<compile_context>
chip_gen: v6e
topology: v6e:2x2x1
jax: 0.10.0
libtpu: 0.0.40
codegen_flags: <defaults>
</compile_context>

<pallas_src>
import numpy as np
import jax
import jax.numpy as jnp
from jax.experimental import pallas as pl
from jax.experimental.pallas import tpu as pltpu


def _vmem_spec():
    return pl.BlockSpec(memory_space=pltpu.MemorySpace.VMEM)


# ----------------------------- Fused kernel --------------------------------
def _hybrid_kernel(
        text_ref, tlen_ref, gid_ref, nodef_ref, adj_ref, pool_ref,
        emb_wih0_ref, b0_ref, whh0_ref, w1cat_ref, b1_ref,
        node_emb_ref,
        gw1a_ref, gc1a_ref, gw2a_ref, gc2a_ref,
        gw1b_ref, gc1b_ref, gw2b_ref, gc2b_ref,
        w0l_ref, w0g_ref, bh0_ref, w1f_ref, bh1f_ref, w2f_ref, bh2f_ref,
        out_ref):
    f32 = jnp.float32
    TB = text_ref.shape[0]
    B = tlen_ref.shape[0]
    T = TB // B
    V = emb_wih0_ref.shape[0]
    H = whh0_ref.shape[0]

    # ---- LSTM: input projection hoisted out of the recurrence (one matmul) ----
    tok_oh = (text_ref[...] ==
              jax.lax.broadcasted_iota(jnp.int32, (TB, V), 1)).astype(f32)
    xg = jnp.dot(tok_oh, emb_wih0_ref[...],
                 preferred_element_type=f32) + b0_ref[...]        # (T*B, 4H)

    whh0 = whh0_ref[...]
    w1cat = w1cat_ref[...]
    b1 = b1_ref[...]
    tl = tlen_ref[...]                                            # (B, 1) float lengths

    def cell(gates, c):
        sig = jax.nn.sigmoid(gates)       # full-vreg EUP pass
        th = jnp.tanh(gates)              # full-vreg EUP pass
        i = sig[:, 0 * H:1 * H]
        f = sig[:, 1 * H:2 * H]
        g = th[:, 2 * H:3 * H]
        o = sig[:, 3 * H:4 * H]
        c_new = f * c + i * g
        h_new = o * jnp.tanh(c_new)
        return h_new, c_new

    h1 = jnp.zeros((B, H), f32)
    c1 = jnp.zeros((B, H), f32)
    h2 = jnp.zeros((B, H), f32)
    c2 = jnp.zeros((B, H), f32)
    for t in range(T):                    # static unroll (T is a compile-time constant)
        valid = tl >= float(t + 1)        # (B, 1) packed-sequence per-step gating
        g0 = xg[t * B:(t + 1) * B, :] + jnp.dot(h1, whh0, preferred_element_type=f32)
        h1n, c1n = cell(g0, c1)
        hcat = jnp.concatenate([h1n, h2], axis=1)                 # (B, 2H)
        g1 = jnp.dot(hcat, w1cat, preferred_element_type=f32) + b1
        h2n, c2n = cell(g1, c2)
        h1 = jnp.where(valid, h1n, h1)
        c1 = jnp.where(valid, c1n, c1)
        h2 = jnp.where(valid, h2n, h2)
        c2 = jnp.where(valid, c2n, c2)

    # pad_packed_sequence + output[:, -1, :]: rows shorter than the batch max are 0
    tmax = jnp.max(tl, axis=0, keepdims=True)                     # (1, 1)
    lstm_out = jnp.where(tl == tmax, h2, 0.0)                     # (B, H)

    # ---- GIN (2 layers, eval mode, BN folded) ---------------------------------
    N = nodef_ref.shape[0]
    NV = node_emb_ref.shape[0]
    node_oh = (nodef_ref[...] ==
               jax.lax.broadcasted_iota(jnp.int32, (N, NV), 1)).astype(f32)
    h = jnp.dot(node_oh, node_emb_ref[...], preferred_element_type=f32)   # (N, D)
    adj = adj_ref[...]

    def gin_layer(h, w1, c1, w2, c2, relu_out):
        # TODO(synk): OGB GINConv adds a bond-encoder edge embedding inside
        # relu(x_j + e); this model has no edge features, so messages are relu(x_j).
        m = jnp.dot(adj, jax.nn.relu(h), preferred_element_type=f32) + h   # eps = 0
        z = jax.nn.relu(jnp.dot(m, w1, preferred_element_type=f32) + c1)
        o = jnp.dot(z, w2, preferred_element_type=f32) + c2
        return jax.nn.relu(o) if relu_out else o

    h = gin_layer(h, gw1a_ref[...], gc1a_ref[...], gw2a_ref[...], gc2a_ref[...], True)
    h = gin_layer(h, gw1b_ref[...], gc1b_ref[...], gw2b_ref[...], gc2b_ref[...], False)
    g_emb = jnp.dot(pool_ref[...], h, preferred_element_type=f32)          # (G, D)

    # ---- g_emb[text[:, 0] - 7] gather + head MLP ------------------------------
    G = pool_ref.shape[0]
    gid_oh = (gid_ref[...] ==
              jax.lax.broadcasted_iota(jnp.int32, (B, G), 1)).astype(f32)
    g_sel = jnp.dot(gid_oh, g_emb, preferred_element_type=f32)             # (B, D)

    f0 = jax.nn.relu(jnp.dot(lstm_out, w0l_ref[...], preferred_element_type=f32)
                     + jnp.dot(g_sel, w0g_ref[...], preferred_element_type=f32)
                     + bh0_ref[...])
    f1 = jax.nn.relu(jnp.dot(f0, w1f_ref[...], preferred_element_type=f32)
                     + bh1f_ref[...])                 # BN0 folded into w1f / bh1f
    out_ref[...] = (jnp.dot(f1, w2f_ref[...], preferred_element_type=f32)
                    + bh2f_ref[...])                  # BN1 folded; lane-dense (B, 128)


# ----------------------------- Parameter setup ------------------------------
def init_params(key, input_dim=20, emb_dim=16, hidden_dim=32, graph_emb=11,
                node_vocab=10, mlp_hidden=100):
    keys = iter(jax.random.split(key, 64))

    def rnd(shape, scale=0.1):
        return (scale * jax.random.normal(next(keys), shape)).astype(jnp.float32)

    def bn_fold(n):
        gamma = 1.0 + 0.1 * jax.random.normal(next(keys), (n,))
        beta = 0.1 * jax.random.normal(next(keys), (n,))
        mean = 0.1 * jax.random.normal(next(keys), (n,))
        var = jax.random.uniform(next(keys), (n,), minval=0.5, maxval=1.5)
        s = gamma / jnp.sqrt(var + 1e-5)
        t = beta - mean * s
        return s.astype(jnp.float32), t.astype(jnp.float32)

    H, E, D = hidden_dim, emb_dim, graph_emb
    p = {}
    # --- LSTM (2 layers). Weights stored transposed: (in_features, 4H) -------
    embedding = rnd((input_dim, E), 1.0)
    wih0 = rnd((E, 4 * H)); whh0 = rnd((H, 4 * H)); b0 = rnd((1, 4 * H))
    wih1 = rnd((H, 4 * H)); whh1 = rnd((H, 4 * H)); b1 = rnd((1, 4 * H))
    p['emb_wih0'] = embedding @ wih0          # fold token embedding into W_ih0
    p['b0'] = b0
    p['whh0'] = whh0
    p['w1cat'] = jnp.concatenate([wih1, whh1], axis=0)   # (2H, 4H) fused layer-1 weight
    p['b1'] = b1
    # --- GIN (2 layers, OGB-style MLP Linear(D,2D)-BN-ReLU-Linear(2D,D)) -----
    p['node_emb'] = rnd((node_vocab, D), 1.0)
    for tag in ('a', 'b'):
        w1 = rnd((D, 2 * D)); bb1 = rnd((1, 2 * D))
        s_m, t_m = bn_fold(2 * D)             # BN inside the GIN MLP
        w2 = rnd((2 * D, D)); bb2 = rnd((1, D))
        s_o, t_o = bn_fold(D)                 # BatchNorm after each GINConv
        p[f'gin_w1{tag}'] = w1 * s_m[None, :]
        p[f'gin_c1{tag}'] = bb1 * s_m[None, :] + t_m[None, :]
        p[f'gin_w2{tag}'] = w2 * s_o[None, :]
        p[f'gin_c2{tag}'] = bb2 * s_o[None, :] + t_o[None, :]
    # --- Head MLP: Linear / ReLU / BN / Linear / ReLU / BN / Linear ----------
    w0 = rnd((H + D, mlp_hidden)); bh0 = rnd((1, mlp_hidden))
    s0, t0 = bn_fold(mlp_hidden)
    w1h = rnd((mlp_hidden, mlp_hidden)); bh1 = rnd((1, mlp_hidden))
    s1, t1 = bn_fold(mlp_hidden)
    w2h = rnd((mlp_hidden, 1)); bh2 = rnd((1, 1))
    p['w0_lstm'] = w0[:H, :]                  # split w0 so the concat is never formed
    p['w0_g'] = w0[H:, :]
    p['bh0'] = bh0
    p['w1f'] = w1h * s0[:, None]              # fold BN0 into the next linear
    p['bh1f'] = bh1 + t0[None, :] @ w1h
    w2f = w2h * s1[:, None]                   # fold BN1 into the last linear
    bh2f = bh2 + t1[None, :] @ w2h
    p['w2f'] = jnp.pad(w2f, ((0, 0), (0, 127)))    # lane-dense (100, 128) output slab
    p['bh2f'] = jnp.pad(bh2f, ((0, 0), (0, 127)))
    return p


# -------------------------------- Forward ----------------------------------
def hybrid_forward(p, text, text_len, node_feat, adj, pool):
    B, T = text.shape
    N = node_feat.shape[0]
    # index plumbing only (tiny int ops); all gathers happen inside the kernel
    text_tm = jnp.transpose(text).reshape(T * B, 1).astype(jnp.int32)   # time-major tokens
    tlen = text_len.astype(jnp.float32).reshape(B, 1)
    gid = (text[:, 0] - 7).reshape(B, 1).astype(jnp.int32)
    nodef = node_feat.reshape(N, 1).astype(jnp.int32)

    args = (text_tm, tlen, gid, nodef, adj, pool,
            p['emb_wih0'], p['b0'], p['whh0'], p['w1cat'], p['b1'],
            p['node_emb'],
            p['gin_w1a'], p['gin_c1a'], p['gin_w2a'], p['gin_c2a'],
            p['gin_w1b'], p['gin_c1b'], p['gin_w2b'], p['gin_c2b'],
            p['w0_lstm'], p['w0_g'], p['bh0'], p['w1f'], p['bh1f'],
            p['w2f'], p['bh2f'])
    out = pl.pallas_call(
        _hybrid_kernel,
        out_shape=jax.ShapeDtypeStruct((B, 128), jnp.float32),
        in_specs=[_vmem_spec()] * len(args),
        out_specs=_vmem_spec(),
    )(*args)
    return out[:, 0]


hybrid_forward = jax.jit(hybrid_forward)


if __name__ == "__main__":
    key = jax.random.PRNGKey(0)
    k_param, k_text, k_node = jax.random.split(key, 3)

    B, T = 4, 8
    input_dim, emb_dim, hidden_dim, graph_emb = 20, 16, 32, 11
    num_graphs, nodes_per_graph, node_vocab = 4, 6, 10
    N = num_graphs * nodes_per_graph

    params = init_params(k_param, input_dim=input_dim, emb_dim=emb_dim,
                         hidden_dim=hidden_dim, graph_emb=graph_emb,
                         node_vocab=node_vocab)

    # text: first token encodes graph id + 7 (as in `g_emb[text[:, 0] - 7]`)
    text = jax.random.randint(k_text, (B, T), 0, input_dim, dtype=jnp.int32)
    text = text.at[:, 0].set(jnp.arange(B, dtype=jnp.int32) % num_graphs + 7)
    text_len = jnp.array([8, 5, 8, 3], dtype=jnp.int32)

    # Graph batch: ring graphs, block-diagonal dense adjacency + mean-pool matrix
    node_feat = jax.random.randint(k_node, (N,), 0, node_vocab, dtype=jnp.int32)
    adj_np = np.zeros((N, N), dtype=np.float32)
    pool_np = np.zeros((num_graphs, N), dtype=np.float32)
    for g in range(num_graphs):
        base = g * nodes_per_graph
        for v in range(nodes_per_graph):
            u = base + v
            w = base + (v + 1) % nodes_per_graph
            adj_np[u, w] = 1.0
            adj_np[w, u] = 1.0
        pool_np[g, base:base + nodes_per_graph] = 1.0 / nodes_per_graph
    adj = jnp.asarray(adj_np)
    pool = jnp.asarray(pool_np)

    flow_out = hybrid_forward(params, text, text_len, node_feat, adj, pool)
    flow_out = jax.block_until_ready(flow_out)
    assert flow_out.shape == (B,)
    print("KERNEL_OK")
</pallas_src>

<mosaic_0001>
module attributes {stable_mosaic.version = 11 : i64} {
  func.func @_hybrid_kernel(%arg0: memref<32x1xi32, #tpu.memory_space<vmem>>, %arg1: memref<4x1xf32, #tpu.memory_space<vmem>>, %arg2: memref<4x1xi32, #tpu.memory_space<vmem>>, %arg3: memref<24x1xi32, #tpu.memory_space<vmem>>, %arg4: memref<24x24xf32, #tpu.memory_space<vmem>>, %arg5: memref<4x24xf32, #tpu.memory_space<vmem>>, %arg6: memref<20x128xf32, #tpu.memory_space<vmem>>, %arg7: memref<1x128xf32, #tpu.memory_space<vmem>>, %arg8: memref<32x128xf32, #tpu.memory_space<vmem>>, %arg9: memref<64x128xf32, #tpu.memory_space<vmem>>, %arg10: memref<1x128xf32, #tpu.memory_space<vmem>>, %arg11: memref<10x11xf32, #tpu.memory_space<vmem>>, %arg12: memref<11x22xf32, #tpu.memory_space<vmem>>, %arg13: memref<1x22xf32, #tpu.memory_space<vmem>>, %arg14: memref<22x11xf32, #tpu.memory_space<vmem>>, %arg15: memref<1x11xf32, #tpu.memory_space<vmem>>, %arg16: memref<11x22xf32, #tpu.memory_space<vmem>>, %arg17: memref<1x22xf32, #tpu.memory_space<vmem>>, %arg18: memref<22x11xf32, #tpu.memory_space<vmem>>, %arg19: memref<1x11xf32, #tpu.memory_space<vmem>>, %arg20: memref<32x100xf32, #tpu.memory_space<vmem>>, %arg21: memref<11x100xf32, #tpu.memory_space<vmem>>, %arg22: memref<1x100xf32, #tpu.memory_space<vmem>>, %arg23: memref<100x100xf32, #tpu.memory_space<vmem>>, %arg24: memref<1x100xf32, #tpu.memory_space<vmem>>, %arg25: memref<100x128xf32, #tpu.memory_space<vmem>>, %arg26: memref<1x128xf32, #tpu.memory_space<vmem>>, %arg27: memref<4x128xf32, #tpu.memory_space<vmem>>) attributes {dimension_semantics = [], scalar_prefetch = 0 : i64, scratch_operands = 0 : i64, tpu.core_type = #tpu.core_type<tc>} {
    %c0 = arith.constant 0 : index
    %c0_0 = arith.constant 0 : index
    %0 = vector.load %arg0[%c0, %c0_0] : memref<32x1xi32, #tpu.memory_space<vmem>>, vector<32x1xi32>
    %1 = tpu.iota {dimensions = array<i32: 1>} : vector<32x20xi32>
    %2 = vector.broadcast %0 : vector<32x1xi32> to vector<32x20xi32>
    %3 = arith.cmpi eq, %2, %1 : vector<32x20xi32>
    %4 = arith.extui %3 : vector<32x20xi1> to vector<32x20xi32>
    %5 = arith.sitofp %4 : vector<32x20xi32> to vector<32x20xf32>
    %c0_1 = arith.constant 0 : index
    %c0_2 = arith.constant 0 : index
    %6 = vector.load %arg6[%c0_1, %c0_2] : memref<20x128xf32, #tpu.memory_space<vmem>>, vector<20x128xf32>
    %cst = arith.constant dense<0.000000e+00> : vector<32x128xf32>
    %7 = tpu.matmul %5, %6, %cst {dimension_numbers = #tpu.dot_dimension_numbers<[1], [0], [0], [1], [0, 0, 1, 1], [], []>} : vector<32x20xf32>, vector<20x128xf32>, vector<32x128xf32> -> vector<32x128xf32>
    %c0_3 = arith.constant 0 : index
    %c0_4 = arith.constant 0 : index
    %8 = vector.load %arg7[%c0_3, %c0_4] : memref<1x128xf32, #tpu.memory_space<vmem>>, vector<1x128xf32>
    %9 = vector.broadcast %8 : vector<1x128xf32> to vector<32x128xf32>
    %10 = arith.addf %7, %9 : vector<32x128xf32>
    %c0_5 = arith.constant 0 : index
    %c0_6 = arith.constant 0 : index
    %11 = vector.load %arg8[%c0_5, %c0_6] : memref<32x128xf32, #tpu.memory_space<vmem>>, vector<32x128xf32>
    %c0_7 = arith.constant 0 : index
    %c0_8 = arith.constant 0 : index
    %12 = vector.load %arg9[%c0_7, %c0_8] : memref<64x128xf32, #tpu.memory_space<vmem>>, vector<64x128xf32>
    %c0_9 = arith.constant 0 : index
    %c0_10 = arith.constant 0 : index
    %13 = vector.load %arg10[%c0_9, %c0_10] : memref<1x128xf32, #tpu.memory_space<vmem>>, vector<1x128xf32>
    %c0_11 = arith.constant 0 : index
    %c0_12 = arith.constant 0 : index
    %14 = vector.load %arg1[%c0_11, %c0_12] : memref<4x1xf32, #tpu.memory_space<vmem>>, vector<4x1xf32>
    %cst_13 = arith.constant 0.000000e+00 : f32
    %15 = vector.broadcast %cst_13 : f32 to vector<4x32xf32>
    %cst_14 = arith.constant 0.000000e+00 : f32
    %16 = vector.broadcast %cst_14 : f32 to vector<4x32xf32>
    %cst_15 = arith.constant 0.000000e+00 : f32
    %17 = vector.broadcast %cst_15 : f32 to vector<4x32xf32>
    %cst_16 = arith.constant 0.000000e+00 : f32
    %18 = vector.broadcast %cst_16 : f32 to vector<4x32xf32>
    %cst_17 = arith.constant 1.000000e+00 : f32
    %19 = vector.broadcast %cst_17 : f32 to vector<4x1xf32>
    %20 = arith.cmpf oge, %14, %19 : vector<4x1xf32>
    %21 = vector.extract_strided_slice %10 {offsets = [0, 0], sizes = [4, 128], strides = [1, 1]} : vector<32x128xf32> to vector<4x128xf32>
    %cst_18 = arith.constant dense<0.000000e+00> : vector<4x128xf32>
    %22 = tpu.matmul %15, %11, %cst_18 {dimension_numbers = #tpu.dot_dimension_numbers<[1], [0], [0], [1], [0, 0, 1, 1], [], []>} : vector<4x32xf32>, vector<32x128xf32>, vector<4x128xf32> -> vector<4x128xf32>
    %23 = arith.addf %21, %22 : vector<4x128xf32>
    %24 = arith.negf %23 : vector<4x128xf32>
    %25 = math.exp %24 : vector<4x128xf32>
    %cst_19 = arith.constant 1.000000e+00 : f32
    %26 = vector.broadcast %cst_19 : f32 to vector<4x128xf32>
    %27 = arith.addf %26, %25 : vector<4x128xf32>
    %28 = arith.divf %26, %27 : vector<4x128xf32>
    %29 = math.tanh %23 : vector<4x128xf32>
    %30 = vector.extract_strided_slice %28 {offsets = [0, 0], sizes = [4, 32], strides = [1, 1]} : vector<4x128xf32> to vector<4x32xf32>
    %31 = vector.extract_strided_slice %28 {offsets = [0, 32], sizes = [4, 32], strides = [1, 1]} : vector<4x128xf32> to vector<4x32xf32>
    %32 = vector.extract_strided_slice %29 {offsets = [0, 64], sizes = [4, 32], strides = [1, 1]} : vector<4x128xf32> to vector<4x32xf32>
    %33 = vector.extract_strided_slice %28 {offsets = [0, 96], sizes = [4, 32], strides = [1, 1]} : vector<4x128xf32> to vector<4x32xf32>
    %34 = arith.mulf %31, %16 : vector<4x32xf32>
    %35 = arith.mulf %30, %32 : vector<4x32xf32>
    %36 = arith.addf %34, %35 : vector<4x32xf32>
    %37 = math.tanh %36 : vector<4x32xf32>
    %38 = arith.mulf %33, %37 : vector<4x32xf32>
    %39 = tpu.concatenate %38, %17 in 1 : vector<4x32xf32>, vector<4x32xf32> -> vector<4x64xf32>
    %cst_20 = arith.constant dense<0.000000e+00> : vector<4x128xf32>
    %40 = tpu.matmul %39, %12, %cst_20 {dimension_numbers = #tpu.dot_dimension_numbers<[1], [0], [0], [1], [0, 0, 1, 1], [], []>} : vector<4x64xf32>, vector<64x128xf32>, vector<4x128xf32> -> vector<4x128xf32>
    %41 = vector.broadcast %13 : vector<1x128xf32> to vector<4x128xf32>
    %42 = arith.addf %40, %41 : vector<4x128xf32>
    %43 = arith.negf %42 : vector<4x128xf32>
    %44 = math.exp %43 : vector<4x128xf32>
    %cst_21 = arith.constant 1.000000e+00 : f32
    %45 = vector.broadcast %cst_21 : f32 to vector<4x128xf32>
    %46 = arith.addf %45, %44 : vector<4x128xf32>
    %47 = arith.divf %45, %46 : vector<4x128xf32>
    %48 = math.tanh %42 : vector<4x128xf32>
    %49 = vector.extract_strided_slice %47 {offsets = [0, 0], sizes = [4, 32], strides = [1, 1]} : vector<4x128xf32> to vector<4x32xf32>
    %50 = vector.extract_strided_slice %47 {offsets = [0, 32], sizes = [4, 32], strides = [1, 1]} : vector<4x128xf32> to vector<4x32xf32>
    %51 = vector.extract_strided_slice %48 {offsets = [0, 64], sizes = [4, 32], strides = [1, 1]} : vector<4x128xf32> to vector<4x32xf32>
    %52 = vector.extract_strided_slice %47 {offsets = [0, 96], sizes = [4, 32], strides = [1, 1]} : vector<4x128xf32> to vector<4x32xf32>
    %53 = arith.mulf %50, %18 : vector<4x32xf32>
    %54 = arith.mulf %49, %51 : vector<4x32xf32>
    %55 = arith.addf %53, %54 : vector<4x32xf32>
    %56 = math.tanh %55 : vector<4x32xf32>
    %57 = arith.mulf %52, %56 : vector<4x32xf32>
    %58 = vector.shape_cast %20 : vector<4x1xi1> to vector<4x1xi1>
    %59 = vector.broadcast %58 : vector<4x1xi1> to vector<4x32xi1>
    %60 = arith.select %59, %38, %15 : vector<4x32xi1>, vector<4x32xf32>
    %61 = vector.shape_cast %20 : vector<4x1xi1> to vector<4x1xi1>
    %62 = vector.broadcast %61 : vector<4x1xi1> to vector<4x32xi1>
    %63 = arith.select %62, %36, %16 : vector<4x32xi1>, vector<4x32xf32>
    %64 = vector.shape_cast %20 : vector<4x1xi1> to vector<4x1xi1>
    %65 = vector.broadcast %64 : vector<4x1xi1> to vector<4x32xi1>
    %66 = arith.select %65, %57, %17 : vector<4x32xi1>, vector<4x32xf32>
    %67 = vector.shape_cast %20 : vector<4x1xi1> to vector<4x1xi1>
    %68 = vector.broadcast %67 : vector<4x1xi1> to vector<4x32xi1>
    %69 = arith.select %68, %55, %18 : vector<4x32xi1>, vector<4x32xf32>
    %cst_22 = arith.constant 2.000000e+00 : f32
    %70 = vector.broadcast %cst_22 : f32 to vector<4x1xf32>
    %71 = arith.cmpf oge, %14, %70 : vector<4x1xf32>
    %72 = vector.extract_strided_slice %10 {offsets = [4, 0], sizes = [4, 128], strides = [1, 1]} : vector<32x128xf32> to vector<4x128xf32>
    %cst_23 = arith.constant dense<0.000000e+00> : vector<4x128xf32>
    %73 = tpu.matmul %60, %11, %cst_23 {dimension_numbers = #tpu.dot_dimension_numbers<[1], [0], [0], [1], [0, 0, 1, 1], [], []>} : vector<4x32xf32>, vector<32x128xf32>, vector<4x128xf32> -> vector<4x128xf32>
    %74 = arith.addf %72, %73 : vector<4x128xf32>
    %75 = arith.negf %74 : vector<4x128xf32>
    %76 = math.exp %75 : vector<4x128xf32>
    %cst_24 = arith.constant 1.000000e+00 : f32
    %77 = vector.broadcast %cst_24 : f32 to vector<4x128xf32>
    %78 = arith.addf %77, %76 : vector<4x128xf32>
    %79 = arith.divf %77, %78 : vector<4x128xf32>
    %80 = math.tanh %74 : vector<4x128xf32>
    %81 = vector.extract_strided_slice %79 {offsets = [0, 0], sizes = [4, 32], strides = [1, 1]} : vector<4x128xf32> to vector<4x32xf32>
    %82 = vector.extract_strided_slice %79 {offsets = [0, 32], sizes = [4, 32], strides = [1, 1]} : vector<4x128xf32> to vector<4x32xf32>
    %83 = vector.extract_strided_slice %80 {offsets = [0, 64], sizes = [4, 32], strides = [1, 1]} : vector<4x128xf32> to vector<4x32xf32>
    %84 = vector.extract_strided_slice %79 {offsets = [0, 96], sizes = [4, 32], strides = [1, 1]} : vector<4x128xf32> to vector<4x32xf32>
    %85 = arith.mulf %82, %63 : vector<4x32xf32>
    %86 = arith.mulf %81, %83 : vector<4x32xf32>
    %87 = arith.addf %85, %86 : vector<4x32xf32>
    %88 = math.tanh %87 : vector<4x32xf32>
    %89 = arith.mulf %84, %88 : vector<4x32xf32>
    %90 = tpu.concatenate %89, %66 in 1 : vector<4x32xf32>, vector<4x32xf32> -> vector<4x64xf32>
    %cst_25 = arith.constant dense<0.000000e+00> : vector<4x128xf32>
    %91 = tpu.matmul %90, %12, %cst_25 {dimension_numbers = #tpu.dot_dimension_numbers<[1], [0], [0], [1], [0, 0, 1, 1], [], []>} : vector<4x64xf32>, vector<64x128xf32>, vector<4x128xf32> -> vector<4x128xf32>
    %92 = vector.broadcast %13 : vector<1x128xf32> to vector<4x128xf32>
    %93 = arith.addf %91, %92 : vector<4x128xf32>
    %94 = arith.negf %93 : vector<4x128xf32>
    %95 = math.exp %94 : vector<4x128xf32>
    %cst_26 = arith.constant 1.000000e+00 : f32
    %96 = vector.broadcast %cst_26 : f32 to vector<4x128xf32>
    %97 = arith.addf %96, %95 : vector<4x128xf32>
    %98 = arith.divf %96, %97 : vector<4x128xf32>
    %99 = math.tanh %93 : vector<4x128xf32>
    %100 = vector.extract_strided_slice %98 {offsets = [0, 0], sizes = [4, 32], strides = [1, 1]} : vector<4x128xf32> to vector<4x32xf32>
    %101 = vector.extract_strided_slice %98 {offsets = [0, 32], sizes = [4, 32], strides = [1, 1]} : vector<4x128xf32> to vector<4x32xf32>
    %102 = vector.extract_strided_slice %99 {offsets = [0, 64], sizes = [4, 32], strides = [1, 1]} : vector<4x128xf32> to vector<4x32xf32>
    %103 = vector.extract_strided_slice %98 {offsets = [0, 96], sizes = [4, 32], strides = [1, 1]} : vector<4x128xf32> to vector<4x32xf32>
    %104 = arith.mulf %101, %69 : vector<4x32xf32>
    %105 = arith.mulf %100, %102 : vector<4x32xf32>
    %106 = arith.addf %104, %105 : vector<4x32xf32>
    %107 = math.tanh %106 : vector<4x32xf32>
    %108 = arith.mulf %103, %107 : vector<4x32xf32>
    %109 = vector.shape_cast %71 : vector<4x1xi1> to vector<4x1xi1>
    %110 = vector.broadcast %109 : vector<4x1xi1> to vector<4x32xi1>
    %111 = arith.select %110, %89, %60 : vector<4x32xi1>, vector<4x32xf32>
    %112 = vector.shape_cast %71 : vector<4x1xi1> to vector<4x1xi1>
    %113 = vector.broadcast %112 : vector<4x1xi1> to vector<4x32xi1>
    %114 = arith.select %113, %87, %63 : vector<4x32xi1>, vector<4x32xf32>
    %115 = vector.shape_cast %71 : vector<4x1xi1> to vector<4x1xi1>
    %116 = vector.broadcast %115 : vector<4x1xi1> to vector<4x32xi1>
    %117 = arith.select %116, %108, %66 : vector<4x32xi1>, vector<4x32xf32>
    %118 = vector.shape_cast %71 : vector<4x1xi1> to vector<4x1xi1>
    %119 = vector.broadcast %118 : vector<4x1xi1> to vector<4x32xi1>
    %120 = arith.select %119, %106, %69 : vector<4x32xi1>, vector<4x32xf32>
    %cst_27 = arith.constant 3.000000e+00 : f32
    %121 = vector.broadcast %cst_27 : f32 to vector<4x1xf32>
    %122 = arith.cmpf oge, %14, %121 : vector<4x1xf32>
    %123 = vector.extract_strided_slice %10 {offsets = [8, 0], sizes = [4, 128], strides = [1, 1]} : vector<32x128xf32> to vector<4x128xf32>
    %cst_28 = arith.constant dense<0.000000e+00> : vector<4x128xf32>
    %124 = tpu.matmul %111, %11, %cst_28 {dimension_numbers = #tpu.dot_dimension_numbers<[1], [0], [0], [1], [0, 0, 1, 1], [], []>} : vector<4x32xf32>, vector<32x128xf32>, vector<4x128xf32> -> vector<4x128xf32>
    %125 = arith.addf %123, %124 : vector<4x128xf32>
    %126 = arith.negf %125 : vector<4x128xf32>
    %127 = math.exp %126 : vector<4x128xf32>
    %cst_29 = arith.constant 1.000000e+00 : f32
    %128 = vector.broadcast %cst_29 : f32 to vector<4x128xf32>
    %129 = arith.addf %128, %127 : vector<4x128xf32>
    %130 = arith.divf %128, %129 : vector<4x128xf32>
    %131 = math.tanh %125 : vector<4x128xf32>
    %132 = vector.extract_strided_slice %130 {offsets = [0, 0], sizes = [4, 32], strides = [1, 1]} : vector<4x128xf32> to vector<4x32xf32>
    %133 = vector.extract_strided_slice %130 {offsets = [0, 32], sizes = [4, 32], strides = [1, 1]} : vector<4x128xf32> to vector<4x32xf32>
    %134 = vector.extract_strided_slice %131 {offsets = [0, 64], sizes = [4, 32], strides = [1, 1]} : vector<4x128xf32> to vector<4x32xf32>
    %135 = vector.extract_strided_slice %130 {offsets = [0, 96], sizes = [4, 32], strides = [1, 1]} : vector<4x128xf32> to vector<4x32xf32>
    %136 = arith.mulf %133, %114 : vector<4x32xf32>
    %137 = arith.mulf %132, %134 : vector<4x32xf32>
    %138 = arith.addf %136, %137 : vector<4x32xf32>
    %139 = math.tanh %138 : vector<4x32xf32>
    %140 = arith.mulf %135, %139 : vector<4x32xf32>
    %141 = tpu.concatenate %140, %117 in 1 : vector<4x32xf32>, vector<4x32xf32> -> vector<4x64xf32>
    %cst_30 = arith.constant dense<0.000000e+00> : vector<4x128xf32>
    %142 = tpu.matmul %141, %12, %cst_30 {dimension_numbers = #tpu.dot_dimension_numbers<[1], [0], [0], [1], [0, 0, 1, 1], [], []>} : vector<4x64xf32>, vector<64x128xf32>, vector<4x128xf32> -> vector<4x128xf32>
    %143 = vector.broadcast %13 : vector<1x128xf32> to vector<4x128xf32>
    %144 = arith.addf %142, %143 : vector<4x128xf32>
    %145 = arith.negf %144 : vector<4x128xf32>
    %146 = math.exp %145 : vector<4x128xf32>
    %cst_31 = arith.constant 1.000000e+00 : f32
    %147 = vector.broadcast %cst_31 : f32 to vector<4x128xf32>
    %148 = arith.addf %147, %146 : vector<4x128xf32>
    %149 = arith.divf %147, %148 : vector<4x128xf32>
    %150 = math.tanh %144 : vector<4x128xf32>
    %151 = vector.extract_strided_slice %149 {offsets = [0, 0], sizes = [4, 32], strides = [1, 1]} : vector<4x128xf32> to vector<4x32xf32>
    %152 = vector.extract_strided_slice %149 {offsets = [0, 32], sizes = [4, 32], strides = [1, 1]} : vector<4x128xf32> to vector<4x32xf32>
    %153 = vector.extract_strided_slice %150 {offsets = [0, 64], sizes = [4, 32], strides = [1, 1]} : vector<4x128xf32> to vector<4x32xf32>
    %154 = vector.extract_strided_slice %149 {offsets = [0, 96], sizes = [4, 32], strides = [1, 1]} : vector<4x128xf32> to vector<4x32xf32>
    %155 = arith.mulf %152, %120 : vector<4x32xf32>
    %156 = arith.mulf %151, %153 : vector<4x32xf32>
    %157 = arith.addf %155, %156 : vector<4x32xf32>
    %158 = math.tanh %157 : vector<4x32xf32>
    %159 = arith.mulf %154, %158 : vector<4x32xf32>
    %160 = vector.shape_cast %122 : vector<4x1xi1> to vector<4x1xi1>
    %161 = vector.broadcast %160 : vector<4x1xi1> to vector<4x32xi1>
    %162 = arith.select %161, %140, %111 : vector<4x32xi1>, vector<4x32xf32>
    %163 = vector.shape_cast %122 : vector<4x1xi1> to vector<4x1xi1>
    %164 = vector.broadcast %163 : vector<4x1xi1> to vector<4x32xi1>
    %165 = arith.select %164, %138, %114 : vector<4x32xi1>, vector<4x32xf32>
    %166 = vector.shape_cast %122 : vector<4x1xi1> to vector<4x1xi1>
    %167 = vector.broadcast %166 : vector<4x1xi1> to vector<4x32xi1>
    %168 = arith.select %167, %159, %117 : vector<4x32xi1>, vector<4x32xf32>
    %169 = vector.shape_cast %122 : vector<4x1xi1> to vector<4x1xi1>
    %170 = vector.broadcast %169 : vector<4x1xi1> to vector<4x32xi1>
    %171 = arith.select %170, %157, %120 : vector<4x32xi1>, vector<4x32xf32>
    %cst_32 = arith.constant 4.000000e+00 : f32
    %172 = vector.broadcast %cst_32 : f32 to vector<4x1xf32>
    %173 = arith.cmpf oge, %14, %172 : vector<4x1xf32>
    %174 = vector.extract_strided_slice %10 {offsets = [12, 0], sizes = [4, 128], strides = [1, 1]} : vector<32x128xf32> to vector<4x128xf32>
    %cst_33 = arith.constant dense<0.000000e+00> : vector<4x128xf32>
    %175 = tpu.matmul %162, %11, %cst_33 {dimension_numbers = #tpu.dot_dimension_numbers<[1], [0], [0], [1], [0, 0, 1, 1], [], []>} : vector<4x32xf32>, vector<32x128xf32>, vector<4x128xf32> -> vector<4x128xf32>
    %176 = arith.addf %174, %175 : vector<4x128xf32>
    %177 = arith.negf %176 : vector<4x128xf32>
    %178 = math.exp %177 : vector<4x128xf32>
    %cst_34 = arith.constant 1.000000e+00 : f32
    %179 = vector.broadcast %cst_34 : f32 to vector<4x128xf32>
    %180 = arith.addf %179, %178 : vector<4x128xf32>
    %181 = arith.divf %179, %180 : vector<4x128xf32>
    %182 = math.tanh %176 : vector<4x128xf32>
    %183 = vector.extract_strided_slice %181 {offsets = [0, 0], sizes = [4, 32], strides = [1, 1]} : vector<4x128xf32> to vector<4x32xf32>
    %184 = vector.extract_strided_slice %181 {offsets = [0, 32], sizes = [4, 32], strides = [1, 1]} : vector<4x128xf32> to vector<4x32xf32>
    %185 = vector.extract_strided_slice %182 {offsets = [0, 64], sizes = [4, 32], strides = [1, 1]} : vector<4x128xf32> to vector<4x32xf32>
    %186 = vector.extract_strided_slice %181 {offsets = [0, 96], sizes = [4, 32], strides = [1, 1]} : vector<4x128xf32> to vector<4x32xf32>
    %187 = arith.mulf %184, %165 : vector<4x32xf32>
    %188 = arith.mulf %183, %185 : vector<4x32xf32>
    %189 = arith.addf %187, %188 : vector<4x32xf32>
    %190 = math.tanh %189 : vector<4x32xf32>
    %191 = arith.mulf %186, %190 : vector<4x32xf32>
    %192 = tpu.concatenate %191, %168 in 1 : vector<4x32xf32>, vector<4x32xf32> -> vector<4x64xf32>
    %cst_35 = arith.constant dense<0.000000e+00> : vector<4x128xf32>
    %193 = tpu.matmul %192, %12, %cst_35 {dimension_numbers = #tpu.dot_dimension_numbers<[1], [0], [0], [1], [0, 0, 1, 1], [], []>} : vector<4x64xf32>, vector<64x128xf32>, vector<4x128xf32> -> vector<4x128xf32>
    %194 = vector.broadcast %13 : vector<1x128xf32> to vector<4x128xf32>
    %195 = arith.addf %193, %194 : vector<4x128xf32>
    %196 = arith.negf %195 : vector<4x128xf32>
    %197 = math.exp %196 : vector<4x128xf32>
    %cst_36 = arith.constant 1.000000e+00 : f32
    %198 = vector.broadcast %cst_36 : f32 to vector<4x128xf32>
    %199 = arith.addf %198, %197 : vector<4x128xf32>
    %200 = arith.divf %198, %199 : vector<4x128xf32>
    %201 = math.tanh %195 : vector<4x128xf32>
    %202 = vector.extract_strided_slice %200 {offsets = [0, 0], sizes = [4, 32], strides = [1, 1]} : vector<4x128xf32> to vector<4x32xf32>
    %203 = vector.extract_strided_slice %200 {offsets = [0, 32], sizes = [4, 32], strides = [1, 1]} : vector<4x128xf32> to vector<4x32xf32>
    %204 = vector.extract_strided_slice %201 {offsets = [0, 64], sizes = [4, 32], strides = [1, 1]} : vector<4x128xf32> to vector<4x32xf32>
    %205 = vector.extract_strided_slice %200 {offsets = [0, 96], sizes = [4, 32], strides = [1, 1]} : vector<4x128xf32> to vector<4x32xf32>
    %206 = arith.mulf %203, %171 : vector<4x32xf32>
    %207 = arith.mulf %202, %204 : vector<4x32xf32>
    %208 = arith.addf %206, %207 : vector<4x32xf32>
    %209 = math.tanh %208 : vector<4x32xf32>
    %210 = arith.mulf %205, %209 : vector<4x32xf32>
    %211 = vector.shape_cast %173 : vector<4x1xi1> to vector<4x1xi1>
    %212 = vector.broadcast %211 : vector<4x1xi1> to vector<4x32xi1>
    %213 = arith.select %212, %191, %162 : vector<4x32xi1>, vector<4x32xf32>
    %214 = vector.shape_cast %173 : vector<4x1xi1> to vector<4x1xi1>
    %215 = vector.broadcast %214 : vector<4x1xi1> to vector<4x32xi1>
    %216 = arith.select %215, %189, %165 : vector<4x32xi1>, vector<4x32xf32>
    %217 = vector.shape_cast %173 : vector<4x1xi1> to vector<4x1xi1>
    %218 = vector.broadcast %217 : vector<4x1xi1> to vector<4x32xi1>
    %219 = arith.select %218, %210, %168 : vector<4x32xi1>, vector<4x32xf32>
    %220 = vector.shape_cast %173 : vector<4x1xi1> to vector<4x1xi1>
    %221 = vector.broadcast %220 : vector<4x1xi1> to vector<4x32xi1>
    %222 = arith.select %221, %208, %171 : vector<4x32xi1>, vector<4x32xf32>
    %cst_37 = arith.constant 5.000000e+00 : f32
    %223 = vector.broadcast %cst_37 : f32 to vector<4x1xf32>
    %224 = arith.cmpf oge, %14, %223 : vector<4x1xf32>
    %225 = vector.extract_strided_slice %10 {offsets = [16, 0], sizes = [4, 128], strides = [1, 1]} : vector<32x128xf32> to vector<4x128xf32>
    %cst_38 = arith.constant dense<0.000000e+00> : vector<4x128xf32>
    %226 = tpu.matmul %213, %11, %cst_38 {dimension_numbers = #tpu.dot_dimension_numbers<[1], [0], [0], [1], [0, 0, 1, 1], [], []>} : vector<4x32xf32>, vector<32x128xf32>, vector<4x128xf32> -> vector<4x128xf32>
    %227 = arith.addf %225, %226 : vector<4x128xf32>
    %228 = arith.negf %227 : vector<4x128xf32>
    %229 = math.exp %228 : vector<4x128xf32>
    %cst_39 = arith.constant 1.000000e+00 : f32
    %230 = vector.broadcast %cst_39 : f32 to vector<4x128xf32>
    %231 = arith.addf %230, %229 : vector<4x128xf32>
    %232 = arith.divf %230, %231 : vector<4x128xf32>
    %233 = math.tanh %227 : vector<4x128xf32>
    %234 = vector.extract_strided_slice %232 {offsets = [0, 0], sizes = [4, 32], strides = [1, 1]} : vector<4x128xf32> to vector<4x32xf32>
    %235 = vector.extract_strided_slice %232 {offsets = [0, 32], sizes = [4, 32], strides = [1, 1]} : vector<4x128xf32> to vector<4x32xf32>
    %236 = vector.extract_strided_slice %233 {offsets = [0, 64], sizes = [4, 32], strides = [1, 1]} : vector<4x128xf32> to vector<4x32xf32>
    %237 = vector.extract_strided_slice %232 {offsets = [0, 96], sizes = [4, 32], strides = [1, 1]} : vector<4x128xf32> to vector<4x32xf32>
    %238 = arith.mulf %235, %216 : vector<4x32xf32>
    %239 = arith.mulf %234, %236 : vector<4x32xf32>
    %240 = arith.addf %238, %239 : vector<4x32xf32>
    %241 = math.tanh %240 : vector<4x32xf32>
    %242 = arith.mulf %237, %241 : vector<4x32xf32>
    %243 = tpu.concatenate %242, %219 in 1 : vector<4x32xf32>, vector<4x32xf32> -> vector<4x64xf32>
    %cst_40 = arith.constant dense<0.000000e+00> : vector<4x128xf32>
    %244 = tpu.matmul %243, %12, %cst_40 {dimension_numbers = #tpu.dot_dimension_numbers<[1], [0], [0], [1], [0, 0, 1, 1], [], []>} : vector<4x64xf32>, vector<64x128xf32>, vector<4x128xf32> -> vector<4x128xf32>
    %245 = vector.broadcast %13 : vector<1x128xf32> to vector<4x128xf32>
    %246 = arith.addf %244, %245 : vector<4x128xf32>
    %247 = arith.negf %246 : vector<4x128xf32>
    %248 = math.exp %247 : vector<4x128xf32>
    %cst_41 = arith.constant 1.000000e+00 : f32
    %249 = vector.broadcast %cst_41 : f32 to vector<4x128xf32>
    %250 = arith.addf %249, %248 : vector<4x128xf32>
    %251 = arith.divf %249, %250 : vector<4x128xf32>
    %252 = math.tanh %246 : vector<4x128xf32>
    %253 = vector.extract_strided_slice %251 {offsets = [0, 0], sizes = [4, 32], strides = [1, 1]} : vector<4x128xf32> to vector<4x32xf32>
    %254 = vector.extract_strided_slice %251 {offsets = [0, 32], sizes = [4, 32], strides = [1, 1]} : vector<4x128xf32> to vector<4x32xf32>
    %255 = vector.extract_strided_slice %252 {offsets = [0, 64], sizes = [4, 32], strides = [1, 1]} : vector<4x128xf32> to vector<4x32xf32>
    %256 = vector.extract_strided_slice %251 {offsets = [0, 96], sizes = [4, 32], strides = [1, 1]} : vector<4x128xf32> to vector<4x32xf32>
    %257 = arith.mulf %254, %222 : vector<4x32xf32>
    %258 = arith.mulf %253, %255 : vector<4x32xf32>
    %259 = arith.addf %257, %258 : vector<4x32xf32>
    %260 = math.tanh %259 : vector<4x32xf32>
    %261 = arith.mulf %256, %260 : vector<4x32xf32>
    %262 = vector.shape_cast %224 : vector<4x1xi1> to vector<4x1xi1>
    %263 = vector.broadcast %262 : vector<4x1xi1> to vector<4x32xi1>
    %264 = arith.select %263, %242, %213 : vector<4x32xi1>, vector<4x32xf32>
    %265 = vector.shape_cast %224 : vector<4x1xi1> to vector<4x1xi1>
    %266 = vector.broadcast %265 : vector<4x1xi1> to vector<4x32xi1>
    %267 = arith.select %266, %240, %216 : vector<4x32xi1>, vector<4x32xf32>
    %268 = vector.shape_cast %224 : vector<4x1xi1> to vector<4x1xi1>
    %269 = vector.broadcast %268 : vector<4x1xi1> to vector<4x32xi1>
    %270 = arith.select %269, %261, %219 : vector<4x32xi1>, vector<4x32xf32>
    %271 = vector.shape_cast %224 : vector<4x1xi1> to vector<4x1xi1>
    %272 = vector.broadcast %271 : vector<4x1xi1> to vector<4x32xi1>
    %273 = arith.select %272, %259, %222 : vector<4x32xi1>, vector<4x32xf32>
    %cst_42 = arith.constant 6.000000e+00 : f32
    %274 = vector.broadcast %cst_42 : f32 to vector<4x1xf32>
    %275 = arith.cmpf oge, %14, %274 : vector<4x1xf32>
    %276 = vector.extract_strided_slice %10 {offsets = [20, 0], sizes = [4, 128], strides = [1, 1]} : vector<32x128xf32> to vector<4x128xf32>
    %cst_43 = arith.constant dense<0.000000e+00> : vector<4x128xf32>
    %277 = tpu.matmul %264, %11, %cst_43 {dimension_numbers = #tpu.dot_dimension_numbers<[1], [0], [0], [1], [0, 0, 1, 1], [], []>} : vector<4x32xf32>, vector<32x128xf32>, vector<4x128xf32> -> vector<4x128xf32>
    %278 = arith.addf %276, %277 : vector<4x128xf32>
    %279 = arith.negf %278 : vector<4x128xf32>
    %280 = math.exp %279 : vector<4x128xf32>
    %cst_44 = arith.constant 1.000000e+00 : f32
    %281 = vector.broadcast %cst_44 : f32 to vector<4x128xf32>
    %282 = arith.addf %281, %280 : vector<4x128xf32>
    %283 = arith.divf %281, %282 : vector<4x128xf32>
    %284 = math.tanh %278 : vector<4x128xf32>
    %285 = vector.extract_strided_slice %283 {offsets = [0, 0], sizes = [4, 32], strides = [1, 1]} : vector<4x128xf32> to vector<4x32xf32>
    %286 = vector.extract_strided_slice %283 {offsets = [0, 32], sizes = [4, 32], strides = [1, 1]} : vector<4x128xf32> to vector<4x32xf32>
    %287 = vector.extract_strided_slice %284 {offsets = [0, 64], sizes = [4, 32], strides = [1, 1]} : vector<4x128xf32> to vector<4x32xf32>
    %288 = vector.extract_strided_slice %283 {offsets = [0, 96], sizes = [4, 32], strides = [1, 1]} : vector<4x128xf32> to vector<4x32xf32>
    %289 = arith.mulf %286, %267 : vector<4x32xf32>
    %290 = arith.mulf %285, %287 : vector<4x32xf32>
    %291 = arith.addf %289, %290 : vector<4x32xf32>
    %292 = math.tanh %291 : vector<4x32xf32>
    %293 = arith.mulf %288, %292 : vector<4x32xf32>
    %294 = tpu.concatenate %293, %270 in 1 : vector<4x32xf32>, vector<4x32xf32> -> vector<4x64xf32>
    %cst_45 = arith.constant dense<0.000000e+00> : vector<4x128xf32>
    %295 = tpu.matmul %294, %12, %cst_45 {dimension_numbers = #tpu.dot_dimension_numbers<[1], [0], [0], [1], [0, 0, 1, 1], [], []>} : vector<4x64xf32>, vector<64x128xf32>, vector<4x128xf32> -> vector<4x128xf32>
    %296 = vector.broadcast %13 : vector<1x128xf32> to vector<4x128xf32>
    %297 = arith.addf %295, %296 : vector<4x128xf32>
    %298 = arith.negf %297 : vector<4x128xf32>
    %299 = math.exp %298 : vector<4x128xf32>
    %cst_46 = arith.constant 1.000000e+00 : f32
    %300 = vector.broadcast %cst_46 : f32 to vector<4x128xf32>
    %301 = arith.addf %300, %299 : vector<4x128xf32>
    %302 = arith.divf %300, %301 : vector<4x128xf32>
    %303 = math.tanh %297 : vector<4x128xf32>
    %304 = vector.extract_strided_slice %302 {offsets = [0, 0], sizes = [4, 32], strides = [1, 1]} : vector<4x128xf32> to vector<4x32xf32>
    %305 = vector.extract_strided_slice %302 {offsets = [0, 32], sizes = [4, 32], strides = [1, 1]} : vector<4x128xf32> to vector<4x32xf32>
    %306 = vector.extract_strided_slice %303 {offsets = [0, 64], sizes = [4, 32], strides = [1, 1]} : vector<4x128xf32> to vector<4x32xf32>
    %307 = vector.extract_strided_slice %302 {offsets = [0, 96], sizes = [4, 32], strides = [1, 1]} : vector<4x128xf32> to vector<4x32xf32>
    %308 = arith.mulf %305, %273 : vector<4x32xf32>
    %309 = arith.mulf %304, %306 : vector<4x32xf32>
    %310 = arith.addf %308, %309 : vector<4x32xf32>
    %311 = math.tanh %310 : vector<4x32xf32>
    %312 = arith.mulf %307, %311 : vector<4x32xf32>
    %313 = vector.shape_cast %275 : vector<4x1xi1> to vector<4x1xi1>
    %314 = vector.broadcast %313 : vector<4x1xi1> to vector<4x32xi1>
    %315 = arith.select %314, %293, %264 : vector<4x32xi1>, vector<4x32xf32>
    %316 = vector.shape_cast %275 : vector<4x1xi1> to vector<4x1xi1>
    %317 = vector.broadcast %316 : vector<4x1xi1> to vector<4x32xi1>
    %318 = arith.select %317, %291, %267 : vector<4x32xi1>, vector<4x32xf32>
    %319 = vector.shape_cast %275 : vector<4x1xi1> to vector<4x1xi1>
    %320 = vector.broadcast %319 : vector<4x1xi1> to vector<4x32xi1>
    %321 = arith.select %320, %312, %270 : vector<4x32xi1>, vector<4x32xf32>
    %322 = vector.shape_cast %275 : vector<4x1xi1> to vector<4x1xi1>
    %323 = vector.broadcast %322 : vector<4x1xi1> to vector<4x32xi1>
    %324 = arith.select %323, %310, %273 : vector<4x32xi1>, vector<4x32xf32>
    %cst_47 = arith.constant 7.000000e+00 : f32
    %325 = vector.broadcast %cst_47 : f32 to vector<4x1xf32>
    %326 = arith.cmpf oge, %14, %325 : vector<4x1xf32>
    %327 = vector.extract_strided_slice %10 {offsets = [24, 0], sizes = [4, 128], strides = [1, 1]} : vector<32x128xf32> to vector<4x128xf32>
    %cst_48 = arith.constant dense<0.000000e+00> : vector<4x128xf32>
    %328 = tpu.matmul %315, %11, %cst_48 {dimension_numbers = #tpu.dot_dimension_numbers<[1], [0], [0], [1], [0, 0, 1, 1], [], []>} : vector<4x32xf32>, vector<32x128xf32>, vector<4x128xf32> -> vector<4x128xf32>
    %329 = arith.addf %327, %328 : vector<4x128xf32>
    %330 = arith.negf %329 : vector<4x128xf32>
    %331 = math.exp %330 : vector<4x128xf32>
    %cst_49 = arith.constant 1.000000e+00 : f32
    %332 = vector.broadcast %cst_49 : f32 to vector<4x128xf32>
    %333 = arith.addf %332, %331 : vector<4x128xf32>
    %334 = arith.divf %332, %333 : vector<4x128xf32>
    %335 = math.tanh %329 : vector<4x128xf32>
    %336 = vector.extract_strided_slice %334 {offsets = [0, 0], sizes = [4, 32], strides = [1, 1]} : vector<4x128xf32> to vector<4x32xf32>
    %337 = vector.extract_strided_slice %334 {offsets = [0, 32], sizes = [4, 32], strides = [1, 1]} : vector<4x128xf32> to vector<4x32xf32>
    %338 = vector.extract_strided_slice %335 {offsets = [0, 64], sizes = [4, 32], strides = [1, 1]} : vector<4x128xf32> to vector<4x32xf32>
    %339 = vector.extract_strided_slice %334 {offsets = [0, 96], sizes = [4, 32], strides = [1, 1]} : vector<4x128xf32> to vector<4x32xf32>
    %340 = arith.mulf %337, %318 : vector<4x32xf32>
    %341 = arith.mulf %336, %338 : vector<4x32xf32>
    %342 = arith.addf %340, %341 : vector<4x32xf32>
    %343 = math.tanh %342 : vector<4x32xf32>
    %344 = arith.mulf %339, %343 : vector<4x32xf32>
    %345 = tpu.concatenate %344, %321 in 1 : vector<4x32xf32>, vector<4x32xf32> -> vector<4x64xf32>
    %cst_50 = arith.constant dense<0.000000e+00> : vector<4x128xf32>
    %346 = tpu.matmul %345, %12, %cst_50 {dimension_numbers = #tpu.dot_dimension_numbers<[1], [0], [0], [1], [0, 0, 1, 1], [], []>} : vector<4x64xf32>, vector<64x128xf32>, vector<4x128xf32> -> vector<4x128xf32>
    %347 = vector.broadcast %13 : vector<1x128xf32> to vector<4x128xf32>
    %348 = arith.addf %346, %347 : vector<4x128xf32>
    %349 = arith.negf %348 : vector<4x128xf32>
    %350 = math.exp %349 : vector<4x128xf32>
    %cst_51 = arith.constant 1.000000e+00 : f32
    %351 = vector.broadcast %cst_51 : f32 to vector<4x128xf32>
    %352 = arith.addf %351, %350 : vector<4x128xf32>
    %353 = arith.divf %351, %352 : vector<4x128xf32>
    %354 = math.tanh %348 : vector<4x128xf32>
    %355 = vector.extract_strided_slice %353 {offsets = [0, 0], sizes = [4, 32], strides = [1, 1]} : vector<4x128xf32> to vector<4x32xf32>
    %356 = vector.extract_strided_slice %353 {offsets = [0, 32], sizes = [4, 32], strides = [1, 1]} : vector<4x128xf32> to vector<4x32xf32>
    %357 = vector.extract_strided_slice %354 {offsets = [0, 64], sizes = [4, 32], strides = [1, 1]} : vector<4x128xf32> to vector<4x32xf32>
    %358 = vector.extract_strided_slice %353 {offsets = [0, 96], sizes = [4, 32], strides = [1, 1]} : vector<4x128xf32> to vector<4x32xf32>
    %359 = arith.mulf %356, %324 : vector<4x32xf32>
    %360 = arith.mulf %355, %357 : vector<4x32xf32>
    %361 = arith.addf %359, %360 : vector<4x32xf32>
    %362 = math.tanh %361 : vector<4x32xf32>
    %363 = arith.mulf %358, %362 : vector<4x32xf32>
    %364 = vector.shape_cast %326 : vector<4x1xi1> to vector<4x1xi1>
    %365 = vector.broadcast %364 : vector<4x1xi1> to vector<4x32xi1>
    %366 = arith.select %365, %344, %315 : vector<4x32xi1>, vector<4x32xf32>
    %367 = vector.shape_cast %326 : vector<4x1xi1> to vector<4x1xi1>
    %368 = vector.broadcast %367 : vector<4x1xi1> to vector<4x32xi1>
    %369 = arith.select %368, %342, %318 : vector<4x32xi1>, vector<4x32xf32>
    %370 = vector.shape_cast %326 : vector<4x1xi1> to vector<4x1xi1>
    %371 = vector.broadcast %370 : vector<4x1xi1> to vector<4x32xi1>
    %372 = arith.select %371, %363, %321 : vector<4x32xi1>, vector<4x32xf32>
    %373 = vector.shape_cast %326 : vector<4x1xi1> to vector<4x1xi1>
    %374 = vector.broadcast %373 : vector<4x1xi1> to vector<4x32xi1>
    %375 = arith.select %374, %361, %324 : vector<4x32xi1>, vector<4x32xf32>
    %cst_52 = arith.constant 8.000000e+00 : f32
    %376 = vector.broadcast %cst_52 : f32 to vector<4x1xf32>
    %377 = arith.cmpf oge, %14, %376 : vector<4x1xf32>
    %378 = vector.extract_strided_slice %10 {offsets = [28, 0], sizes = [4, 128], strides = [1, 1]} : vector<32x128xf32> to vector<4x128xf32>
    %cst_53 = arith.constant dense<0.000000e+00> : vector<4x128xf32>
    %379 = tpu.matmul %366, %11, %cst_53 {dimension_numbers = #tpu.dot_dimension_numbers<[1], [0], [0], [1], [0, 0, 1, 1], [], []>} : vector<4x32xf32>, vector<32x128xf32>, vector<4x128xf32> -> vector<4x128xf32>
    %380 = arith.addf %378, %379 : vector<4x128xf32>
    %381 = arith.negf %380 : vector<4x128xf32>
    %382 = math.exp %381 : vector<4x128xf32>
    %cst_54 = arith.constant 1.000000e+00 : f32
    %383 = vector.broadcast %cst_54 : f32 to vector<4x128xf32>
    %384 = arith.addf %383, %382 : vector<4x128xf32>
    %385 = arith.divf %383, %384 : vector<4x128xf32>
    %386 = math.tanh %380 : vector<4x128xf32>
    %387 = vector.extract_strided_slice %385 {offsets = [0, 0], sizes = [4, 32], strides = [1, 1]} : vector<4x128xf32> to vector<4x32xf32>
    %388 = vector.extract_strided_slice %385 {offsets = [0, 32], sizes = [4, 32], strides = [1, 1]} : vector<4x128xf32> to vector<4x32xf32>
    %389 = vector.extract_strided_slice %386 {offsets = [0, 64], sizes = [4, 32], strides = [1, 1]} : vector<4x128xf32> to vector<4x32xf32>
    %390 = vector.extract_strided_slice %385 {offsets = [0, 96], sizes = [4, 32], strides = [1, 1]} : vector<4x128xf32> to vector<4x32xf32>
    %391 = arith.mulf %388, %369 : vector<4x32xf32>
    %392 = arith.mulf %387, %389 : vector<4x32xf32>
    %393 = arith.addf %391, %392 : vector<4x32xf32>
    %394 = math.tanh %393 : vector<4x32xf32>
    %395 = arith.mulf %390, %394 : vector<4x32xf32>
    %396 = tpu.concatenate %395, %372 in 1 : vector<4x32xf32>, vector<4x32xf32> -> vector<4x64xf32>
    %cst_55 = arith.constant dense<0.000000e+00> : vector<4x128xf32>
    %397 = tpu.matmul %396, %12, %cst_55 {dimension_numbers = #tpu.dot_dimension_numbers<[1], [0], [0], [1], [0, 0, 1, 1], [], []>} : vector<4x64xf32>, vector<64x128xf32>, vector<4x128xf32> -> vector<4x128xf32>
    %398 = vector.broadcast %13 : vector<1x128xf32> to vector<4x128xf32>
    %399 = arith.addf %397, %398 : vector<4x128xf32>
    %400 = arith.negf %399 : vector<4x128xf32>
    %401 = math.exp %400 : vector<4x128xf32>
    %cst_56 = arith.constant 1.000000e+00 : f32
    %402 = vector.broadcast %cst_56 : f32 to vector<4x128xf32>
    %403 = arith.addf %402, %401 : vector<4x128xf32>
    %404 = arith.divf %402, %403 : vector<4x128xf32>
    %405 = math.tanh %399 : vector<4x128xf32>
    %406 = vector.extract_strided_slice %404 {offsets = [0, 0], sizes = [4, 32], strides = [1, 1]} : vector<4x128xf32> to vector<4x32xf32>
    %407 = vector.extract_strided_slice %404 {offsets = [0, 32], sizes = [4, 32], strides = [1, 1]} : vector<4x128xf32> to vector<4x32xf32>
    %408 = vector.extract_strided_slice %405 {offsets = [0, 64], sizes = [4, 32], strides = [1, 1]} : vector<4x128xf32> to vector<4x32xf32>
    %409 = vector.extract_strided_slice %404 {offsets = [0, 96], sizes = [4, 32], strides = [1, 1]} : vector<4x128xf32> to vector<4x32xf32>
    %410 = arith.mulf %407, %375 : vector<4x32xf32>
    %411 = arith.mulf %406, %408 : vector<4x32xf32>
    %412 = arith.addf %410, %411 : vector<4x32xf32>
    %413 = math.tanh %412 : vector<4x32xf32>
    %414 = arith.mulf %409, %413 : vector<4x32xf32>
    %415 = vector.shape_cast %377 : vector<4x1xi1> to vector<4x1xi1>
    %416 = vector.broadcast %415 : vector<4x1xi1> to vector<4x32xi1>
    %417 = arith.select %416, %414, %372 : vector<4x32xi1>, vector<4x32xf32>
    %cst_57 = arith.constant dense<0xFF800000> : vector<1xf32>
    %418 = vector.multi_reduction <maximumf>, %14, %cst_57 [0] : vector<4x1xf32> to vector<1xf32>
    %419 = vector.shape_cast %418 : vector<1xf32> to vector<1x1xf32>
    %420 = vector.broadcast %419 : vector<1x1xf32> to vector<4x1xf32>
    %421 = arith.cmpf oeq, %14, %420 : vector<4x1xf32>
    %cst_58 = arith.constant 0.000000e+00 : f32
    %422 = vector.shape_cast %421 : vector<4x1xi1> to vector<4x1xi1>
    %423 = vector.broadcast %422 : vector<4x1xi1> to vector<4x32xi1>
    %424 = vector.broadcast %cst_58 : f32 to vector<4x32xf32>
    %425 = arith.select %423, %417, %424 : vector<4x32xi1>, vector<4x32xf32>
    %c0_59 = arith.constant 0 : index
    %c0_60 = arith.constant 0 : index
    %426 = vector.load %arg3[%c0_59, %c0_60] : memref<24x1xi32, #tpu.memory_space<vmem>>, vector<24x1xi32>
    %427 = tpu.iota {dimensions = array<i32: 1>} : vector<24x10xi32>
    %428 = vector.broadcast %426 : vector<24x1xi32> to vector<24x10xi32>
    %429 = arith.cmpi eq, %428, %427 : vector<24x10xi32>
    %430 = arith.extui %429 : vector<24x10xi1> to vector<24x10xi32>
    %431 = arith.sitofp %430 : vector<24x10xi32> to vector<24x10xf32>
    %c0_61 = arith.constant 0 : index
    %c0_62 = arith.constant 0 : index
    %432 = vector.load %arg11[%c0_61, %c0_62] : memref<10x11xf32, #tpu.memory_space<vmem>>, vector<10x11xf32>
    %cst_63 = arith.constant dense<0.000000e+00> : vector<24x11xf32>
    %433 = tpu.matmul %431, %432, %cst_63 {dimension_numbers = #tpu.dot_dimension_numbers<[1], [0], [0], [1], [0, 0, 1, 1], [], []>} : vector<24x10xf32>, vector<10x11xf32>, vector<24x11xf32> -> vector<24x11xf32>
    %c0_64 = arith.constant 0 : index
    %c0_65 = arith.constant 0 : index
    %434 = vector.load %arg4[%c0_64, %c0_65] : memref<24x24xf32, #tpu.memory_space<vmem>>, vector<24x24xf32>
    %c0_66 = arith.constant 0 : index
    %c0_67 = arith.constant 0 : index
    %435 = vector.load %arg12[%c0_66, %c0_67] : memref<11x22xf32, #tpu.memory_space<vmem>>, vector<11x22xf32>
    %c0_68 = arith.constant 0 : index
    %c0_69 = arith.constant 0 : index
    %436 = vector.load %arg13[%c0_68, %c0_69] : memref<1x22xf32, #tpu.memory_space<vmem>>, vector<1x22xf32>
    %c0_70 = arith.constant 0 : index
    %c0_71 = arith.constant 0 : index
    %437 = vector.load %arg14[%c0_70, %c0_71] : memref<22x11xf32, #tpu.memory_space<vmem>>, vector<22x11xf32>
    %c0_72 = arith.constant 0 : index
    %c0_73 = arith.constant 0 : index
    %438 = vector.load %arg15[%c0_72, %c0_73] : memref<1x11xf32, #tpu.memory_space<vmem>>, vector<1x11xf32>
    %cst_74 = arith.constant 0.000000e+00 : f32
    %439 = vector.broadcast %cst_74 : f32 to vector<24x11xf32>
    %440 = arith.maximumf %433, %439 : vector<24x11xf32>
    %cst_75 = arith.constant dense<0.000000e+00> : vector<24x11xf32>
    %441 = tpu.matmul %434, %440, %cst_75 {dimension_numbers = #tpu.dot_dimension_numbers<[1], [0], [0], [1], [0, 0, 1, 1], [], []>} : vector<24x24xf32>, vector<24x11xf32>, vector<24x11xf32> -> vector<24x11xf32>
    %442 = arith.addf %441, %433 : vector<24x11xf32>
    %cst_76 = arith.constant dense<0.000000e+00> : vector<24x22xf32>
    %443 = tpu.matmul %442, %435, %cst_76 {dimension_numbers = #tpu.dot_dimension_numbers<[1], [0], [0], [1], [0, 0, 1, 1], [], []>} : vector<24x11xf32>, vector<11x22xf32>, vector<24x22xf32> -> vector<24x22xf32>
    %444 = vector.broadcast %436 : vector<1x22xf32> to vector<24x22xf32>
    %445 = arith.addf %443, %444 : vector<24x22xf32>
    %cst_77 = arith.constant 0.000000e+00 : f32
    %446 = vector.broadcast %cst_77 : f32 to vector<24x22xf32>
    %447 = arith.maximumf %445, %446 : vector<24x22xf32>
    %cst_78 = arith.constant dense<0.000000e+00> : vector<24x11xf32>
    %448 = tpu.matmul %447, %437, %cst_78 {dimension_numbers = #tpu.dot_dimension_numbers<[1], [0], [0], [1], [0, 0, 1, 1], [], []>} : vector<24x22xf32>, vector<22x11xf32>, vector<24x11xf32> -> vector<24x11xf32>
    %449 = vector.broadcast %438 : vector<1x11xf32> to vector<24x11xf32>
    %450 = arith.addf %448, %449 : vector<24x11xf32>
    %cst_79 = arith.constant 0.000000e+00 : f32
    %451 = vector.broadcast %cst_79 : f32 to vector<24x11xf32>
    %452 = arith.maximumf %450, %451 : vector<24x11xf32>
    %c0_80 = arith.constant 0 : index
    %c0_81 = arith.constant 0 : index
    %453 = vector.load %arg16[%c0_80, %c0_81] : memref<11x22xf32, #tpu.memory_space<vmem>>, vector<11x22xf32>
    %c0_82 = arith.constant 0 : index
    %c0_83 = arith.constant 0 : index
    %454 = vector.load %arg17[%c0_82, %c0_83] : memref<1x22xf32, #tpu.memory_space<vmem>>, vector<1x22xf32>
    %c0_84 = arith.constant 0 : index
    %c0_85 = arith.constant 0 : index
    %455 = vector.load %arg18[%c0_84, %c0_85] : memref<22x11xf32, #tpu.memory_space<vmem>>, vector<22x11xf32>
    %c0_86 = arith.constant 0 : index
    %c0_87 = arith.constant 0 : index
    %456 = vector.load %arg19[%c0_86, %c0_87] : memref<1x11xf32, #tpu.memory_space<vmem>>, vector<1x11xf32>
    %cst_88 = arith.constant 0.000000e+00 : f32
    %457 = vector.broadcast %cst_88 : f32 to vector<24x11xf32>
    %458 = arith.maximumf %452, %457 : vector<24x11xf32>
    %cst_89 = arith.constant dense<0.000000e+00> : vector<24x11xf32>
    %459 = tpu.matmul %434, %458, %cst_89 {dimension_numbers = #tpu.dot_dimension_numbers<[1], [0], [0], [1], [0, 0, 1, 1], [], []>} : vector<24x24xf32>, vector<24x11xf32>, vector<24x11xf32> -> vector<24x11xf32>
    %460 = arith.addf %459, %452 : vector<24x11xf32>
    %cst_90 = arith.constant dense<0.000000e+00> : vector<24x22xf32>
    %461 = tpu.matmul %460, %453, %cst_90 {dimension_numbers = #tpu.dot_dimension_numbers<[1], [0], [0], [1], [0, 0, 1, 1], [], []>} : vector<24x11xf32>, vector<11x22xf32>, vector<24x22xf32> -> vector<24x22xf32>
    %462 = vector.broadcast %454 : vector<1x22xf32> to vector<24x22xf32>
    %463 = arith.addf %461, %462 : vector<24x22xf32>
    %cst_91 = arith.constant 0.000000e+00 : f32
    %464 = vector.broadcast %cst_91 : f32 to vector<24x22xf32>
    %465 = arith.maximumf %463, %464 : vector<24x22xf32>
    %cst_92 = arith.constant dense<0.000000e+00> : vector<24x11xf32>
    %466 = tpu.matmul %465, %455, %cst_92 {dimension_numbers = #tpu.dot_dimension_numbers<[1], [0], [0], [1], [0, 0, 1, 1], [], []>} : vector<24x22xf32>, vector<22x11xf32>, vector<24x11xf32> -> vector<24x11xf32>
    %467 = vector.broadcast %456 : vector<1x11xf32> to vector<24x11xf32>
    %468 = arith.addf %466, %467 : vector<24x11xf32>
    %c0_93 = arith.constant 0 : index
    %c0_94 = arith.constant 0 : index
    %469 = vector.load %arg5[%c0_93, %c0_94] : memref<4x24xf32, #tpu.memory_space<vmem>>, vector<4x24xf32>
    %cst_95 = arith.constant dense<0.000000e+00> : vector<4x11xf32>
    %470 = tpu.matmul %469, %468, %cst_95 {dimension_numbers = #tpu.dot_dimension_numbers<[1], [0], [0], [1], [0, 0, 1, 1], [], []>} : vector<4x24xf32>, vector<24x11xf32>, vector<4x11xf32> -> vector<4x11xf32>
    %c0_96 = arith.constant 0 : index
    %c0_97 = arith.constant 0 : index
    %471 = vector.load %arg2[%c0_96, %c0_97] : memref<4x1xi32, #tpu.memory_space<vmem>>, vector<4x1xi32>
    %472 = tpu.iota {dimensions = array<i32: 1>} : vector<4x4xi32>
    %473 = vector.broadcast %471 : vector<4x1xi32> to vector<4x4xi32>
    %474 = arith.cmpi eq, %473, %472 : vector<4x4xi32>
    %475 = arith.extui %474 : vector<4x4xi1> to vector<4x4xi32>
    %476 = arith.sitofp %475 : vector<4x4xi32> to vector<4x4xf32>
    %cst_98 = arith.constant dense<0.000000e+00> : vector<4x11xf32>
    %477 = tpu.matmul %476, %470, %cst_98 {dimension_numbers = #tpu.dot_dimension_numbers<[1], [0], [0], [1], [0, 0, 1, 1], [], []>} : vector<4x4xf32>, vector<4x11xf32>, vector<4x11xf32> -> vector<4x11xf32>
    %c0_99 = arith.constant 0 : index
    %c0_100 = arith.constant 0 : index
    %478 = vector.load %arg20[%c0_99, %c0_100] : memref<32x100xf32, #tpu.memory_space<vmem>>, vector<32x100xf32>
    %cst_101 = arith.constant dense<0.000000e+00> : vector<4x100xf32>
    %479 = tpu.matmul %425, %478, %cst_101 {dimension_numbers = #tpu.dot_dimension_numbers<[1], [0], [0], [1], [0, 0, 1, 1], [], []>} : vector<4x32xf32>, vector<32x100xf32>, vector<4x100xf32> -> vector<4x100xf32>
    %c0_102 = arith.constant 0 : index
    %c0_103 = arith.constant 0 : index
    %480 = vector.load %arg21[%c0_102, %c0_103] : memref<11x100xf32, #tpu.memory_space<vmem>>, vector<11x100xf32>
    %cst_104 = arith.constant dense<0.000000e+00> : vector<4x100xf32>
    %481 = tpu.matmul %477, %480, %cst_104 {dimension_numbers = #tpu.dot_dimension_numbers<[1], [0], [0], [1], [0, 0, 1, 1], [], []>} : vector<4x11xf32>, vector<11x100xf32>, vector<4x100xf32> -> vector<4x100xf32>
    %482 = arith.addf %479, %481 : vector<4x100xf32>
    %c0_105 = arith.constant 0 : index
    %c0_106 = arith.constant 0 : index
    %483 = vector.load %arg22[%c0_105, %c0_106] : memref<1x100xf32, #tpu.memory_space<vmem>>, vector<1x100xf32>
    %484 = vector.broadcast %483 : vector<1x100xf32> to vector<4x100xf32>
    %485 = arith.addf %482, %484 : vector<4x100xf32>
    %cst_107 = arith.constant 0.000000e+00 : f32
    %486 = vector.broadcast %cst_107 : f32 to vector<4x100xf32>
    %487 = arith.maximumf %485, %486 : vector<4x100xf32>
    %c0_108 = arith.constant 0 : index
    %c0_109 = arith.constant 0 : index
    %488 = vector.load %arg23[%c0_108, %c0_109] : memref<100x100xf32, #tpu.memory_space<vmem>>, vector<100x100xf32>
    %cst_110 = arith.constant dense<0.000000e+00> : vector<4x100xf32>
    %489 = tpu.matmul %487, %488, %cst_110 {dimension_numbers = #tpu.dot_dimension_numbers<[1], [0], [0], [1], [0, 0, 1, 1], [], []>} : vector<4x100xf32>, vector<100x100xf32>, vector<4x100xf32> -> vector<4x100xf32>
    %c0_111 = arith.constant 0 : index
    %c0_112 = arith.constant 0 : index
    %490 = vector.load %arg24[%c0_111, %c0_112] : memref<1x100xf32, #tpu.memory_space<vmem>>, vector<1x100xf32>
    %491 = vector.broadcast %490 : vector<1x100xf32> to vector<4x100xf32>
    %492 = arith.addf %489, %491 : vector<4x100xf32>
    %cst_113 = arith.constant 0.000000e+00 : f32
    %493 = vector.broadcast %cst_113 : f32 to vector<4x100xf32>
    %494 = arith.maximumf %492, %493 : vector<4x100xf32>
    %c0_114 = arith.constant 0 : index
    %c0_115 = arith.constant 0 : index
    %495 = vector.load %arg25[%c0_114, %c0_115] : memref<100x128xf32, #tpu.memory_space<vmem>>, vector<100x128xf32>
    %cst_116 = arith.constant dense<0.000000e+00> : vector<4x128xf32>
    %496 = tpu.matmul %494, %495, %cst_116 {dimension_numbers = #tpu.dot_dimension_numbers<[1], [0], [0], [1], [0, 0, 1, 1], [], []>} : vector<4x100xf32>, vector<100x128xf32>, vector<4x128xf32> -> vector<4x128xf32>
    %c0_117 = arith.constant 0 : index
    %c0_118 = arith.constant 0 : index
    %497 = vector.load %arg26[%c0_117, %c0_118] : memref<1x128xf32, #tpu.memory_space<vmem>>, vector<1x128xf32>
    %498 = vector.broadcast %497 : vector<1x128xf32> to vector<4x128xf32>
    %499 = arith.addf %496, %498 : vector<4x128xf32>
    %c0_119 = arith.constant 0 : index
    %c0_120 = arith.constant 0 : index
    %500 = vector.load %arg27[%c0_119, %c0_120] : memref<4x128xf32, #tpu.memory_space<vmem>>, vector<4x128xf32>
    tpu.vector_store %arg27[%c0_119, %c0_120], %499 {strides = array<i32>} : memref<4x128xf32, #tpu.memory_space<vmem>>, vector<4x128xf32>,
    return
  }
}

</mosaic_0001>

<bundles_post_ra>
// kernel: hybrid_forward.1
= control target key start
LH: loop header
LB: loop body
LE: loop exit
PB: predicated region body
PF: predicated region fallthrough
CT: control target
= control target key end

     0   :  { %s6047_s0 = inlined_call_operand.vmem [shape: s32[32,1], index: 0, kind: input, shape index: {}]   ;;  %s6048_s1 = inlined_call_operand.vmem [shape: f32[4,1], index: 1, kind: input, shape index: {}]   ;;  %s6049_s2 = inlined_call_operand.vmem [shape: s32[4,1], index: 2, kind: input, shape index: {}]   ;;  %s6050_s3 = inlined_call_operand.vmem [shape: s32[24,1], index: 3, kind: input, shape index: {}]   ;;  %s6051_s4 = inlined_call_operand.hbm [shape: f32[24,24], index: 4, kind: input, shape index: {}]   ;;  %s6052_s5 = inlined_call_operand.vmem [shape: f32[4,24], index: 5, kind: input, shape index: {}]   ;;  %s6053_s6 = inlined_call_operand.hbm [shape: f32[20,128], index: 6, kind: input, shape index: {}]   ;;  %s6054_s7 = inlined_call_operand.hbm [shape: f32[1,128], index: 7, kind: input, shape index: {}]   ;;  %s6055_s8 = inlined_call_operand.hbm [shape: f32[32,128], index: 8, kind: input, shape index: {}]   ;;  %s6056_s9 = inlined_call_operand.hbm [shape: f32[64,128], index: 9, kind: input, shape index: {}]   ;;  %s6057_s10 = inlined_call_operand.hbm [shape: f32[1,128], index: 10, kind: input, shape index: {}]   ;;  %s6058_s11 = inlined_call_operand.hbm [shape: f32[10,11], index: 11, kind: input, shape index: {}]   ;;  %s6059_s12 = inlined_call_operand.hbm [shape: f32[11,22], index: 12, kind: input, shape index: {}]   ;;  %s6060_s13 = inlined_call_operand.hbm [shape: f32[1,22], index: 13, kind: input, shape index: {}]   ;;  %s6061_s14 = inlined_call_operand.vmem [shape: f32[22,11], index: 14, kind: input, shape index: {}]   ;;  %s6062_s15 = inlined_call_operand.hbm [shape: f32[1,11], index: 15, kind: input, shape index: {}]   ;;  %s6063_s16 = inlined_call_operand.hbm [shape: f32[11,22], index: 16, kind: input, shape index: {}]   ;;  %s6064_s17 = inlined_call_operand.hbm [shape: f32[1,22], index: 17, kind: input, shape index: {}]   ;;  %s6065_s18 = inlined_call_operand.vmem [shape: f32[22,11], index: 18, kind: input, shape index: {}]   ;;  %s6066_s19 = inlined_call_operand.hbm [shape: f32[1,11], index: 19, kind: input, shape index: {}]   ;;  %s6067_s20 = inlined_call_operand.hbm [shape: f32[32,100], index: 20, kind: input, shape index: {}]   ;;  %s6068_s21 = inlined_call_operand.hbm [shape: f32[11,100], index: 21, kind: input, shape index: {}]   ;;  %s6069_s22 = inlined_call_operand.hbm [shape: f32[1,100], index: 22, kind: input, shape index: {}]   ;;  %s6070_s23 = inlined_call_operand.vmem [shape: f32[100,100], index: 23, kind: input, shape index: {}]   ;;  %s6071_s24 = inlined_call_operand.hbm [shape: f32[1,100], index: 24, kind: input, shape index: {}]   ;;  %s6072_s25 = inlined_call_operand.vmem [shape: f32[100,128], index: 25, kind: input, shape index: {}]   ;;  %s6073_s26 = inlined_call_operand.hbm [shape: f32[1,128], index: 26, kind: input, shape index: {}]   ;;  %s6074_s27 = inlined_call_operand.vmem [shape: f32[4,128], index: 27, kind: output, shape index: {}]  }
   0x1   :  { %6078 = sst [smem:[#allocation40_spill]] %s6047_s0 }
   0x2   :  { %6079 = sst [smem:[#allocation41_spill]] %s6048_s1 }
   0x3   :  { %6080 = sst [smem:[#allocation42_spill]] %s6049_s2 }
   0x4   :  { %6081 = sst [smem:[#allocation43_spill]] %s6050_s3 }
   0x5   :  { %6082 = sst [smem:[#allocation44_spill]] %s6051_s4 }
   0x6   :  { %6083 = sst [smem:[#allocation45_spill]] %s6052_s5 }
   0x7   :  { %6084 = sst [smem:[#allocation46_spill]] %s6053_s6 }
   0x8   :  { %6085 = sst [smem:[#allocation47_spill]] %s6054_s7 }
   0x9   :  { %6086 = sst [smem:[#allocation48_spill]] %s6055_s8 }
   0xa   :  { %6087 = sst [smem:[#allocation49_spill]] %s6056_s9 }
   0xb   :  { %6088 = sst [smem:[#allocation50_spill]] %s6057_s10 }
   0xc   :  { %6089 = sst [smem:[#allocation51_spill]] %s6058_s11 }
   0xd   :  { %32 = vsyncpa [#allocation3], 0 }
   0xe   :  { %33 = vsyncpa [#allocation5], 0 }
   0xf   :  { %34 = vsyncpa [#allocation8], 0 }
  0x10   :  { %35 = vsyncpa [#allocation11], 0 }
  0x11   :  { %36 = vsyncpa [#allocation14], 0 }
  0x12   :  { %37 = vsyncpa [#allocation17], 0 }
  0x13   :  { %38 = vsyncpa [#allocation20], 0 }
  0x14   :  { %39 = vsyncpa [#allocation23], 0 }
  0x15   :  { %40 = vsyncpa [#allocation26], 0 }
  0x16   :  { %41 = vsyncpa [#allocation29], 0  ;;  %s4829_s7 = smov [#allocation4]   ;;  %s4830_s8 = smov [#allocation7]  }
  0x17   :  { %s69_s4 = sshll.u32 %s4829_s7, 4  ;;  %s91_s30 = sshll.u32 %s4830_s8, 4  ;;  %s70_s4 = int_to_ptr.vmem [resolvable:$true] %s69_s4  ;;  %s92_s30 = int_to_ptr.vmem [resolvable:$true] %s91_s30 }
  0x18   :  { %s4457_s9 = scalar_lea.vmem %s70_s4, 384  ;;  %p4462_p1 = scmp.lt.s32.totalorder %s70_s4, %s70_s4 }
  0x19   :  { %p4458_p0 = scmp.ne.s32.totalorder %s70_s4, %s4457_s9  ;;  %p4463_p2 = scmp.lt.s32.totalorder %s4457_s9, %s4457_s9 }
  0x1b   :  { %p4464_p3 = por %p4463_p2, %p4462_p1 }
  0x1d   :  { %p4465_p4 = pnand %p4464_p3, %p4458_p0 }
  0x1f   :  { %4468 = shalt.err (!%p4465_p4)
}
  0x20   :  { %s4831_s5 = smov 128   ;;  %s4832_s28 = smov 8  }
  0x21   :  { %s6090_s29 = sld [smem:[#allocation46_spill]]  ;;  %s4477_s1 = scalar_lea.vmem %s92_s30, 512 }
  0x22   :  { %p4478_p5 = scmp.ne.s32.totalorder %s92_s30, %s4477_s1  ;;  %p4482_p6 = scmp.lt.s32.totalorder %s92_s30, %s92_s30 }
  0x23   :  { %p4483_p7 = scmp.lt.s32.totalorder %s4477_s1, %s4477_s1 }
  0x25   :  { %p4484_p8 = por %p4483_p7, %p4482_p6 }
  0x27   :  { %75 = dma.hbm_to_vmem [thread:$0]  %s6090_s29, 384, %s70_s4, [#allocation5], %s4831_s5, %s4831_s5, %s4832_s28  }
  0x28   :  { %p4485_p9 = pnand %p4484_p8, %p4478_p5 }
  0x2a   :  { %4488 = shalt.err (!%p4485_p9)
}
  0x2b   :  { %s6091_s2 = sld [smem:[#allocation48_spill]]  ;;  %s4833_s3 = smov [#allocation10]  }
  0x2c   :  { %s116_s7 = sshll.u32 %s4833_s3, 4  ;;  %s4834_s8 = smov [#allocation13]   ;;  %s117_s7 = int_to_ptr.vmem [resolvable:$true] %s116_s7 }
  0x2d   :  { %s137_s9 = sshll.u32 %s4834_s8, 4  ;;  %s4497_s4 = scalar_lea.vmem %s117_s7, 16  ;;  %s138_s9 = int_to_ptr.vmem [resolvable:$true] %s137_s9 }
  0x2e   :  { %p4498_p10 = scmp.ne.s32.totalorder %s117_s7, %s4497_s4  ;;  %s4501_s0 = scalar_lea.vmem %s117_s7, 32 }
  0x2f   :  { %p4502_p11 = scmp.lt.s32.totalorder %s117_s7, %s117_s7  ;;  %p4503_p12 = scmp.lt.s32.totalorder %s4501_s0, %s4497_s4 }
  0x31   :  { %97 = dma.hbm_to_vmem [thread:$0]  %s6091_s2, 512, %s92_s30, [#allocation8], %s4831_s5, %s4831_s5, %s4832_s28  }
  0x32   :  { %p4504_p13 = por %p4503_p12, %p4502_p11 }
  0x34   :  { %p4505_p0 = pnand %p4504_p13, %p4498_p10 }
  0x36   :  { %4508 = shalt.err (!%p4505_p0)
}
  0x37   :  { %s6092_s1 = sld [smem:[#allocation50_spill]]  ;;  %s4517_s6 = scalar_lea.vmem %s138_s9, 256 }
  0x38   :  { %p4518_p1 = scmp.ne.s32.totalorder %s138_s9, %s4517_s6  ;;  %p4522_p2 = scmp.lt.s32.totalorder %s138_s9, %s138_s9 }
  0x39   :  { %p4523_p3 = scmp.lt.s32.totalorder %s4517_s6, %s4517_s6 }
  0x3b   :  { %p4524_p4 = por %p4523_p3, %p4522_p2 }
  0x3d   :  { %119 = dma.hbm_to_vmem [thread:$0]  %s6092_s1, 16, %s117_s7, [#allocation11]  }
  0x3e   :  { %p4525_p5 = pnand %p4524_p4, %p4518_p1 }
  0x40   :  { %4528 = shalt.err (!%p4525_p5)
}
  0x41   :  { %143 = dma.hbm_to_vmem [thread:$0]  %s6059_s12, 256, %s138_s9, [#allocation14], %s4831_s5, %s4831_s5, %s4832_s28  }
  0x42   :  { %s4835_s2 = smov [#allocation16]   ;;  %s4836_s8 = smov [#allocation19]  }
  0x43   :  { %s162_s3 = sshll.u32 %s4835_s2, 4  ;;  %s184_s4 = sshll.u32 %s4836_s8, 4  ;;  %s163_s3 = int_to_ptr.vmem [resolvable:$true] %s162_s3  ;;  %s185_s4 = int_to_ptr.vmem [resolvable:$true] %s184_s4 }
  0x44   :  { %s4537_s7 = scalar_lea.vmem %s163_s3, 16  ;;  %s4541_s0 = scalar_lea.vmem %s163_s3, 32 }
  0x45   :  { %p4538_p6 = scmp.ne.s32.totalorder %s163_s3, %s4537_s7  ;;  %p4542_p7 = scmp.lt.s32.totalorder %s163_s3, %s163_s3 }
  0x46   :  { %p4543_p8 = scmp.lt.s32.totalorder %s4541_s0, %s4537_s7 }
  0x48   :  { %p4544_p9 = por %p4543_p8, %p4542_p7 }
  0x4a   :  { %p4545_p10 = pnand %p4544_p9, %p4538_p6 }
  0x4c   :  { %4548 = shalt.err (!%p4545_p10)
}
  0x4d   :  { %165 = dma.hbm_to_vmem [thread:$0]  %s6062_s15, 16, %s163_s3, [#allocation17]  }
  0x4e   :  { %s4557_s1 = scalar_lea.vmem %s185_s4, 16  ;;  %s4561_s12 = scalar_lea.vmem %s185_s4, 32 }
  0x4f   :  { %p4558_p11 = scmp.ne.s32.totalorder %s185_s4, %s4557_s1  ;;  %p4562_p12 = scmp.lt.s32.totalorder %s185_s4, %s185_s4 }
  0x50   :  { %p4563_p13 = scmp.lt.s32.totalorder %s4561_s12, %s4557_s1 }
  0x52   :  { %p4564_p0 = por %p4563_p13, %p4562_p12 }
  0x54   :  { %p4565_p1 = pnand %p4564_p0, %p4558_p11 }
  0x56   :  { %4568 = shalt.err (!%p4565_p1)
}
  0x57   :  { %187 = dma.hbm_to_vmem [thread:$0]  %s6064_s17, 16, %s185_s4, [#allocation20]  }
  0x58   :  { %s4837_s30 = smov [#allocation22]   ;;  %s4838_s2 = smov [#allocation25]  }
  0x59   :  { %s205_s11 = sshll.u32 %s4837_s30, 4  ;;  %s230_s8 = sshll.u32 %s4838_s2, 4  ;;  %s206_s11 = int_to_ptr.vmem [resolvable:$true] %s205_s11  ;;  %s231_s8 = int_to_ptr.vmem [resolvable:$true] %s230_s8 }
  0x5a   :  { %s4577_s7 = scalar_lea.vmem %s206_s11, 512  ;;  %p4582_p3 = scmp.lt.s32.totalorder %s206_s11, %s206_s11 }
  0x5b   :  { %p4578_p2 = scmp.ne.s32.totalorder %s206_s11, %s4577_s7  ;;  %p4583_p4 = scmp.lt.s32.totalorder %s4577_s7, %s4577_s7 }
  0x5d   :  { %p4584_p5 = por %p4583_p4, %p4582_p3 }
  0x5f   :  { %p4585_p6 = pnand %p4584_p5, %p4578_p2 }
  0x61   :  { %4588 = shalt.err (!%p4585_p6)
}
  0x62   :  { %211 = dma.hbm_to_vmem [thread:$0]  %s6067_s20, 512, %s206_s11, [#allocation23], %s4831_s5, %s4831_s5, %s4832_s28  }
  0x63   :  { %s4597_s17 = scalar_lea.vmem %s231_s8, 16  ;;  %s4601_s4 = scalar_lea.vmem %s231_s8, 32 }
  0x64   :  { %p4598_p7 = scmp.ne.s32.totalorder %s231_s8, %s4597_s17  ;;  %p4602_p8 = scmp.lt.s32.totalorder %s231_s8, %s231_s8 }
  0x65   :  { %p4603_p9 = scmp.lt.s32.totalorder %s4601_s4, %s4597_s17 }
  0x67   :  { %p4604_p10 = por %p4603_p9, %p4602_p8 }
  0x69   :  { %p4605_p11 = pnand %p4604_p10, %p4598_p7 }
  0x6b   :  { %4608 = shalt.err (!%p4605_p11)
}
  0x6c   :  { %233 = dma.hbm_to_vmem [thread:$0]  %s6069_s22, 16, %s231_s8, [#allocation26]  }
  0x6d   :  { %s4839_s29 = smov [#allocation2]   ;;  %s4840_s12 = smov [#allocation6]  }
  0x6e   :  { %s55_s1 = sshll.u32 %s4839_s29, 4  ;;  %s82_s9 = sshll.u32 %s4840_s12, 4  ;;  %s56_s1 = int_to_ptr.vmem [resolvable:$true] %s55_s1  ;;  %s83_s9 = int_to_ptr.vmem [resolvable:$true] %s82_s9 }
  0x6f   :  { %s4617_s6 = scalar_lea.vmem %s56_s1, 384  ;;  %p4622_p13 = scmp.lt.s32.totalorder %s56_s1, %s56_s1 }
  0x70   :  { %p4618_p12 = scmp.ne.s32.totalorder %s56_s1, %s4617_s6  ;;  %p4623_p0 = scmp.lt.s32.totalorder %s4617_s6, %s4617_s6 }
  0x72   :  { %p4624_p1 = por %p4623_p0, %p4622_p13 }
  0x74   :  { %p4625_p2 = pnand %p4624_p1, %p4618_p12 }
  0x76   :  { %4628 = shalt.err (!%p4625_p2)
}
  0x77   :  { %s6093_s11 = sld [smem:[#allocation44_spill]]  ;;  %s4637_s22 = scalar_lea.vmem %s83_s9, 16 }
  0x78   :  { %p4638_p3 = scmp.ne.s32.totalorder %s83_s9, %s4637_s22  ;;  %s4641_s2 = scalar_lea.vmem %s83_s9, 32 }
  0x79   :  { %p4642_p4 = scmp.lt.s32.totalorder %s83_s9, %s83_s9  ;;  %p4643_p5 = scmp.lt.s32.totalorder %s4641_s2, %s4637_s22 }
  0x7b   :  { %p4644_p6 = por %p4643_p5, %p4642_p4 }
  0x7d   :  { %61 = dma.hbm_to_vmem [thread:$0]  %s6093_s11, 384, %s56_s1, [#allocation3], %s4831_s5, %s4831_s5, %s4832_s28  }
  0x7e   :  { %p4645_p7 = pnand %p4644_p6, %p4638_p3 }
  0x80   :  { %4648 = shalt.err (!%p4645_p7)
}
  0x81   :  { %s6094_s15 = sld [smem:[#allocation47_spill]]  ;;  %s4841_s3 = smov [#allocation9]  }
  0x82   :  { %s103_s17 = sshll.u32 %s4841_s3, 4  ;;  %s4842_s4 = smov [#allocation12]   ;;  %s104_s17 = int_to_ptr.vmem [resolvable:$true] %s103_s17 }
  0x83   :  { %s125_s0 = sshll.u32 %s4842_s4, 4  ;;  %s4657_s10 = scalar_lea.vmem %s104_s17, 1024  ;;  %s126_s0 = int_to_ptr.vmem [resolvable:$true] %s125_s0 }
  0x84   :  { %p4658_p8 = scmp.ne.s32.totalorder %s104_s17, %s4657_s10  ;;  %p4662_p9 = scmp.lt.s32.totalorder %s104_s17, %s104_s17 }
  0x85   :  { %p4663_p10 = scmp.lt.s32.totalorder %s4657_s10, %s4657_s10 }
  0x87   :  { %85 = dma.hbm_to_vmem [thread:$0]  %s6094_s15, 16, %s83_s9, [#allocation5]  }
  0x88   :  { %p4664_p11 = por %p4663_p10, %p4662_p9 }
  0x8a   :  { %p4665_p12 = pnand %p4664_p11, %p4658_p8 }
  0x8c   :  { %4668 = shalt.err (!%p4665_p12)
}
  0x8d   :  { %s6095_s12 = sld [smem:[#allocation49_spill]]  ;;  %s4677_s9 = scalar_lea.vmem %s126_s0, 256 }
  0x8e   :  { %p4678_p13 = scmp.ne.s32.totalorder %s126_s0, %s4677_s9  ;;  %p4682_p0 = scmp.lt.s32.totalorder %s126_s0, %s126_s0 }
  0x8f   :  { %p4683_p1 = scmp.lt.s32.totalorder %s4677_s9, %s4677_s9 }
  0x91   :  { %p4684_p2 = por %p4683_p1, %p4682_p0 }
  0x93   :  { %109 = dma.hbm_to_vmem [thread:$0]  %s6095_s12, 1024, %s104_s17, [#allocation8], %s4831_s5, %s4831_s5, %s4832_s28  }
  0x94   :  { %p4685_p3 = pnand %p4684_p2, %p4678_p13 }
  0x96   :  { %4688 = shalt.err (!%p4685_p3)
}
  0x97   :  { %s6096_s30 = sld [smem:[#allocation51_spill]]  ;;  %s4843_s11 = smov [#allocation15]  }
  0x98   :  { %s150_s22 = sshll.u32 %s4843_s11, 4  ;;  %s4844_s2 = smov [#allocation18]   ;;  %s151_s22 = int_to_ptr.vmem [resolvable:$true] %s150_s22 }
  0x99   :  { %s171_s8 = sshll.u32 %s4844_s2, 4  ;;  %s4697_s7 = scalar_lea.vmem %s151_s22, 16  ;;  %s172_s8 = int_to_ptr.vmem [resolvable:$true] %s171_s8 }
  0x9a   :  { %p4698_p4 = scmp.ne.s32.totalorder %s151_s22, %s4697_s7  ;;  %s4701_s15 = scalar_lea.vmem %s151_s22, 32 }
  0x9b   :  { %p4702_p5 = scmp.lt.s32.totalorder %s151_s22, %s151_s22  ;;  %p4703_p6 = scmp.lt.s32.totalorder %s4701_s15, %s4697_s7 }
  0x9d   :  { %131 = dma.hbm_to_vmem [thread:$0]  %s6096_s30, 256, %s126_s0, [#allocation11], %s4831_s5, %s4831_s5, %s4832_s28  }
  0x9e   :  { %p4704_p7 = por %p4703_p6, %p4702_p5 }
  0xa0   :  { %p4705_p8 = pnand %p4704_p7, %p4698_p4 }
  0xa2   :  { %4708 = shalt.err (!%p4705_p8)
}
  0xa3   :  { %153 = dma.hbm_to_vmem [thread:$0]  %s6060_s13, 16, %s151_s22, [#allocation14]  }
  0xa4   :  { %s4717_s4 = scalar_lea.vmem %s172_s8, 256  ;;  %p4722_p10 = scmp.lt.s32.totalorder %s172_s8, %s172_s8 }
  0xa5   :  { %p4718_p9 = scmp.ne.s32.totalorder %s172_s8, %s4717_s4  ;;  %p4723_p11 = scmp.lt.s32.totalorder %s4717_s4, %s4717_s4 }
  0xa7   :  { %p4724_p12 = por %p4723_p11, %p4722_p10 }
  0xa9   :  { %p4725_p13 = pnand %p4724_p12, %p4718_p9 }
  0xab   :  { %4728 = shalt.err (!%p4725_p13)
}
  0xac   :  { %177 = dma.hbm_to_vmem [thread:$0]  %s6063_s16, 256, %s172_s8, [#allocation17], %s4831_s5, %s4831_s5, %s4832_s28  }
  0xad   :  { %s4845_s29 = smov [#allocation21]   ;;  %s4846_s12 = smov [#allocation24]  }
  0xae   :  { %s196_s1 = sshll.u32 %s4845_s29, 4  ;;  %s217_s9 = sshll.u32 %s4846_s12, 4  ;;  %s197_s1 = int_to_ptr.vmem [resolvable:$true] %s196_s1  ;;  %s218_s9 = int_to_ptr.vmem [resolvable:$true] %s217_s9 }
  0xaf   :  { %s4737_s13 = scalar_lea.vmem %s197_s1, 16  ;;  %s4741_s6 = scalar_lea.vmem %s197_s1, 32 }
  0xb0   :  { %p4738_p0 = scmp.ne.s32.totalorder %s197_s1, %s4737_s13  ;;  %p4742_p1 = scmp.lt.s32.totalorder %s197_s1, %s197_s1 }
  0xb1   :  { %p4743_p2 = scmp.lt.s32.totalorder %s4741_s6, %s4737_s13 }
  0xb3   :  { %p4744_p3 = por %p4743_p2, %p4742_p1 }
  0xb5   :  { %p4745_p4 = pnand %p4744_p3, %p4738_p0 }
  0xb7   :  { %4748 = shalt.err (!%p4745_p4)
}
  0xb8   :  { %199 = dma.hbm_to_vmem [thread:$0]  %s6066_s19, 16, %s197_s1, [#allocation20]  }
  0xb9   :  { %s4757_s11 = scalar_lea.vmem %s218_s9, 256  ;;  %p4762_p6 = scmp.lt.s32.totalorder %s218_s9, %s218_s9 }
  0xba   :  { %p4758_p5 = scmp.ne.s32.totalorder %s218_s9, %s4757_s11  ;;  %p4763_p7 = scmp.lt.s32.totalorder %s4757_s11, %s4757_s11 }
  0xbc   :  { %p4764_p8 = por %p4763_p7, %p4762_p6 }
  0xbe   :  { %p4765_p9 = pnand %p4764_p8, %p4758_p5 }
  0xc0   :  { %4768 = shalt.err (!%p4765_p9)
}
  0xc1   :  { %223 = dma.hbm_to_vmem [thread:$0]  %s6068_s21, 256, %s218_s9, [#allocation23], %s4831_s5, %s4831_s5, %s4832_s28  }
  0xc2   :  { %s4847_s2 = smov [#allocation27]   ;;  %s4848_s7 = smov [#allocation28]  }
  0xc3   :  { %s242_s8 = sshll.u32 %s4847_s2, 4  ;;  %s254_s15 = sshll.u32 %s4848_s7, 4  ;;  %s243_s8 = int_to_ptr.vmem [resolvable:$true] %s242_s8  ;;  %s255_s15 = int_to_ptr.vmem [resolvable:$true] %s254_s15 }
  0xc4   :  { %s4777_s19 = scalar_lea.vmem %s243_s8, 16  ;;  %s4781_s3 = scalar_lea.vmem %s243_s8, 32 }
  0xc5   :  { %p4778_p10 = scmp.ne.s32.totalorder %s243_s8, %s4777_s19  ;;  %p4782_p11 = scmp.lt.s32.totalorder %s243_s8, %s243_s8 }
  0xc6   :  { %p4783_p12 = scmp.lt.s32.totalorder %s4781_s3, %s4777_s19 }
  0xc8   :  { %p4784_p13 = por %p4783_p12, %p4782_p11 }
  0xca   :  { %p4785_p0 = pnand %p4784_p13, %p4778_p10 }
  0xcc   :  { %4788 = shalt.err (!%p4785_p0)
}
  0xcd   :  { %245 = dma.hbm_to_vmem [thread:$0]  %s6071_s24, 16, %s243_s8, [#allocation26]  }
  0xce   :  { %s4797_s0 = scalar_lea.vmem %s255_s15, 16  ;;  %s4801_s21 = scalar_lea.vmem %s255_s15, 32 }
  0xcf   :  { %p4798_p1 = scmp.ne.s32.totalorder %s255_s15, %s4797_s0  ;;  %p4802_p2 = scmp.lt.s32.totalorder %s255_s15, %s255_s15 }
  0xd0   :  { %p4803_p3 = scmp.lt.s32.totalorder %s4801_s21, %s4797_s0 }
  0xd2   :  { %p4804_p4 = por %p4803_p3, %p4802_p2 }
  0xd4   :  { %p4805_p5 = pnand %p4804_p4, %p4798_p1 }
  0xd6   :  { %4808 = shalt.err (!%p4805_p5)
}
  0xd7   :  { %257 = dma.hbm_to_vmem [thread:$0]  %s6073_s26, 16, %s255_s15, [#allocation29]  }
  0xd8   :  { %4809 = dma.done.wait [#allocation3], 384  }
  0xd9   :  { %4810 = vsyncadd [#allocation3], 4294966912 }
  0xda   :  { %4811 = dma.done.wait [#allocation5], 400  }
  0xdb   :  { %4812 = vsyncadd [#allocation5], 4294966896 }
  0xdc   :  { %4813 = dma.done.wait [#allocation8], 1536  }
  0xdd   :  { %4814 = vsyncadd [#allocation8], 4294965760 }
  0xde   :  { %4815 = dma.done.wait [#allocation11], 272  }
  0xdf   :  { %4816 = vsyncadd [#allocation11], 4294967024 }
  0xe0   :  { %4817 = dma.done.wait [#allocation14], 272  }
  0xe1   :  { %4818 = vsyncadd [#allocation14], 4294967024 }
  0xe2   :  { %4819 = dma.done.wait [#allocation17], 272  }
  0xe3   :  { %4820 = vsyncadd [#allocation17], 4294967024 }
  0xe4   :  { %4821 = dma.done.wait [#allocation20], 32  }
  0xe5   :  { %4822 = vsyncadd [#allocation20], 4294967264 }
  0xe6   :  { %4823 = dma.done.wait [#allocation23], 768  }
  0xe7   :  { %4824 = vsyncadd [#allocation23], 4294966528 }
  0xe8   :  { %4825 = dma.done.wait [#allocation26], 32  }
  0xe9   :  { %4826 = vsyncadd [#allocation26], 4294967264 }
  0xea   :  { %4827 = dma.done.wait [#allocation29], 16  }
  0xeb   :  { %4828 = vsyncadd [#allocation29], 4294967280  ;;  %v4849_v0 = vmov 0   ;;  %v4850_v1 = vmov 0.0   ;;  %vm365_vm0 = vcmask 1043456   ;;  %s6097_s10 = sld [smem:[#allocation40_spill]]  ;;  %v316_v14 = vlaneseq }
  0xec   :  { %4304 = vset.pattern.permute.xlu0 %v4849_v0  ;;  %4305 = vset.pattern.permute.xlu1 %v4849_v0  ;;  %s6098_s12 = sld [smem:[#allocation41_spill]]  ;;  %v344_v4 = vld [vmem:[#allocation4 + $0x10] sm:$0xf]  ;;  %v343_v7 = vld [vmem:[#allocation4 + $0x8] sm:$0xff]  ;;  %v342_v9 = vld [vmem:[#allocation4] sm:$0xff]  ;;  %vm4851_vm2 = vmmov 0  }
  0xed   :  { %3845 = vmatprep.subr.mxu1 %v4850_v1  ;;  %v5087_v5 = vld [vmem:[#allocation7 + $0x18] sm:$0xff]  ;;  %3833 = vmatprep.subr.msk.mxu0 %vm365_vm0, %v344_v4  ;;  %v5094_v8 = vld [vmem:[#allocation7 + $0x10] sm:$0xff]  ;;  %v5100_v10 = vld [vmem:[#allocation7 + $0x8] sm:$0xff]  ;;  %v5127_v15 = vand.u32 127, %v316_v14  ;;  %vm352_vm3 = vcmask 162816   ;;  %s4852_s30 = smov 64  }
  0xee   :  { %3846 = vmatpush3.msra.mxu1 %v5087_v5  ;;  %3834 = vmatpush3.msk.msra.mxu0 %vm365_vm0, %v344_v4  ;;  %v5104_v12 = vld [vmem:[#allocation7] sm:$0xff]  ;;  %v5142_v26 = vld [vmem:[#allocation6] ss:$0 sm:$0xff]  ;;  %s4853_s11 = smov 32   ;;  %v5155_v41 = vld [vmem:[#allocation9 + $0x30] sm:$0xff]  ;;  %vm469_vm9 = vcmask 261120  }
  0xef   :  { %3847 = vmatprep.subr.mxu1 %v4850_v1  ;;  %3835 = vmatprep.subr.mxu0 %v343_v7  ;;  %v5153_v40 = vld [vmem:[#allocation9 + $0x38] sm:$0xff]  ;;  %v5159_v42 = vld [vmem:[#allocation9 + $0x28] sm:$0xff]  ;;  %v5163_v43 = vld [vmem:[#allocation9 + $0x20] sm:$0xff]  ;;  %vm579_vm10 = vcmask 523264   ;;  %s4854_s2 = smov 96   ;;  %s6099_s3 = sld [smem:[#allocation43_spill]] }
  0xf0   :  { %3848 = vmatpush3.msra.mxu1 %v5094_v8  ;;  %3836 = vmatpush3.msra.mxu0 %v343_v7  ;;  %v5173_v46 = vld [vmem:[#allocation9 + $0x18] sm:$0xff]  ;;  %v5176_v47 = vld [vmem:[#allocation9 + $0x10] sm:$0xff]  ;;  %v5179_v48 = vld [vmem:[#allocation9 + $0x8] sm:$0xff]  ;;  %s6100_s24 = sld [smem:[#allocation42_spill]] }
  0xf1   :  { %v312_v2 = vld [vmem:[%s6097_s10] sm:$0xff]  ;;  %v313_v6 = vld [vmem:[%s6097_s10 + $0x8] sm:$0xff]  ;;  %3837 = vmatprep.subr.mxu0 %v342_v9  ;;  %3849 = vmatprep.subr.mxu1 %v4850_v1  ;;  %v314_v13 = vld [vmem:[%s6097_s10 + $0x10] sm:$0xff]  ;;  %s6101_s22 = sld [smem:[#allocation45_spill]] }
  0xf2   :  { %v5085_v3 = vld [vmem:[%s6098_s12] sm:$0xf]  ;;  %319 = vperm.xlu0 %4304, %v312_v2   ;;  %3838 = vmatpush3.msra.mxu0 %v342_v9  ;;  %v315_v45 = vld [vmem:[%s6097_s10 + $0x18] sm:$0xff]  ;;  %v5237_v60 = vld [vmem:[#allocation10] ss:$0 sm:$0xff] }
  0xf3   :  { %vm468_vm1 = vcmp.ge.f32.partialorder %v5085_v3, 1.0  ;;  %3850 = vmatpush3.msra.mxu1 %v5100_v10  ;;  %3853 = vmatprep.mubr.msk.f32.mxu1 %vm4851_vm2, %v4850_v1  ;;  %v5185_v49 = vld [vmem:[#allocation9] sm:$0xff]  ;;  %vm686_vm11 = vcmp.ge.f32.partialorder %v5085_v3, 2.0  ;;  %vm923_vm13 = vcmp.ge.f32.partialorder %v5085_v3, 3.0  ;;  %vm1144_vm15 = vcmp.ge.f32.partialorder %v5085_v3, 4.0 }
  0xf4   :  { %v677_v11 = vsel %vm468_vm1, 1, %v4849_v0  ;;  %3851 = vmatprep.subr.mxu1 %v4850_v1  ;;  %3856 = vmatprep.subr.mxu0 %v4850_v1 }
  0xf5   :  { %3852 = vmatpush3.msra.mxu1 %v5104_v12 }
  0xf6   :  { %322 = vperm.xlu0 %4304, %v313_v6   ;;  %3854 = vmatmul.mubr.f32.vlgmr.msra.gmra.mxu1 %v4850_v1 }
  0xf7   :  { %3875 = vmatprep.subr.mxu1 %v4850_v1  ;;  %3883 = vmatprep.mubr.msk.f32.mxu1 %vm4851_vm2, %v4850_v1 }
  0xf8   :  { %3876 = vmatpush3.msra.mxu1 %v5087_v5 }
  0xf9   :  { %3877 = vmatprep.subr.mxu1 %v4850_v1 }
  0xfa   :  { %679 = vperm.xlu0 %4304, %v677_v11   ;;  %3878 = vmatpush3.msra.mxu1 %v5094_v8 }
  0xfb   :  { %3879 = vmatprep.subr.mxu1 %v4850_v1 }
  0xfc   :  { %3880 = vmatpush3.msra.mxu1 %v5100_v10 }
  0xfd   :  { %3881 = vmatprep.subr.mxu1 %v4850_v1 }
  0xfe   :  { %325 = vperm.xlu0 %4304, %v314_v13   ;;  %3882 = vmatpush3.msra.mxu1 %v5104_v12 }
  0xff   :  { %3886 = vmatprep.subr.mxu1 %v4850_v1 }
 0x16d   :  { %v320_v16 = vpop.permute.xlu0 %319 }
 0x16e   :  { %vm330_vm4 = vcmp.eq.s32.totalorder %v320_v16, %v5127_v15 }
 0x16f   :  { %v3544_v17 = vsel %vm330_vm4, 1.0, %v4850_v1 }
 0x170   :  { %3839 = vmatprep.mubr.msk.f32.mxu0 %vm352_vm3, %v3544_v17 }
 0x171   :  { %v323_v18 = vpop.permute.xlu0 %322 }
 0x172   :  { %vm331_vm5 = vcmp.eq.s32.totalorder %v323_v18, %v5127_v15 }
 0x173   :  { %v3545_v19 = vsel %vm331_vm5, 1.0, %v4850_v1 }
 0x174   :  { %3840 = vmatmul.mubr.msk.f32.vlgmr.msra.gmra.mxu0 %vm352_vm3, %v3545_v19 }
 0x175   :  { %v5135_v20 = vpop.permute.xlu0 %679  ;;  %3857 = vmatpush3.msra.mxu0 %v5153_v40 }
 0x176   :  { %3858 = vmatprep.subr.mxu0 %v4850_v1  ;;  %vm681_vm7 = vcmp.eq.s32.totalorder %v5135_v20, 1 }
 0x177   :  { %3859 = vmatpush3.msra.mxu0 %v5155_v41 }
 0x178   :  { %3860 = vmatprep.subr.mxu0 %v4850_v1 }
 0x179   :  { %v326_v21 = vpop.permute.xlu0 %325  ;;  %3861 = vmatpush3.msra.mxu0 %v5159_v42 }
 0x17a   :  { %vm332_vm6 = vcmp.eq.s32.totalorder %v326_v21, %v5127_v15  ;;  %3862 = vmatprep.subr.mxu0 %v4850_v1 }
 0x17b   :  { %v3546_v22 = vsel %vm332_vm6, 1.0, %v4850_v1  ;;  %3863 = vmatpush3.msra.mxu0 %v5163_v43 }
 0x17c   :  { %3842 = vmatprep.mubr.msk.f32.mxu0 %vm352_vm3, %v3546_v22  ;;  %3864 = vmatprep.subr.mxu0 %v4850_v1 }
 0x17d   :  { %3865 = vmatpush3.msra.mxu0 %v5173_v46 }
 0x17e   :  { %3866 = vmatprep.subr.mxu0 %v4850_v1 }
 0x17f   :  { %3867 = vmatpush3.msra.mxu0 %v5176_v47 }
 0x180   :  { %3868 = vmatprep.subr.mxu0 %v4850_v1 }
 0x181   :  { %3869 = vmatpush3.msra.mxu0 %v5179_v48 }
 0x182   :  { %3870 = vmatprep.subr.mxu0 %v4850_v1 }
 0x183   :  { %3871 = vmatpush3.msra.mxu0 %v5185_v49 }
 0x184   :  { %3905 = vmatprep.subr.mxu0 %v4850_v1 }
 0x1b6   :  { %v539_v23 = vpop.f32.mrf.mxu1 }
 0x1b8   :  { %v3855_v24 = vpop.f32.mrf.mxu1 }
 0x234   :  { %v5140_v25 = vpop.f32.mrf.mxu0 }
 0x236   :  { %v435_v27 = vpop.f32.mrf.mxu0 }
 0x237   :  { %v5145_v28 = vadd.f32 %v5142_v26, %v435_v27 }
 0x239   :  { %v543_v29 = vadd.f32 %v539_v23, %v5145_v28 }
 0x23b   :  { %4306 = vtanh.f32 %v543_v29  ;;  %v3554_v31 = vmul.f32 -1.442695, %v543_v29 }
 0x23d   :  { %4308 = vpow2.f32 %v3554_v31 }
 0x248   :  { %v4307_v30 = vpop.eup %4306 }
 0x249   :  { %553 = vrot.lane.b32.xlu1 %v4307_v30, %s4852_s30 }
 0x24a   :  { %v4309_v32 = vpop.eup %4308 }
 0x24b   :  { %v547_v33 = vadd.f32 1.0, %v4309_v32 }
 0x24d   :  { %4310 = vrcp.f32 %v547_v33 }
 0x25a   :  { %v4311_v34 = vpop.eup %4310 }
 0x25b   :  { %v551_v37 = vmul.f32 0.0, %v4311_v34 }
 0x2bb   :  { %v554_v35 = vpop.permute.xlu1 %553 }
 0x2bc   :  { %v556_v36 = vmul.f32 %v4311_v34, %v554_v35 }
 0x2be   :  { %558 = vrot.lane.b32.xlu1 %v556_v36, %s4853_s11 }
 0x330   :  { %v559_v38 = vpop.permute.xlu1 %558 }
 0x331   :  { %v5150_v39 = vadd.f32 %v559_v38, %v551_v37  ;;  %v901_v38 = vsel %vm686_vm11, 1, %v4849_v0  ;;  %vm2329_vm11 = vcmask 1041408  }
 0x333   :  { %4312 = vtanh.f32 %v5150_v39  ;;  %v5248_v29 = vsel %vm681_vm7, %v5150_v39, 0.0 }
 0x334   :  { %v774_v31 = vrot.slane %v5248_v29, 4 }
 0x340   :  { %v4313_v44 = vpop.eup %4312 }
 0x341   :  { %564 = vrot.lane.b32.xlu1 %v4313_v44, %s4852_s30 }
 0x345   :  { %328 = vperm.xlu1 %4305, %v315_v45  }
 0x3b3   :  { %v565_v50 = vpop.permute.xlu1 %564 }
 0x3b4   :  { %v567_v51 = vmul.f32 %v4311_v34, %v565_v50 }
 0x3b6   :  { %569 = vrot.lane.b32.xlu0 %v567_v51, %s4853_s11  ;;  %v682_v52 = vsel %vm681_vm7, %v567_v51, 0.0 }
 0x3b7   :  { %688 = vrot.lane.b32.xlu1 %v682_v52, %s4853_s11 }
 0x3c0   :  { %v329_v53 = vpop.permute.xlu1 %328 }
 0x3c1   :  { %vm333_vm8 = vcmp.eq.s32.totalorder %v329_v53, %v5127_v15 }
 0x3c2   :  { %v3547_v54 = vsel %vm333_vm8, 1.0, %v4850_v1 }
 0x3c3   :  { %3843 = vmatmul.mubr.msk.f32.gmra.mxu0 %vm352_vm3, %v3547_v54  ;;  %vm1381_vm3 = vcmp.ge.f32.partialorder %v5085_v3, 5.0 }
 0x3c4   :  { %3872 = vmatprep.mubr.msk.f32.mxu0 %vm4851_vm2, %v4850_v1 }
 0x428   :  { %v570_v55 = vpop.permute.xlu0 %569 }
 0x429   :  { %v572_v56 = vsel %vm469_vm9, %v570_v55, 0.0  ;;  %v5200_v57 = vpop.permute.xlu1 %688 }
 0x42a   :  { %3873 = vmatmul.mubr.msk.f32.vlgmr.msra.gmra.mxu0 %vm579_vm10, %v572_v56  ;;  %3884 = vmatmul.mubr.msk.f32.vlgmr.msra.gmra.mxu1 %vm469_vm9, %v5200_v57 }
 0x42b   :  { %3887 = vmatpush3.msra.mxu1 %v5153_v40  ;;  %3906 = vmatpush3.msra.mxu0 %v5087_v5 }
 0x42c   :  { %3888 = vmatprep.subr.mxu1 %v4850_v1  ;;  %3907 = vmatprep.subr.mxu0 %v4850_v1 }
 0x42d   :  { %3889 = vmatpush3.msra.mxu1 %v5155_v41  ;;  %3908 = vmatpush3.msra.mxu0 %v5094_v8 }
 0x42e   :  { %3890 = vmatprep.subr.mxu1 %v4850_v1  ;;  %3909 = vmatprep.subr.mxu0 %v4850_v1 }
 0x42f   :  { %3891 = vmatpush3.msra.mxu1 %v5159_v42  ;;  %3910 = vmatpush3.msra.mxu0 %v5100_v10 }
 0x430   :  { %3892 = vmatprep.subr.mxu1 %v4850_v1  ;;  %3902 = vmatprep.mubr.msk.f32.mxu1 %vm4851_vm2, %v4850_v1 }
 0x431   :  { %3893 = vmatpush3.msra.mxu1 %v5163_v43  ;;  %3911 = vmatprep.subr.mxu0 %v4850_v1 }
 0x432   :  { %3894 = vmatprep.subr.mxu1 %v4850_v1  ;;  %3912 = vmatpush3.msra.mxu0 %v5104_v12 }
 0x433   :  { %3895 = vmatpush3.msra.mxu1 %v5173_v46  ;;  %3913 = vmatprep.mubr.msk.f32.mxu0 %vm4851_vm2, %v4850_v1 }
 0x434   :  { %3896 = vmatprep.subr.mxu1 %v4850_v1  ;;  %3916 = vmatprep.subr.mxu0 %v4850_v1 }
 0x435   :  { %3897 = vmatpush3.msra.mxu1 %v5176_v47 }
 0x436   :  { %3898 = vmatprep.subr.mxu1 %v4850_v1 }
 0x437   :  { %3899 = vmatpush3.msra.mxu1 %v5179_v48 }
 0x438   :  { %3900 = vmatprep.subr.mxu1 %v4850_v1 }
 0x439   :  { %3901 = vmatpush3.msra.mxu1 %v5185_v49 }
 0x43a   :  { %3935 = vmatprep.subr.mxu1 %v4850_v1 }
 0x483   :  { %v5233_v58 = vpop.f32.mrf.mxu0 }
 0x485   :  { %v5235_v59 = vpop.f32.mrf.mxu0 }
 0x4ea   :  { %v649_v61 = vpop.f32.mrf.mxu0  ;;  %v758_v62 = vpop.f32.mrf.mxu1 }
 0x4eb   :  { %v650_v63 = vadd.f32 %v5237_v60, %v649_v61  ;;  %v763_v2 = vrot.slane %v758_v62, 4 }
 0x4ec   :  { %v3874_v4 = vpop.f32.mrf.mxu0  ;;  %v3885_v6 = vpop.f32.mrf.mxu1 }
 0x4ed   :  { %4314 = vtanh.f32 %v650_v63  ;;  %v765_v7 = vadd.f32 %v763_v2, %v5145_v28  ;;  %v3557_v13 = vmul.f32 -1.442695, %v650_v63 }
 0x4ef   :  { %4316 = vtanh.f32 %v765_v7  ;;  %v3559_v14 = vmul.f32 -1.442695, %v765_v7  ;;  %v5309_v7 = vadd.f32 %v5140_v25, %v5142_v26 }
 0x4f0   :  { %4318 = vpow2.f32 %v3557_v13 }
 0x4f1   :  { %4320 = vpow2.f32 %v3559_v14 }
 0x4fa   :  { %v4315_v9 = vpop.eup %4314 }
 0x4fb   :  { %662 = vrot.lane.b32.xlu0 %v4315_v9, %s4852_s30 }
 0x4fc   :  { %v4317_v11 = vpop.eup %4316 }
 0x4fd   :  { %778 = vrot.lane.b32.xlu1 %v4317_v11, %s4852_s30  ;;  %v4319_v16 = vpop.eup %4318 }
 0x4fe   :  { %v4321_v17 = vpop.eup %4320  ;;  %v656_v18 = vadd.f32 1.0, %v4319_v16 }
 0x4ff   :  { %v769_v19 = vadd.f32 1.0, %v4321_v17 }
 0x500   :  { %4322 = vrcp.f32 %v656_v18 }
 0x501   :  { %4324 = vrcp.f32 %v769_v19 }
 0x50d   :  { %v4323_v21 = vpop.eup %4322 }
 0x50e   :  { %v4325_v24 = vpop.eup %4324  ;;  %v660_v30 = vmul.f32 0.0, %v4323_v21 }
 0x50f   :  { %v776_v34 = vmul.f32 %v4325_v24, %v774_v31 }
 0x56d   :  { %v663_v22 = vpop.permute.xlu0 %662 }
 0x56e   :  { %v665_v23 = vmul.f32 %v4323_v21, %v663_v22 }
 0x56f   :  { %v779_v27 = vpop.permute.xlu1 %778 }
 0x570   :  { %667 = vrot.lane.b32.xlu0 %v665_v23, %s4853_s11  ;;  %v781_v28 = vmul.f32 %v4325_v24, %v779_v27 }
 0x572   :  { %783 = vrot.lane.b32.xlu1 %v781_v28, %s4853_s11 }
 0x5e2   :  { %v668_v32 = vpop.permute.xlu0 %667 }
 0x5e3   :  { %v5251_v33 = vadd.f32 %v668_v32, %v660_v30 }
 0x5e4   :  { %v784_v35 = vpop.permute.xlu1 %783 }
 0x5e5   :  { %4326 = vtanh.f32 %v5251_v33  ;;  %v786_v36 = vadd.f32 %v784_v35, %v776_v34 }
 0x5e7   :  { %4328 = vtanh.f32 %v786_v36  ;;  %v913_v55 = vrot.slane %v786_v36, 4 }
 0x5f2   :  { %v4327_v37 = vpop.eup %4326 }
 0x5f3   :  { %673 = vrot.lane.b32.xlu0 %v4327_v37, %s4852_s30 }
 0x5f4   :  { %v4329_v39 = vpop.eup %4328 }
 0x5f5   :  { %789 = vrot.lane.b32.xlu1 %v4329_v39, %s4852_s30 }
 0x5f7   :  { %903 = vperm.xlu0 %4304, %v901_v38   ;;  %v5327_v38 = vsel %vm681_vm7, %v5251_v33, 0.0 }
 0x665   :  { %v674_v44 = vpop.permute.xlu0 %673 }
 0x666   :  { %v676_v45 = vmul.f32 %v4323_v21, %v674_v44 }
 0x667   :  { %v790_v51 = vpop.permute.xlu1 %789 }
 0x668   :  { %v5260_v50 = vsel %vm681_vm7, %v676_v45, 0.0  ;;  %v792_v53 = vmul.f32 %v4325_v24, %v790_v51 }
 0x669   :  { %v798_v52 = vrot.slane %v5260_v50, 4 }
 0x66a   :  { %794 = vrot.lane.b32.xlu1 %v792_v53, %s4853_s11  ;;  %v906_v54 = vrot.slane %v792_v53, 4 }
 0x66b   :  { %799 = vrot.lane.b32.xlu0 %v798_v52, %s4852_s30 }
 0x66e   :  { %907 = vrot.lane.b32.xlu1 %v906_v54, %s4853_s11 }
 0x672   :  { %914 = vrot.lane.b32.xlu1 %v913_v55, %s4854_s2  ;;  %v5267_v56 = vpop.permute.xlu0 %903 }
 0x673   :  { %vm905_vm12 = vcmp.eq.s32.totalorder %v5267_v56, 1  ;;  %v1359_v56 = vsel %vm1144_vm15, 1, %v4849_v0 }
 0x6dc   :  { %v795_v61 = vpop.permute.xlu1 %794 }
 0x6dd   :  { %v800_v62 = vpop.permute.xlu0 %799 }
 0x6de   :  { %v802_v63 = vsel %vm469_vm9, %v795_v61, %v800_v62 }
 0x6df   :  { %v804_v2 = vrot.slane %v802_v63, 4 }
 0x6e0   :  { %v908_v4 = vpop.permute.xlu1 %907 }
 0x6e1   :  { %3903 = vmatmul.mubr.msk.f32.vlgmr.msra.gmra.mxu1 %vm579_vm10, %v804_v2  ;;  %v5275_v6 = vsel %vm905_vm12, %v908_v4, %v5200_v57 }
 0x6e2   :  { %3936 = vmatpush3.msra.mxu1 %v5087_v5  ;;  %3943 = vmatprep.mubr.msk.f32.mxu1 %vm4851_vm2, %v4850_v1 }
 0x6e3   :  { %3914 = vmatmul.mubr.msk.f32.vlgmr.msra.gmra.mxu0 %vm469_vm9, %v5275_v6  ;;  %3937 = vmatprep.subr.mxu1 %v4850_v1 }
 0x6e4   :  { %3917 = vmatpush3.msra.mxu0 %v5153_v40  ;;  %3938 = vmatpush3.msra.mxu1 %v5094_v8  ;;  %v915_v30 = vpop.permute.xlu1 %914 }
 0x6e5   :  { %3918 = vmatprep.subr.mxu0 %v4850_v1  ;;  %3932 = vmatprep.mubr.msk.f32.mxu0 %vm4851_vm2, %v4850_v1 }
 0x6e6   :  { %3919 = vmatpush3.msra.mxu0 %v5155_v41  ;;  %3939 = vmatprep.subr.mxu1 %v4850_v1 }
 0x6e7   :  { %3920 = vmatprep.subr.mxu0 %v4850_v1  ;;  %3940 = vmatpush3.msra.mxu1 %v5100_v10 }
 0x6e8   :  { %3921 = vmatpush3.msra.mxu0 %v5159_v42  ;;  %3941 = vmatprep.subr.mxu1 %v4850_v1 }
 0x6e9   :  { %3922 = vmatprep.subr.mxu0 %v4850_v1  ;;  %3942 = vmatpush3.msra.mxu1 %v5104_v12 }
 0x6ea   :  { %3923 = vmatpush3.msra.mxu0 %v5163_v43  ;;  %3946 = vmatprep.subr.mxu1 %v4850_v1 }
 0x6eb   :  { %3924 = vmatprep.subr.mxu0 %v4850_v1 }
 0x6ec   :  { %3925 = vmatpush3.msra.mxu0 %v5173_v46 }
 0x6ed   :  { %3926 = vmatprep.subr.mxu0 %v4850_v1 }
 0x6ee   :  { %3927 = vmatpush3.msra.mxu0 %v5176_v47 }
 0x6ef   :  { %3928 = vmatprep.subr.mxu0 %v4850_v1 }
 0x6f0   :  { %3929 = vmatpush3.msra.mxu0 %v5179_v48 }
 0x6f1   :  { %3930 = vmatprep.subr.mxu0 %v4850_v1 }
 0x6f2   :  { %3931 = vmatpush3.msra.mxu0 %v5185_v49 }
 0x6f3   :  { %3965 = vmatprep.subr.mxu0 %v4850_v1 }
 0x7a1   :  { %v873_v57 = vpop.f32.mrf.mxu1 }
 0x7a2   :  { %v874_v9 = vadd.f32 %v5237_v60, %v873_v57 }
 0x7a3   :  { %v993_v11 = vpop.f32.mrf.mxu0  ;;  %v3904_v13 = vpop.f32.mrf.mxu1 }
 0x7a4   :  { %4330 = vtanh.f32 %v874_v9  ;;  %v997_v14 = vadd.f32 %v993_v11, %v5309_v7  ;;  %v3561_v25 = vmul.f32 -1.442695, %v874_v9 }
 0x7a5   :  { %v3915_v16 = vpop.f32.mrf.mxu0 }
 0x7a6   :  { %4332 = vtanh.f32 %v997_v14  ;;  %v3563_v19 = vmul.f32 -1.442695, %v997_v14 }
 0x7a7   :  { %4334 = vpow2.f32 %v3561_v25 }
 0x7a8   :  { %4336 = vpow2.f32 %v3563_v19 }
 0x7b1   :  { %v4331_v17 = vpop.eup %4330 }
 0x7b2   :  { %886 = vrot.lane.b32.xlu0 %v4331_v17, %s4852_s30 }
 0x7b3   :  { %v4333_v18 = vpop.eup %4332 }
 0x7b4   :  { %1011 = vrot.lane.b32.xlu1 %v4333_v18, %s4852_s30  ;;  %v4335_v21 = vpop.eup %4334 }
 0x7b5   :  { %v880_v22 = vadd.f32 1.0, %v4335_v21  ;;  %v4337_v23 = vpop.eup %4336 }
 0x7b6   :  { %917 = vrot.lane.b32.xlu0 %v5248_v29, %s4854_s2  ;;  %v1001_v24 = vadd.f32 1.0, %v4337_v23  ;;  %v1132_v29 = vsel %vm923_vm13, 1, %v4849_v0 }
 0x7b7   :  { %4338 = vrcp.f32 %v880_v22 }
 0x7b8   :  { %4340 = vrcp.f32 %v1001_v24 }
 0x7c4   :  { %v4339_v27 = vpop.eup %4338 }
 0x7c5   :  { %v4341_v36 = vpop.eup %4340  ;;  %v884_v39 = vmul.f32 %v4339_v27, %v5327_v38 }
 0x824   :  { %v887_v28 = vpop.permute.xlu0 %886 }
 0x825   :  { %v889_v31 = vmul.f32 %v4339_v27, %v887_v28 }
 0x826   :  { %v1012_v34 = vpop.permute.xlu1 %1011 }
 0x827   :  { %891 = vrot.lane.b32.xlu1 %v889_v31, %s4853_s11  ;;  %v1014_v37 = vmul.f32 %v4341_v36, %v1012_v34 }
 0x828   :  { %v918_v32 = vpop.permute.xlu0 %917 }
 0x829   :  { %v920_v35 = vsel %vm905_vm12, %v915_v30, %v918_v32 }
 0x82a   :  { %1006 = vrot.lane.b32.xlu0 %v920_v35, %s4853_s11 }
 0x82b   :  { %1134 = vperm.xlu1 %4305, %v1132_v29  }
 0x82e   :  { %1016 = vrot.lane.b32.xlu0 %v1014_v37, %s4853_s11 }
 0x899   :  { %v892_v44 = vpop.permute.xlu1 %891 }
 0x89a   :  { %v5330_v45 = vadd.f32 %v892_v44, %v884_v39 }
 0x89c   :  { %4342 = vtanh.f32 %v5330_v45  ;;  %v1007_v51 = vpop.permute.xlu0 %1006  ;;  %v5399_v44 = vsel %vm905_vm12, %v5330_v45, %v5327_v38 }
 0x89d   :  { %v1009_v52 = vmul.f32 %v4341_v36, %v1007_v51 }
 0x8a0   :  { %v1017_v53 = vpop.permute.xlu0 %1016 }
 0x8a1   :  { %v1019_v54 = vadd.f32 %v1017_v53, %v1009_v52 }
 0x8a3   :  { %4344 = vtanh.f32 %v1019_v54 }
 0x8a6   :  { %v5333_v55 = vpop.permute.xlu1 %1134 }
 0x8a7   :  { %vm1136_vm14 = vcmp.eq.s32.totalorder %v5333_v55, 1 }
 0x8a8   :  { %v5338_v20 = vsel %vm1136_vm14, %v1019_v54, %v1007_v51 }
 0x8a9   :  { %v4343_v33 = vpop.eup %4342  ;;  %v1232_v54 = vrot.slane %v5338_v20, 4 }
 0x8aa   :  { %897 = vrot.lane.b32.xlu0 %v4343_v33, %s4852_s30 }
 0x8ae   :  { %1137 = vrot.lane.b32.xlu0 %v5275_v6, %s4854_s2 }
 0x8b0   :  { %v4345_v61 = vpop.eup %4344 }
 0x8b1   :  { %1022 = vrot.lane.b32.xlu1 %v4345_v61, %s4852_s30 }
 0x91c   :  { %v898_v62 = vpop.permute.xlu0 %897 }
 0x91d   :  { %v900_v63 = vmul.f32 %v4339_v27, %v898_v62 }
 0x91f   :  { %v5347_v2 = vsel %vm905_vm12, %v900_v63, %v5260_v50  ;;  %vm2319_vm12 = vcmask 80896  }
 0x920   :  { %1031 = vrot.lane.b32.xlu0 %v5347_v2, %s4852_s30  ;;  %v1138_v9 = vpop.permute.xlu0 %1137 }
 0x923   :  { %v1023_v4 = vpop.permute.xlu1 %1022 }
 0x924   :  { %v1025_v57 = vmul.f32 %v4341_v36, %v1023_v4 }
 0x926   :  { %1027 = vrot.lane.b32.xlu1 %v1025_v57, %s4853_s11  ;;  %v1140_v6 = vsel %vm1136_vm14, %v1025_v57, %v1138_v9 }
 0x92a   :  { %1146 = vrot.lane.b32.xlu1 %v1140_v6, %s4853_s11 }
 0x992   :  { %v1032_v11 = vpop.permute.xlu0 %1031 }
 0x998   :  { %v1028_v13 = vpop.permute.xlu1 %1027 }
 0x999   :  { %v1034_v14 = vsel %vm469_vm9, %v1028_v13, %v1032_v11 }
 0x99a   :  { %3933 = vmatmul.mubr.msk.f32.vlgmr.msra.gmra.mxu0 %vm579_vm10, %v1034_v14 }
 0x99b   :  { %3966 = vmatpush3.msra.mxu0 %v5087_v5  ;;  %3973 = vmatprep.mubr.msk.f32.mxu0 %vm4851_vm2, %v4850_v1 }
 0x99c   :  { %v5360_v50 = vpop.permute.xlu1 %1146  ;;  %3967 = vmatprep.subr.mxu0 %v4850_v1 }
 0x99d   :  { %3944 = vmatmul.mubr.msk.f32.vlgmr.msra.gmra.mxu1 %vm469_vm9, %v5360_v50  ;;  %3968 = vmatpush3.msra.mxu0 %v5094_v8 }
 0x99e   :  { %3947 = vmatpush3.msra.mxu1 %v5153_v40  ;;  %3969 = vmatprep.subr.mxu0 %v4850_v1 }
 0x99f   :  { %3948 = vmatprep.subr.mxu1 %v4850_v1  ;;  %3962 = vmatprep.mubr.msk.f32.mxu1 %vm4851_vm2, %v4850_v1 }
 0x9a0   :  { %3949 = vmatpush3.msra.mxu1 %v5155_v41  ;;  %3970 = vmatpush3.msra.mxu0 %v5100_v10 }
 0x9a1   :  { %3950 = vmatprep.subr.mxu1 %v4850_v1  ;;  %3971 = vmatprep.subr.mxu0 %v4850_v1 }
 0x9a2   :  { %3951 = vmatpush3.msra.mxu1 %v5159_v42  ;;  %3972 = vmatpush3.msra.mxu0 %v5104_v12 }
 0x9a3   :  { %3952 = vmatprep.subr.mxu1 %v4850_v1  ;;  %3976 = vmatprep.subr.mxu0 %v4850_v1 }
 0x9a4   :  { %3953 = vmatpush3.msra.mxu1 %v5163_v43 }
 0x9a5   :  { %3954 = vmatprep.subr.mxu1 %v4850_v1 }
 0x9a6   :  { %3955 = vmatpush3.msra.mxu1 %v5173_v46 }
 0x9a7   :  { %3956 = vmatprep.subr.mxu1 %v4850_v1 }
 0x9a8   :  { %3957 = vmatpush3.msra.mxu1 %v5176_v47 }
 0x9a9   :  { %3958 = vmatprep.subr.mxu1 %v4850_v1 }
 0x9aa   :  { %3959 = vmatpush3.msra.mxu1 %v5179_v48 }
 0x9ab   :  { %3960 = vmatprep.subr.mxu1 %v4850_v1 }
 0x9ac   :  { %3961 = vmatpush3.msra.mxu1 %v5185_v49 }
 0x9ad   :  { %3995 = vmatprep.subr.mxu1 %v4850_v1 }
 0xa5a   :  { %v1104_v16 = vpop.f32.mrf.mxu0 }
 0xa5b   :  { %v1105_v17 = vadd.f32 %v5237_v60, %v1104_v16 }
 0xa5c   :  { %v3934_v18 = vpop.f32.mrf.mxu0 }
 0xa5d   :  { %4346 = vtanh.f32 %v1105_v17  ;;  %v1216_v25 = vpop.f32.mrf.mxu1  ;;  %v3565_v27 = vmul.f32 -1.442695, %v1105_v17 }
 0xa5e   :  { %v1221_v19 = vrot.slane %v1216_v25, 4 }
 0xa5f   :  { %v3945_v21 = vpop.f32.mrf.mxu1 }
 0xa60   :  { %v1223_v22 = vadd.f32 %v1221_v19, %v5309_v7 }
 0xa62   :  { %4348 = vtanh.f32 %v1223_v22  ;;  %v3567_v28 = vmul.f32 -1.442695, %v1223_v22 }
 0xa63   :  { %4350 = vpow2.f32 %v3565_v27 }
 0xa64   :  { %4352 = vpow2.f32 %v3567_v28 }
 0xa6a   :  { %v4347_v23 = vpop.eup %4346 }
 0xa6b   :  { %1117 = vrot.lane.b32.xlu0 %v4347_v23, %s4852_s30 }
 0xa6f   :  { %v4349_v24 = vpop.eup %4348 }
 0xa70   :  { %1236 = vrot.lane.b32.xlu1 %v4349_v24, %s4852_s30  ;;  %v4351_v30 = vpop.eup %4350 }
 0xa71   :  { %v1111_v31 = vadd.f32 1.0, %v4351_v30  ;;  %v4353_v32 = vpop.eup %4352 }
 0xa72   :  { %v1227_v29 = vadd.f32 1.0, %v4353_v32 }
 0xa73   :  { %4354 = vrcp.f32 %v1111_v31 }
 0xa74   :  { %4356 = vrcp.f32 %v1227_v29 }
 0xa80   :  { %v4355_v34 = vpop.eup %4354 }
 0xa81   :  { %v4357_v36 = vpop.eup %4356  ;;  %v1115_v51 = vmul.f32 %v4355_v34, %v5399_v44 }
 0xa82   :  { %v1234_v33 = vmul.f32 %v4357_v36, %v1232_v54 }
 0xadd   :  { %v1118_v35 = vpop.permute.xlu0 %1117 }
 0xade   :  { %v1120_v7 = vmul.f32 %v4355_v34, %v1118_v35 }
 0xae0   :  { %1122 = vrot.lane.b32.xlu0 %v1120_v7, %s4853_s11 }
 0xae2   :  { %v1237_v37 = vpop.permute.xlu1 %1236 }
 0xae3   :  { %v1239_v39 = vmul.f32 %v4357_v36, %v1237_v37 }
 0xae5   :  { %1241 = vrot.lane.b32.xlu1 %v1239_v39, %s4853_s11 }
 0xb52   :  { %v1123_v52 = vpop.permute.xlu0 %1122 }
 0xb53   :  { %v5402_v53 = vadd.f32 %v1123_v52, %v1115_v51 }
 0xb55   :  { %4358 = vtanh.f32 %v5402_v53  ;;  %v5481_v3 = vsel %vm1136_vm14, %v5402_v53, %v5399_v44 }
 0xb57   :  { %v1242_v61 = vpop.permute.xlu1 %1241 }
 0xb58   :  { %v1244_v62 = vadd.f32 %v1242_v61, %v1234_v33 }
 0xb5a   :  { %4360 = vtanh.f32 %v1244_v62  ;;  %v1371_v14 = vrot.slane %v1244_v62, 4 }
 0xb62   :  { %v4359_v63 = vpop.eup %4358 }
 0xb63   :  { %1128 = vrot.lane.b32.xlu0 %v4359_v63, %s4852_s30 }
 0xb67   :  { %v4361_v38 = vpop.eup %4360  ;;  %1361 = vperm.xlu0 %4304, %v1359_v56  }
 0xb68   :  { %1247 = vrot.lane.b32.xlu1 %v4361_v38, %s4852_s30 }
 0xbd5   :  { %v1129_v45 = vpop.permute.xlu0 %1128 }
 0xbd6   :  { %v1131_v4 = vmul.f32 %v4355_v34, %v1129_v45 }
 0xbd8   :  { %v5413_v57 = vsel %vm1136_vm14, %v1131_v4, %v5347_v2 }
 0xbd9   :  { %v1256_v9 = vrot.slane %v5413_v57, 4 }
 0xbda   :  { %v1248_v6 = vpop.permute.xlu1 %1247 }
 0xbdb   :  { %v1250_v11 = vmul.f32 %v4357_v36, %v1248_v6  ;;  %1257 = vrot.lane.b32.xlu0 %v1256_v9, %s4852_s30 }
 0xbdd   :  { %1252 = vrot.lane.b32.xlu1 %v1250_v11, %s4853_s11  ;;  %v1364_v13 = vrot.slane %v1250_v11, 4 }
 0xbe1   :  { %1365 = vrot.lane.b32.xlu1 %v1364_v13, %s4853_s11 }
 0xbe2   :  { %v5420_v16 = vpop.permute.xlu0 %1361 }
 0xbe3   :  { %vm1363_vm1 = vcmp.eq.s32.totalorder %v5420_v16, 1 }
 0xbe5   :  { %1372 = vrot.lane.b32.xlu1 %v1371_v14, %s4854_s2 }
 0xc4d   :  { %v1258_v17 = vpop.permute.xlu0 %1257 }
 0xc4f   :  { %v1253_v18 = vpop.permute.xlu1 %1252 }
 0xc50   :  { %v1260_v2 = vsel %vm469_vm9, %v1253_v18, %v1258_v17 }
 0xc51   :  { %v1262_v25 = vrot.slane %v1260_v2, 4 }
 0xc53   :  { %v1366_v19 = vpop.permute.xlu1 %1365  ;;  %3963 = vmatmul.mubr.msk.f32.vlgmr.msra.gmra.mxu1 %vm579_vm10, %v1262_v25 }
 0xc54   :  { %v5428_v21 = vsel %vm1363_vm1, %v1366_v19, %v5360_v50  ;;  %3996 = vmatpush3.msra.mxu1 %v5087_v5  ;;  %4003 = vmatprep.mubr.msk.f32.mxu1 %vm4851_vm2, %v4850_v1 }
 0xc55   :  { %3974 = vmatmul.mubr.msk.f32.vlgmr.msra.gmra.mxu0 %vm469_vm9, %v5428_v21  ;;  %3997 = vmatprep.subr.mxu1 %v4850_v1 }
 0xc56   :  { %3977 = vmatpush3.msra.mxu0 %v5153_v40  ;;  %3998 = vmatpush3.msra.mxu1 %v5094_v8  ;;  %v5462_v8 = vadd.f32 %v5142_v26, %v5235_v59 }
 0xc57   :  { %3978 = vmatprep.subr.mxu0 %v4850_v1  ;;  %3992 = vmatprep.mubr.msk.f32.mxu0 %vm4851_vm2, %v4850_v1  ;;  %v1373_v35 = vpop.permute.xlu1 %1372 }
 0xc58   :  { %3979 = vmatpush3.msra.mxu0 %v5155_v41  ;;  %3999 = vmatprep.subr.mxu1 %v4850_v1 }
 0xc59   :  { %3980 = vmatprep.subr.mxu0 %v4850_v1  ;;  %4000 = vmatpush3.msra.mxu1 %v5100_v10 }
 0xc5a   :  { %3981 = vmatpush3.msra.mxu0 %v5159_v42  ;;  %4001 = vmatprep.subr.mxu1 %v4850_v1 }
 0xc5b   :  { %3982 = vmatprep.subr.mxu0 %v4850_v1  ;;  %4002 = vmatpush3.msra.mxu1 %v5104_v12 }
 0xc5c   :  { %3983 = vmatpush3.msra.mxu0 %v5163_v43  ;;  %4006 = vmatprep.subr.mxu1 %v4850_v1 }
 0xc5d   :  { %3984 = vmatprep.subr.mxu0 %v4850_v1 }
 0xc5e   :  { %3985 = vmatpush3.msra.mxu0 %v5173_v46 }
 0xc5f   :  { %3986 = vmatprep.subr.mxu0 %v4850_v1 }
 0xc60   :  { %3987 = vmatpush3.msra.mxu0 %v5176_v47 }
 0xc61   :  { %3988 = vmatprep.subr.mxu0 %v4850_v1 }
 0xc62   :  { %3989 = vmatpush3.msra.mxu0 %v5179_v48 }
 0xc63   :  { %3990 = vmatprep.subr.mxu0 %v4850_v1 }
 0xc64   :  { %3991 = vmatpush3.msra.mxu0 %v5185_v49 }
 0xc65   :  { %4025 = vmatprep.subr.mxu0 %v4850_v1 }
 0xd13   :  { %v1331_v5 = vpop.f32.mrf.mxu1 }
 0xd14   :  { %v1332_v10 = vadd.f32 %v5237_v60, %v1331_v5  ;;  %v5530_v5 = vld [vmem:[#allocation7 + $0x8] sm:$0xff] }
 0xd15   :  { %v3964_v12 = vpop.f32.mrf.mxu1  ;;  %v1451_v50 = vpop.f32.mrf.mxu0 }
 0xd16   :  { %4362 = vtanh.f32 %v1332_v10  ;;  %v1455_v22 = vadd.f32 %v1451_v50, %v5462_v8  ;;  %v3569_v26 = vmul.f32 -1.442695, %v1332_v10 }
 0xd17   :  { %v3975_v23 = vpop.f32.mrf.mxu0 }
 0xd18   :  { %4364 = vtanh.f32 %v1455_v22  ;;  %v3571_v59 = vmul.f32 -1.442695, %v1455_v22 }
 0xd19   :  { %4366 = vpow2.f32 %v3569_v26 }
 0xd1a   :  { %4368 = vpow2.f32 %v3571_v59 }
 0xd23   :  { %v4363_v24 = vpop.eup %4362 }
 0xd24   :  { %1344 = vrot.lane.b32.xlu0 %v4363_v24, %s4852_s30 }
 0xd25   :  { %v4365_v27 = vpop.eup %4364 }
 0xd26   :  { %1469 = vrot.lane.b32.xlu1 %v4365_v27, %s4852_s30  ;;  %v4367_v28 = vpop.eup %4366 }
 0xd27   :  { %v1338_v30 = vadd.f32 1.0, %v4367_v28  ;;  %v4369_v31 = vpop.eup %4368 }
 0xd28   :  { %1375 = vrot.lane.b32.xlu0 %v5338_v20, %s4854_s2  ;;  %v1459_v32 = vadd.f32 1.0, %v4369_v31  ;;  %v1590_v20 = vsel %vm1381_vm3, 1, %v4849_v0  ;;  %vm2532_vm3 = vcmask 1042432  }
 0xd29   :  { %4370 = vrcp.f32 %v1338_v30 }
 0xd2a   :  { %4372 = vrcp.f32 %v1459_v32 }
 0xd36   :  { %v4371_v29 = vpop.eup %4370 }
 0xd37   :  { %v4373_v51 = vpop.eup %4372  ;;  %v1342_v54 = vmul.f32 %v4371_v29, %v5481_v3 }
 0xd96   :  { %v1345_v34 = vpop.permute.xlu0 %1344 }
 0xd97   :  { %v1347_v7 = vmul.f32 %v4371_v29, %v1345_v34 }
 0xd98   :  { %v1470_v37 = vpop.permute.xlu1 %1469 }
 0xd99   :  { %1349 = vrot.lane.b32.xlu1 %v1347_v7, %s4853_s11  ;;  %v1472_v52 = vmul.f32 %v4373_v51, %v1470_v37 }
 0xd9a   :  { %v1376_v36 = vpop.permute.xlu0 %1375 }
 0xd9b   :  { %v1378_v39 = vsel %vm1363_vm1, %v1373_v35, %v1376_v36 }
 0xd9c   :  { %1464 = vrot.lane.b32.xlu0 %v1378_v39, %s4853_s11 }
 0xd9d   :  { %1592 = vperm.xlu1 %4305, %v1590_v20  }
 0xda0   :  { %1474 = vrot.lane.b32.xlu0 %v1472_v52, %s4853_s11 }
 0xe0b   :  { %v1350_v33 = vpop.permute.xlu1 %1349 }
 0xe0c   :  { %v5484_v61 = vadd.f32 %v1350_v33, %v1342_v54 }
 0xe0e   :  { %4374 = vtanh.f32 %v5484_v61  ;;  %v1465_v62 = vpop.permute.xlu0 %1464 }
 0xe0f   :  { %v1467_v63 = vmul.f32 %v4373_v51, %v1465_v62 }
 0xe12   :  { %v1475_v56 = vpop.permute.xlu0 %1474 }
 0xe13   :  { %v1477_v38 = vadd.f32 %v1475_v56, %v1467_v63 }
 0xe15   :  { %4376 = vtanh.f32 %v1477_v38 }
 0xe18   :  { %v5487_v45 = vpop.permute.xlu1 %1592 }
 0xe19   :  { %vm1594_vm4 = vcmp.eq.s32.totalorder %v5487_v45, 1 }
 0xe1a   :  { %v5492_v55 = vsel %vm1594_vm4, %v1477_v38, %v1465_v62 }
 0xe1b   :  { %v4375_v44 = vpop.eup %4374  ;;  %v1690_v36 = vrot.slane %v5492_v55, 4 }
 0xe1c   :  { %1355 = vrot.lane.b32.xlu0 %v4375_v44, %s4852_s30 }
 0xe20   :  { %1595 = vrot.lane.b32.xlu0 %v5428_v21, %s4854_s2  ;;  %v5521_v21 = vld [vmem:[#allocation7 + $0x10] sm:$0xff] }
 0xe22   :  { %v4377_v53 = vpop.eup %4376 }
 0xe23   :  { %1480 = vrot.lane.b32.xlu1 %v4377_v53, %s4852_s30 }
 0xe8e   :  { %v1356_v4 = vpop.permute.xlu0 %1355 }
 0xe8f   :  { %v1358_v9 = vmul.f32 %v4371_v29, %v1356_v4  ;;  %v5561_v29 = vsel %vm1363_vm1, %v5484_v61, %v5481_v3 }
 0xe91   :  { %v5501_v6 = vsel %vm1363_vm1, %v1358_v9, %v5413_v57  ;;  %v5511_v57 = vld [vmem:[#allocation7 + $0x18] sm:$0xff]  ;;  %vm2426_vm1 = vcmask 195584  }
 0xe92   :  { %1489 = vrot.lane.b32.xlu0 %v5501_v6, %s4852_s30  ;;  %v1596_v14 = vpop.permute.xlu0 %1595 }
 0xe95   :  { %v1481_v11 = vpop.permute.xlu1 %1480 }
 0xe96   :  { %v1483_v13 = vmul.f32 %v4373_v51, %v1481_v11  ;;  %v5571_v51 = vld [vmem:[%s6098_s12] sm:$0xf] }
 0xe97   :  { %vm1602_vm5 = vcmp.ge.f32.partialorder %v5571_v51, 6.0  ;;  %vm1839_vm7 = vcmp.ge.f32.partialorder %v5571_v51, 7.0 }
 0xe98   :  { %1485 = vrot.lane.b32.xlu1 %v1483_v13, %s4853_s11  ;;  %v1598_v17 = vsel %vm1594_vm4, %v1483_v13, %v1596_v14  ;;  %v1817_v52 = vsel %vm1602_vm5, 1, %v4849_v0 }
 0xe9c   :  { %1604 = vrot.lane.b32.xlu1 %v1598_v17, %s4853_s11  ;;  %v5603_v17 = vld [vmem:[#allocation9 + $0x38] sm:$0xff] }
 0xf04   :  { %v1490_v18 = vpop.permute.xlu0 %1489 }
 0xf0a   :  { %v1486_v2 = vpop.permute.xlu1 %1485 }
 0xf0b   :  { %v1492_v25 = vsel %vm469_vm9, %v1486_v2, %v1490_v18  ;;  %v5610_v18 = vld [vmem:[#allocation9 + $0x30] sm:$0xff]  ;;  %v5616_v2 = vld [vmem:[#allocation9 + $0x28] sm:$0xff] }
 0xf0c   :  { %3993 = vmatmul.mubr.msk.f32.vlgmr.msra.gmra.mxu0 %vm579_vm10, %v1492_v25  ;;  %v5622_v25 = vld [vmem:[#allocation9 + $0x20] sm:$0xff] }
 0xf0d   :  { %4026 = vmatpush3.msra.mxu0 %v5511_v57  ;;  %4033 = vmatprep.mubr.msk.f32.mxu0 %vm4851_vm2, %v4850_v1 }
 0xf0e   :  { %v5516_v19 = vpop.permute.xlu1 %1604  ;;  %4027 = vmatprep.subr.mxu0 %v4850_v1 }
 0xf0f   :  { %4004 = vmatmul.mubr.msk.f32.vlgmr.msra.gmra.mxu1 %vm469_vm9, %v5516_v19  ;;  %4028 = vmatpush3.msra.mxu0 %v5521_v21 }
 0xf10   :  { %4007 = vmatpush3.msra.mxu1 %v5153_v40  ;;  %4029 = vmatprep.subr.mxu0 %v4850_v1  ;;  %v5536_v40 = vld [vmem:[#allocation7] sm:$0xff] }
 0xf11   :  { %4008 = vmatprep.subr.mxu1 %v4850_v1  ;;  %4022 = vmatprep.mubr.msk.f32.mxu1 %vm4851_vm2, %v4850_v1 }
 0xf12   :  { %4009 = vmatpush3.msra.mxu1 %v5155_v41  ;;  %4030 = vmatpush3.msra.mxu0 %v5530_v5 }
 0xf13   :  { %4010 = vmatprep.subr.mxu1 %v4850_v1  ;;  %4031 = vmatprep.subr.mxu0 %v4850_v1 }
 0xf14   :  { %4011 = vmatpush3.msra.mxu1 %v5159_v42  ;;  %4032 = vmatpush3.msra.mxu0 %v5536_v40 }
 0xf15   :  { %4012 = vmatprep.subr.mxu1 %v4850_v1  ;;  %4036 = vmatprep.subr.mxu0 %v4850_v1 }
 0xf16   :  { %4013 = vmatpush3.msra.mxu1 %v5163_v43 }
 0xf17   :  { %4014 = vmatprep.subr.mxu1 %v4850_v1 }
 0xf18   :  { %4015 = vmatpush3.msra.mxu1 %v5173_v46 }
 0xf19   :  { %4016 = vmatprep.subr.mxu1 %v4850_v1 }
 0xf1a   :  { %4017 = vmatpush3.msra.mxu1 %v5176_v47 }
 0xf1b   :  { %4018 = vmatprep.subr.mxu1 %v4850_v1 }
 0xf1c   :  { %4019 = vmatpush3.msra.mxu1 %v5179_v48 }
 0xf1d   :  { %4020 = vmatprep.subr.mxu1 %v4850_v1 }
 0xf1e   :  { %4021 = vmatpush3.msra.mxu1 %v5185_v49 }
 0xf1f   :  { %4055 = vmatprep.subr.mxu1 %v4850_v1 }
 0xfcc   :  { %v1562_v41 = vpop.f32.mrf.mxu0 }
 0xfcd   :  { %v1563_v42 = vadd.f32 %v5237_v60, %v1562_v41  ;;  %v4447_v41 = vld [vmem:[#allocation6] ss:$0 sm:$0xff] }
 0xfce   :  { %v3994_v43 = vpop.f32.mrf.mxu0 }
 0xfcf   :  { %4378 = vtanh.f32 %v1563_v42  ;;  %v1674_v46 = vpop.f32.mrf.mxu1  ;;  %v3573_v49 = vmul.f32 -1.442695, %v1563_v42  ;;  %v5644_v42 = vadd.f32 %v4447_v41, %v5233_v58 }
 0xfd0   :  { %v1679_v10 = vrot.slane %v1674_v46, 4 }
 0xfd1   :  { %v4005_v12 = vpop.f32.mrf.mxu1 }
 0xfd2   :  { %v1681_v47 = vadd.f32 %v1679_v10, %v5462_v8 }
 0xfd4   :  { %4380 = vtanh.f32 %v1681_v47  ;;  %v3575_v22 = vmul.f32 -1.442695, %v1681_v47 }
 0xfd5   :  { %4382 = vpow2.f32 %v3573_v49 }
 0xfd6   :  { %4384 = vpow2.f32 %v3575_v22 }
 0xfdc   :  { %v4379_v50 = vpop.eup %4378 }
 0xfdd   :  { %1575 = vrot.lane.b32.xlu0 %v4379_v50, %s4852_s30 }
 0xfe1   :  { %v4381_v48 = vpop.eup %4380 }
 0xfe2   :  { %1694 = vrot.lane.b32.xlu1 %v4381_v48, %s4852_s30  ;;  %v4383_v23 = vpop.eup %4382 }
 0xfe3   :  { %v1569_v24 = vadd.f32 1.0, %v4383_v23  ;;  %v4385_v27 = vpop.eup %4384 }
 0xfe4   :  { %v1685_v26 = vadd.f32 1.0, %v4385_v27 }
 0xfe5   :  { %4386 = vrcp.f32 %v1569_v24 }
 0xfe6   :  { %4388 = vrcp.f32 %v1685_v26 }
 0xff2   :  { %v4387_v59 = vpop.eup %4386 }
 0xff3   :  { %v4389_v30 = vpop.eup %4388  ;;  %v1573_v34 = vmul.f32 %v4387_v59, %v5561_v29 }
 0xff4   :  { %v1692_v20 = vmul.f32 %v4389_v30, %v1690_v36 }
0x104f   :  { %v1576_v28 = vpop.permute.xlu0 %1575 }
0x1050   :  { %v1578_v8 = vmul.f32 %v4387_v59, %v1576_v28 }
0x1052   :  { %1580 = vrot.lane.b32.xlu0 %v1578_v8, %s4853_s11 }
0x1054   :  { %v1695_v31 = vpop.permute.xlu1 %1694 }
0x1055   :  { %v1697_v32 = vmul.f32 %v4389_v30, %v1695_v31 }
0x1057   :  { %1699 = vrot.lane.b32.xlu1 %v1697_v32, %s4853_s11 }
0x10c4   :  { %v1581_v35 = vpop.permute.xlu0 %1580 }
0x10c5   :  { %v5564_v7 = vadd.f32 %v1581_v35, %v1573_v34 }
0x10c7   :  { %4390 = vtanh.f32 %v5564_v7  ;;  %v5663_v35 = vsel %vm1594_vm4, %v5564_v7, %v5561_v29 }
0x10c9   :  { %v1700_v37 = vpop.permute.xlu1 %1699 }
0x10ca   :  { %v1702_v39 = vadd.f32 %v1700_v37, %v1692_v20 }
0x10cc   :  { %4392 = vtanh.f32 %v1702_v39  ;;  %v1829_v44 = vrot.slane %v1702_v39, 4 }
0x10d4   :  { %v4391_v16 = vpop.eup %4390 }
0x10d5   :  { %1586 = vrot.lane.b32.xlu0 %v4391_v16, %s4852_s30 }
0x10d9   :  { %v4393_v3 = vpop.eup %4392  ;;  %1819 = vperm.xlu0 %4304, %v1817_v52  }
0x10da   :  { %1705 = vrot.lane.b32.xlu1 %v4393_v3, %s4852_s30 }
0x1147   :  { %v1587_v54 = vpop.permute.xlu0 %1586 }
0x1148   :  { %v1589_v33 = vmul.f32 %v4387_v59, %v1587_v54 }
0x114a   :  { %v5580_v61 = vsel %vm1594_vm4, %v1589_v33, %v5501_v6  ;;  %vm2281_vm4 = vcmask 3072  }
0x114b   :  { %v1714_v62 = vrot.slane %v5580_v61, 4 }
0x114c   :  { %v1706_v63 = vpop.permute.xlu1 %1705 }
0x114d   :  { %v1708_v56 = vmul.f32 %v4389_v30, %v1706_v63  ;;  %1715 = vrot.lane.b32.xlu0 %v1714_v62, %s4852_s30 }
0x114f   :  { %1710 = vrot.lane.b32.xlu1 %v1708_v56, %s4853_s11  ;;  %v1822_v38 = vrot.slane %v1708_v56, 4 }
0x1153   :  { %1823 = vrot.lane.b32.xlu1 %v1822_v38, %s4853_s11 }
0x1154   :  { %v5587_v53 = vpop.permute.xlu0 %1819 }
0x1155   :  { %vm1821_vm6 = vcmp.eq.s32.totalorder %v5587_v53, 1  ;;  %v2296_v53 = vld [vmem:[%s6099_s3] sm:$0xff] }
0x1157   :  { %1830 = vrot.lane.b32.xlu1 %v1829_v44, %s4854_s2 }
0x11bf   :  { %v1716_v4 = vpop.permute.xlu0 %1715 }
0x11c1   :  { %v1711_v9 = vpop.permute.xlu1 %1710 }
0x11c2   :  { %v1718_v6 = vsel %vm469_vm9, %v1711_v9, %v1716_v4 }
0x11c3   :  { %v1720_v11 = vrot.slane %v1718_v6, 4 }
0x11c5   :  { %v1824_v13 = vpop.permute.xlu1 %1823  ;;  %4023 = vmatmul.mubr.msk.f32.vlgmr.msra.gmra.mxu1 %vm579_vm10, %v1720_v11 }
0x11c6   :  { %v5595_v14 = vsel %vm1821_vm6, %v1824_v13, %v5516_v19  ;;  %4056 = vmatpush3.msra.mxu1 %v5511_v57  ;;  %4063 = vmatprep.mubr.msk.f32.mxu1 %vm4851_vm2, %v4850_v1  ;;  %v5627_v57 = vld [vmem:[#allocation9 + $0x18] sm:$0xff]  ;;  %v5631_v19 = vld [vmem:[#allocation9 + $0x10] sm:$0xff] }
0x11c7   :  { %4034 = vmatmul.mubr.msk.f32.vlgmr.msra.gmra.mxu0 %vm469_vm9, %v5595_v14  ;;  %4057 = vmatprep.subr.mxu1 %v4850_v1 }
0x11c8   :  { %4037 = vmatpush3.msra.mxu0 %v5603_v17  ;;  %4058 = vmatpush3.msra.mxu1 %v5521_v21  ;;  %v5635_v21 = vld [vmem:[#allocation9 + $0x8] sm:$0xff] }
0x11c9   :  { %4038 = vmatprep.subr.mxu0 %v4850_v1  ;;  %4052 = vmatprep.mubr.msk.f32.mxu0 %vm4851_vm2, %v4850_v1  ;;  %v1831_v59 = vpop.permute.xlu1 %1830 }
0x11ca   :  { %4039 = vmatpush3.msra.mxu0 %v5610_v18  ;;  %4059 = vmatprep.subr.mxu1 %v4850_v1 }
0x11cb   :  { %4040 = vmatprep.subr.mxu0 %v4850_v1  ;;  %4060 = vmatpush3.msra.mxu1 %v5530_v5  ;;  %v5639_v5 = vld [vmem:[#allocation9] sm:$0xff] }
0x11cc   :  { %4041 = vmatpush3.msra.mxu0 %v5616_v2  ;;  %4061 = vmatprep.subr.mxu1 %v4850_v1 }
0x11cd   :  { %4042 = vmatprep.subr.mxu0 %v4850_v1  ;;  %4062 = vmatpush3.msra.mxu1 %v5536_v40 }
0x11ce   :  { %4043 = vmatpush3.msra.mxu0 %v5622_v25  ;;  %4066 = vmatprep.subr.mxu1 %v4850_v1 }
0x11cf   :  { %4044 = vmatprep.subr.mxu0 %v4850_v1 }
0x11d0   :  { %4045 = vmatpush3.msra.mxu0 %v5627_v57 }
0x11d1   :  { %4046 = vmatprep.subr.mxu0 %v4850_v1 }
0x11d2   :  { %4047 = vmatpush3.msra.mxu0 %v5631_v19 }
0x11d3   :  { %4048 = vmatprep.subr.mxu0 %v4850_v1 }
0x11d4   :  { %4049 = vmatpush3.msra.mxu0 %v5635_v21 }
0x11d5   :  { %4050 = vmatprep.subr.mxu0 %v4850_v1 }
0x11d6   :  { %4051 = vmatpush3.msra.mxu0 %v5639_v5 }
0x11d7   :  { %4085 = vmatprep.subr.mxu0 %v4850_v1 }
0x1285   :  { %v1789_v40 = vpop.f32.mrf.mxu1 }
0x1286   :  { %v1790_v43 = vadd.f32 %v5237_v60, %v1789_v40 }
0x1287   :  { %v4024_v46 = vpop.f32.mrf.mxu1  ;;  %v1909_v10 = vpop.f32.mrf.mxu0 }
0x1288   :  { %4394 = vtanh.f32 %v1790_v43  ;;  %v1913_v12 = vadd.f32 %v1909_v10, %v5644_v42  ;;  %v3577_v58 = vmul.f32 -1.442695, %v1790_v43 }
0x1289   :  { %v4035_v47 = vpop.f32.mrf.mxu0 }
0x128a   :  { %4396 = vtanh.f32 %v1913_v12  ;;  %v3579_v49 = vmul.f32 -1.442695, %v1913_v12 }
0x128b   :  { %4398 = vpow2.f32 %v3577_v58 }
0x128c   :  { %4400 = vpow2.f32 %v3579_v49 }
0x1295   :  { %v4395_v50 = vpop.eup %4394 }
0x1296   :  { %1802 = vrot.lane.b32.xlu0 %v4395_v50, %s4852_s30 }
0x1297   :  { %v4397_v48 = vpop.eup %4396 }
0x1298   :  { %1927 = vrot.lane.b32.xlu1 %v4397_v48, %s4852_s30  ;;  %v4399_v60 = vpop.eup %4398 }
0x1299   :  { %v1796_v22 = vadd.f32 1.0, %v4399_v60  ;;  %v4401_v23 = vpop.eup %4400 }
0x129a   :  { %1833 = vrot.lane.b32.xlu0 %v5492_v55, %s4854_s2  ;;  %v1917_v24 = vadd.f32 1.0, %v4401_v23  ;;  %v2048_v55 = vsel %vm1839_vm7, 1, %v4849_v0  ;;  %vm2635_vm7 = vcmask 1045504  }
0x129b   :  { %4402 = vrcp.f32 %v1796_v22 }
0x129c   :  { %4404 = vrcp.f32 %v1917_v24 }
0x12a8   :  { %v4403_v27 = vpop.eup %4402 }
0x12a9   :  { %v4405_v32 = vpop.eup %4404  ;;  %v1800_v36 = vmul.f32 %v4403_v27, %v5663_v35 }
0x1308   :  { %v1803_v26 = vpop.permute.xlu0 %1802 }
0x1309   :  { %v1805_v28 = vmul.f32 %v4403_v27, %v1803_v26 }
0x130a   :  { %v1928_v30 = vpop.permute.xlu1 %1927 }
0x130b   :  { %1807 = vrot.lane.b32.xlu1 %v1805_v28, %s4853_s11  ;;  %v1930_v34 = vmul.f32 %v4405_v32, %v1928_v30  ;;  %v2317_v30 = vld [vmem:[#allocation12] sm:$0xff] }
0x130c   :  { %v1834_v8 = vpop.permute.xlu0 %1833 }
0x130d   :  { %v1836_v31 = vsel %vm1821_vm6, %v1831_v59, %v1834_v8  ;;  %v2318_v8 = vld [vmem:[#allocation12 + $0x8] sm:$0x3] }
0x130e   :  { %1922 = vrot.lane.b32.xlu0 %v1836_v31, %s4853_s11 }
0x130f   :  { %2050 = vperm.xlu1 %4305, %v2048_v55  }
0x1312   :  { %1932 = vrot.lane.b32.xlu0 %v1930_v34, %s4853_s11 }
0x137d   :  { %v1808_v20 = vpop.permute.xlu1 %1807 }
0x137e   :  { %v5666_v37 = vadd.f32 %v1808_v20, %v1800_v36 }
0x1380   :  { %4406 = vtanh.f32 %v5666_v37  ;;  %v1923_v39 = vpop.permute.xlu0 %1922  ;;  %v5726_v60 = vsel %vm1821_vm6, %v5666_v37, %v5663_v35 }
0x1381   :  { %v1925_v16 = vmul.f32 %v4405_v32, %v1923_v39 }
0x1384   :  { %v1933_v52 = vpop.permute.xlu0 %1932 }
0x1385   :  { %v1935_v3 = vadd.f32 %v1933_v52, %v1925_v16  ;;  %v2298_v16 = vld [vmem:[%s6099_s3 + $0x10] sm:$0xff] }
0x1387   :  { %4408 = vtanh.f32 %v1935_v3 }
0x138a   :  { %v5669_v54 = vpop.permute.xlu1 %2050 }
0x138b   :  { %vm2052_vm8 = vcmp.eq.s32.totalorder %v5669_v54, 1  ;;  %v2420_v54 = vld [vmem:[%s6061_s14 + $0x8] sm:$0xff] }
0x138c   :  { %v5674_v45 = vsel %vm2052_vm8, %v1935_v3, %v1923_v39  ;;  %v2297_v39 = vld [vmem:[%s6099_s3 + $0x8] sm:$0xff]  ;;  %v3085_v3 = vld [vmem:[%s6100_s24] sm:$0xf] }
0x138d   :  { %v4407_v29 = vpop.eup %4406 }
0x138e   :  { %1813 = vrot.lane.b32.xlu0 %v4407_v29, %s4852_s30 }
0x1392   :  { %2053 = vrot.lane.b32.xlu0 %v5595_v14, %s4854_s2  ;;  %v5714_v14 = vld [vmem:[#allocation10] ss:$0 sm:$0xff] }
0x1394   :  { %v4409_v7 = vpop.eup %4408 }
0x1395   :  { %1938 = vrot.lane.b32.xlu1 %v4409_v7, %s4852_s30 }
0x1400   :  { %v1814_v33 = vpop.permute.xlu0 %1813 }
0x1401   :  { %v1816_v62 = vmul.f32 %v4403_v27, %v1814_v33  ;;  %v2148_v27 = vrot.slane %v5674_v45, 4 }
0x1403   :  { %v5683_v63 = vsel %vm1821_vm6, %v1816_v62, %v5580_v61  ;;  %vm2522_vm6 = vcmask 89088  }
0x1404   :  { %1947 = vrot.lane.b32.xlu0 %v5683_v63, %s4852_s30  ;;  %v2054_v44 = vpop.permute.xlu0 %2053 }
0x1407   :  { %v1939_v56 = vpop.permute.xlu1 %1938 }
0x1408   :  { %v1941_v38 = vmul.f32 %v4405_v32, %v1939_v56 }
0x140a   :  { %1943 = vrot.lane.b32.xlu1 %v1941_v38, %s4853_s11  ;;  %v2056_v4 = vsel %vm2052_vm8, %v1941_v38, %v2054_v44 }
0x140e   :  { %2062 = vrot.lane.b32.xlu1 %v2056_v4, %s4853_s11 }
0x1476   :  { %v1948_v9 = vpop.permute.xlu0 %1947 }
0x147c   :  { %v1944_v6 = vpop.permute.xlu1 %1943 }
0x147d   :  { %v1950_v11 = vsel %vm469_vm9, %v1944_v6, %v1948_v9 }
0x147e   :  { %4053 = vmatmul.mubr.msk.f32.vlgmr.msra.gmra.mxu0 %vm579_vm10, %v1950_v11 }
0x147f   :  { %4089 = vmatprep.mubr.msk.f32.mxu0 %vm4851_vm2, %v4850_v1  ;;  %4086 = vmatpush3.msk.msra.mxu0 %vm2329_vm11, %v2318_v8 }
0x1480   :  { %v2063_v61 = vpop.permute.xlu1 %2062  ;;  %4087 = vmatprep.subr.mxu0 %v4850_v1 }
0x1481   :  { %4064 = vmatmul.mubr.msk.f32.vlgmr.msra.gmra.mxu1 %vm469_vm9, %v2063_v61  ;;  %4088 = vmatpush3.msra.mxu0 %v2317_v30 }
0x1482   :  { %4067 = vmatpush3.msra.mxu1 %v5603_v17  ;;  %4082 = vmatprep.mubr.msk.f32.mxu1 %vm4851_vm2, %v4850_v1 }
0x1483   :  { %4068 = vmatprep.subr.mxu1 %v4850_v1  ;;  %4098 = vmatprep.subr.mxu0 %v4850_v1 }
0x1484   :  { %4069 = vmatpush3.msra.mxu1 %v5610_v18 }
0x1485   :  { %4070 = vmatprep.subr.mxu1 %v4850_v1 }
0x1486   :  { %4071 = vmatpush3.msra.mxu1 %v5616_v2 }
0x1487   :  { %4072 = vmatprep.subr.mxu1 %v4850_v1 }
0x1488   :  { %4073 = vmatpush3.msra.mxu1 %v5622_v25 }
0x1489   :  { %4074 = vmatprep.subr.mxu1 %v4850_v1 }
0x148a   :  { %4075 = vmatpush3.msra.mxu1 %v5627_v57 }
0x148b   :  { %4076 = vmatprep.subr.mxu1 %v4850_v1 }
0x148c   :  { %4077 = vmatpush3.msra.mxu1 %v5631_v19 }
0x148d   :  { %4078 = vmatprep.subr.mxu1 %v4850_v1 }
0x148e   :  { %4079 = vmatpush3.msra.mxu1 %v5635_v21 }
0x148f   :  { %4080 = vmatprep.subr.mxu1 %v4850_v1 }
0x1490   :  { %4081 = vmatpush3.msra.mxu1 %v5639_v5 }
0x1491   :  { %4274 = vmatprep.subr.mxu1 %v4850_v1 }
0x153e   :  { %v2020_v13 = vpop.f32.mrf.mxu0 }
0x153f   :  { %v2021_v17 = vadd.f32 %v5714_v14, %v2020_v13 }
0x1540   :  { %v4054_v18 = vpop.f32.mrf.mxu0 }
0x1541   :  { %4410 = vtanh.f32 %v2021_v17  ;;  %v2132_v2 = vpop.f32.mrf.mxu1  ;;  %v3581_v5 = vmul.f32 -1.442695, %v2021_v17 }
0x1542   :  { %v2137_v25 = vrot.slane %v2132_v2, 4 }
0x1543   :  { %v4065_v57 = vpop.f32.mrf.mxu1 }
0x1544   :  { %v2139_v19 = vadd.f32 %v2137_v25, %v5644_v42 }
0x1546   :  { %4412 = vtanh.f32 %v2139_v19  ;;  %v3583_v41 = vmul.f32 -1.442695, %v2139_v19 }
0x1547   :  { %4414 = vpow2.f32 %v3581_v5  ;;  %v5799_v5 = vld [vmem:[#allocation2 + $0x8] sm:$0xff] }
0x1548   :  { %4416 = vpow2.f32 %v3583_v41  ;;  %v5805_v41 = vld [vmem:[#allocation2 + $0x10] sm:$0xff] }
0x154e   :  { %v4411_v21 = vpop.eup %4410 }
0x154f   :  { %2033 = vrot.lane.b32.xlu0 %v4411_v21, %s4852_s30 }
0x1553   :  { %v4413_v40 = vpop.eup %4412 }
0x1554   :  { %2152 = vrot.lane.b32.xlu1 %v4413_v40, %s4852_s30  ;;  %v4415_v43 = vpop.eup %4414 }
0x1555   :  { %v2027_v46 = vadd.f32 1.0, %v4415_v43  ;;  %v4417_v10 = vpop.eup %4416  ;;  %v2417_v43 = vld [vmem:[#allocation13 + $0x8] sm:$0x7] }
0x1556   :  { %v2143_v12 = vadd.f32 1.0, %v4417_v10 }
0x1557   :  { %4418 = vrcp.f32 %v2027_v46  ;;  %v2416_v46 = vld [vmem:[#allocation13] sm:$0xff] }
0x1558   :  { %4420 = vrcp.f32 %v2143_v12  ;;  %v2282_v12 = vsel %vm2281_vm4, %v5571_v51, -inf }
0x1564   :  { %v4419_v47 = vpop.eup %4418 }
0x1565   :  { %v4421_v48 = vpop.eup %4420  ;;  %v2031_v22 = vmul.f32 %v4419_v47, %v5726_v60 }
0x1566   :  { %v2150_v26 = vmul.f32 %v4421_v48, %v2148_v27 }
0x15c1   :  { %v2034_v50 = vpop.permute.xlu0 %2033 }
0x15c2   :  { %v2036_v42 = vmul.f32 %v4419_v47, %v2034_v50 }
0x15c4   :  { %2038 = vrot.lane.b32.xlu0 %v2036_v42, %s4853_s11 }
0x15c6   :  { %v2153_v58 = vpop.permute.xlu1 %2152 }
0x15c7   :  { %v2155_v49 = vmul.f32 %v4421_v48, %v2153_v58 }
0x15c9   :  { %2157 = vrot.lane.b32.xlu1 %v2155_v49, %s4853_s11 }
0x1636   :  { %v2039_v23 = vpop.permute.xlu0 %2038 }
0x1637   :  { %v5729_v24 = vadd.f32 %v2039_v23, %v2031_v22 }
0x1639   :  { %4422 = vtanh.f32 %v5729_v24 }
0x163b   :  { %v2158_v59 = vpop.permute.xlu1 %2157 }
0x163c   :  { %v2160_v28 = vadd.f32 %v2158_v59, %v2150_v26 }
0x163e   :  { %4424 = vtanh.f32 %v2160_v28 }
0x1646   :  { %v4423_v55 = vpop.eup %4422 }
0x1647   :  { %2044 = vrot.lane.b32.xlu0 %v4423_v55, %s4852_s30 }
0x164b   :  { %v4425_v31 = vpop.eup %4424  ;;  %2300 = vperm.xlu0 %4304, %v2296_v53  }
0x164c   :  { %2163 = vrot.lane.b32.xlu1 %v4425_v31, %s4852_s30 }
0x16b9   :  { %v2045_v32 = vpop.permute.xlu0 %2044 }
0x16ba   :  { %v2047_v34 = vmul.f32 %v4419_v47, %v2045_v32  ;;  %v2283_v47 = vrot.slane %v2282_v12, 4 }
0x16bc   :  { %v5744_v35 = vsel %vm2052_vm8, %v2047_v34, %v5683_v63  ;;  %v2284_v42 = vmax.f32 %v2282_v12, %v2283_v47 }
0x16bd   :  { %v2172_v36 = vrot.slane %v5744_v35, 4 }
0x16be   :  { %v2164_v20 = vpop.permute.xlu1 %2163  ;;  %v2285_v58 = vrot.slane %v2284_v42, 2 }
0x16bf   :  { %v2166_v37 = vmul.f32 %v4421_v48, %v2164_v20  ;;  %2173 = vrot.lane.b32.xlu0 %v2172_v36, %s4852_s30  ;;  %v2059_v20 = vsel %vm2052_vm8, %v5729_v24, %v5726_v60  ;;  %v2419_v60 = vld [vmem:[%s6061_s14] sm:$0xff] }
0x16c0   :  { %v2286_v49 = vmax.f32 %v2284_v42, %v2285_v58 }
0x16c1   :  { %2168 = vrot.lane.b32.xlu1 %v2166_v37, %s4853_s11 }
0x16c2   :  { %v2287_v22 = vrot.slane %v2286_v49, 1 }
0x16c3   :  { %2303 = vperm.xlu0 %4304, %v2297_v39  }
0x16c4   :  { %v2288_v23 = vmax.f32 %v2286_v49, %v2287_v22  ;;  %v2723_v22 = vld [vmem:[#allocation18 + $0x8] sm:$0x7] }
0x16c5   :  { %2306 = vperm.xlu1 %4305, %v2298_v16  }
0x16c6   :  { %v2301_v52 = vpop.permute.xlu0 %2300  ;;  %vm2289_vm5 = vcmp.eq.f32.partialorder %v5571_v51, %v2288_v23 }
0x16c7   :  { %vm2308_vm13 = vcmp.eq.s32.totalorder %v2301_v52, %v5127_v15  ;;  %v2290_v28 = vsel %vm2289_vm5, 1, %v4849_v0 }
0x16c8   :  { %v3586_v45 = vsel %vm2308_vm13, 1.0, %v4850_v1 }
0x16c9   :  { %3087 = vperm.xlu1 %4305, %v3085_v3   ;;  %4090 = vmatmul.mubr.msk.f32.vlgmr.msra.gmra.mxu0 %vm2319_vm12, %v3586_v45  ;;  %v2421_v3 = vld [vmem:[%s6061_s14 + $0x10] sm:$0x3f] }
0x16ca   :  { %4092 = vmatprep.mubr.msk.f32.mxu0 %vm4851_vm2, %v4850_v1 }
0x1731   :  { %v2174_v29 = vpop.permute.xlu0 %2173 }
0x1733   :  { %v2169_v7 = vpop.permute.xlu1 %2168 }
0x1734   :  { %v2176_v33 = vsel %vm469_vm9, %v2169_v7, %v2174_v29 }
0x1735   :  { %v2178_v62 = vrot.slane %v2176_v33, 4 }
0x1737   :  { %4083 = vmatmul.mubr.msk.f32.vlgmr.msra.gmra.mxu1 %vm579_vm10, %v2178_v62  ;;  %vm2060_vm10 = vcmp.ge.f32.partialorder %v5571_v51, 8.0 }
0x1738   :  { %4276 = vmatpush3.msk.msra.mxu1 %vm2329_vm11, %v2318_v8  ;;  %4095 = vmatprep.mubr.msk.f32.mxu1 %vm4851_vm2, %v4850_v1  ;;  %v2275_v40 = vsel %vm2060_vm10, 1, %v4849_v0 }
0x1739   :  { %4275 = vmatprep.subr.mxu1 %v4850_v1 }
0x173a   :  { %4277 = vmatpush3.msra.mxu1 %v2317_v30 }
0x173b   :  { %4113 = vmatprep.subr.mxu1 %v4850_v1 }
0x173e   :  { %v2304_v63 = vpop.permute.xlu0 %2303 }
0x173f   :  { %vm2309_vm14 = vcmp.eq.s32.totalorder %v2304_v63, %v5127_v15  ;;  %v3596_v63 = vld [vmem:[#allocation15] ss:$0 sm:$0xff] }
0x1740   :  { %v3587_v56 = vsel %vm2309_vm14, 1.0, %v4850_v1  ;;  %v2307_v38 = vpop.permute.xlu1 %2306  ;;  %vm3092_vm14 = vcmask 31744  }
0x1741   :  { %vm2310_vm15 = vcmp.eq.s32.totalorder %v2307_v38, %v5127_v15  ;;  %4093 = vmatmul.mubr.msk.f32.gmra.mxu0 %vm2319_vm12, %v3587_v56 }
0x1742   :  { %v3588_v44 = vsel %vm2310_vm15, 1.0, %v4850_v1  ;;  %4104 = vmatprep.mubr.msk.f32.mxu0 %vm4851_vm2, %v4850_v1 }
0x1743   :  { %4096 = vmatmul.mubr.msk.f32.vlgmr.msra.gmra.mxu1 %vm2319_vm12, %v3588_v44  ;;  %vm2625_vm12 = vcmask 179200  }
0x1744   :  { %4117 = vmatprep.mubr.msk.f32.mxu1 %vm4851_vm2, %v4850_v1  ;;  %4114 = vmatpush3.msk.msra.mxu1 %vm2532_vm3, %v2417_v43  ;;  %v5829_v36 = vpop.permute.xlu1 %3087 }
0x1745   :  { %4115 = vmatprep.subr.mxu1 %v4850_v1  ;;  %vm3089_vm13 = vcmp.eq.s32.totalorder %v5829_v36, %v5127_v15  ;;  %v3169_v15 = vld [vmem:[#allocation22] sm:$0xff] }
0x1746   :  { %4116 = vmatpush3.msra.mxu1 %v2416_v46 }
0x1747   :  { %4126 = vmatprep.subr.mxu1 %v4850_v1 }
0x1789   :  { %v5780_v4 = vpop.f32.mrf.mxu0 }
0x178a   :  { %v2423_v21 = vmax.f32 %v5780_v4, 0.0 }
0x178b   :  { %v4091_v9 = vpop.f32.mrf.mxu0 }
0x17f7   :  { %v2247_v6 = vpop.f32.mrf.mxu1 }
0x17f8   :  { %v2248_v11 = vadd.f32 %v5714_v14, %v2247_v6  ;;  %v5790_v14 = vld [vmem:[#allocation2] sm:$0xff] }
0x17f9   :  { %v4084_v61 = vpop.f32.mrf.mxu1 }
0x17fa   :  { %4426 = vtanh.f32 %v2248_v11  ;;  %v3585_v10 = vmul.f32 -1.442695, %v2248_v11 }
0x17fc   :  { %4428 = vpow2.f32 %v3585_v10 }
0x1801   :  { %v2404_v13 = vpop.f32.mrf.mxu0 }
0x1802   :  { %v2424_v57 = vmax.f32 %v2404_v13, 0.0 }
0x1803   :  { %v4094_v17 = vpop.f32.mrf.mxu0  ;;  %v5783_v18 = vpop.f32.mrf.mxu1 }
0x1804   :  { %v2425_v2 = vmax.f32 %v5783_v18, 0.0 }
0x1805   :  { %v4097_v25 = vpop.f32.mrf.mxu1 }
0x1806   :  { %4099 = vmatpush3.msra.mxu0 %v2425_v2 }
0x1807   :  { %v4427_v19 = vpop.eup %4426  ;;  %4100 = vmatprep.subr.mxu0 %v4850_v1 }
0x1808   :  { %2260 = vrot.lane.b32.xlu0 %v4427_v19, %s4852_s30  ;;  %4101 = vmatpush3.msra.mxu0 %v2424_v57  ;;  %v3601_v19 = vld [vmem:[#allocation16] ss:$0 sm:$0xff] }
0x1809   :  { %4102 = vmatprep.subr.mxu0 %v4850_v1  ;;  %v4429_v50 = vpop.eup %4428 }
0x180a   :  { %4103 = vmatpush3.msra.mxu0 %v2423_v21  ;;  %v2254_v48 = vadd.f32 1.0, %v4429_v50 }
0x180b   :  { %4105 = vmatmul.mubr.msk.f32.vlgmr.msra.gmra.mxu0 %vm2426_vm1, %v5790_v14  ;;  %4141 = vmatprep.subr.mxu0 %v4850_v1 }
0x180c   :  { %2277 = vperm.xlu0 %4304, %v2275_v40   ;;  %4107 = vmatprep.mubr.msk.f32.mxu0 %vm4851_vm2, %v4850_v1  ;;  %4430 = vrcp.f32 %v2254_v48 }
0x180f   :  { %4108 = vmatmul.mubr.msk.f32.gmra.mxu0 %vm2426_vm1, %v5799_v5 }
0x1810   :  { %4110 = vmatprep.mubr.msk.f32.mxu0 %vm4851_vm2, %v4850_v1 }
0x1813   :  { %4111 = vmatmul.mubr.msk.f32.gmra.mxu0 %vm2426_vm1, %v5805_v41 }
0x1814   :  { %4147 = vmatprep.mubr.msk.f32.mxu0 %vm4851_vm2, %v4850_v1 }
0x1819   :  { %v4431_v27 = vpop.eup %4430 }
0x181a   :  { %v2258_v37 = vmul.f32 %v4431_v27, %v2059_v20 }
0x187a   :  { %v2261_v26 = vpop.permute.xlu0 %2260 }
0x187b   :  { %v2263_v59 = vmul.f32 %v4431_v27, %v2261_v26 }
0x187d   :  { %2265 = vrot.lane.b32.xlu1 %v2263_v59, %s4853_s11 }
0x1881   :  { %2292 = vperm.xlu1 %4305, %v2290_v28  }
0x1887   :  { %v2278_v24 = vpop.permute.xlu0 %2277 }
0x1888   :  { %vm2279_vm8 = vcmp.eq.s32.totalorder %v2278_v24, 1 }
0x18cb   :  { %v2502_v8 = vpop.f32.mrf.mxu0 }
0x18cc   :  { %v2503_v55 = vadd.f32 %v2502_v8, %v5780_v4 }
0x18cd   :  { %v4106_v53 = vpop.f32.mrf.mxu0 }
0x18ce   :  { %4118 = vmatmul.mubr.msk.f32.vlgmr.msra.gmra.mxu1 %vm2522_vm6, %v2503_v55  ;;  %v2727_v53 = vld [vmem:[%s6065_s18 + $0x10] sm:$0x3f] }
0x18cf   :  { %v2507_v30 = vpop.f32.mrf.mxu0  ;;  %4120 = vmatprep.mubr.msk.f32.mxu1 %vm4851_vm2, %v4850_v1  ;;  %4127 = vmatpush3.msk.msra.mxu1 %vm2635_vm7, %v2421_v3 }
0x18d0   :  { %v2508_v31 = vadd.f32 %v2507_v30, %v2404_v13  ;;  %4128 = vmatprep.subr.mxu1 %v4850_v1  ;;  %v2726_v30 = vld [vmem:[%s6065_s18 + $0x8] sm:$0xff] }
0x18d1   :  { %v4109_v32 = vpop.f32.mrf.mxu0  ;;  %4129 = vmatpush3.msra.mxu1 %v2420_v54 }
0x18d2   :  { %4121 = vmatmul.mubr.msk.f32.gmra.mxu1 %vm2522_vm6, %v2508_v31  ;;  %4130 = vmatprep.subr.mxu1 %v4850_v1  ;;  %v2725_v31 = vld [vmem:[%s6065_s18] sm:$0xff]  ;;  %v3609_v32 = vld [vmem:[#allocation19] ss:$0 sm:$0xff] }
0x18d3   :  { %v2512_v51 = vpop.f32.mrf.mxu0  ;;  %4123 = vmatprep.mubr.msk.f32.mxu1 %vm4851_vm2, %v4850_v1  ;;  %4131 = vmatpush3.msra.mxu1 %v2419_v60 }
0x18d4   :  { %v2513_v0 = vadd.f32 %v2512_v51, %v5783_v18  ;;  %4156 = vmatprep.subr.mxu1 %v4850_v1 }
0x18d5   :  { %v4112_v34 = vpop.f32.mrf.mxu0 }
0x18d6   :  { %4124 = vmatmul.mubr.msk.f32.gmra.mxu1 %vm2522_vm6, %v2513_v0 }
0x18d7   :  { %4132 = vmatprep.mubr.msk.f32.mxu1 %vm4851_vm2, %v4850_v1 }
0x18ef   :  { %v2266_v39 = vpop.permute.xlu1 %2265 }
0x18f0   :  { %v2268_v16 = vadd.f32 %v2266_v39, %v2258_v37 }
0x18f2   :  { %4432 = vtanh.f32 %v2268_v16 }
0x18fc   :  { %v2293_v45 = vpop.permute.xlu1 %2292 }
0x18fd   :  { %vm2294_vm11 = vcmp.eq.s32.totalorder %v2293_v45, 1 }
0x18ff   :  { %v4433_v52 = vpop.eup %4432 }
0x1900   :  { %2271 = vrot.lane.b32.xlu0 %v4433_v52, %s4852_s30 }
0x1972   :  { %v2272_v29 = vpop.permute.xlu0 %2271 }
0x1973   :  { %v2274_v7 = vmul.f32 %v4431_v27, %v2272_v29 }
0x1975   :  { %v2280_v33 = vsel %vm2279_vm8, %v2274_v7, %v5744_v35 }
0x1976   :  { %v2295_v62 = vsel %vm2294_vm11, %v2280_v33, 0.0 }
0x1977   :  { %3252 = vrot.lane.b32.xlu1 %v2295_v62, %s4853_s11  ;;  %v3614_v62 = vld [vmem:[#allocation21] ss:$0 sm:$0xff] }
0x198e   :  { %v2602_v56 = vpop.f32.mrf.mxu1 }
0x198f   :  { %v2603_v38 = vadd.f32 %v3596_v63, %v2602_v56 }
0x1990   :  { %v4119_v44 = vpop.f32.mrf.mxu1 }
0x1991   :  { %v2616_v4 = vmax.f32 %v2603_v38, 0.0 }
0x1992   :  { %v2607_v9 = vpop.f32.mrf.mxu1 }
0x1993   :  { %v2608_v6 = vadd.f32 %v3596_v63, %v2607_v9  ;;  %4133 = vmatmul.mubr.msk.f32.vlgmr.msra.gmra.mxu1 %vm2625_vm12, %v2616_v4  ;;  %v3011_v9 = vld [vmem:[%s6101_s22] sm:$0xf] }
0x1994   :  { %v4122_v11 = vpop.f32.mrf.mxu1  ;;  %4135 = vmatprep.mubr.msk.f32.mxu1 %vm4851_vm2, %v4850_v1  ;;  %4157 = vmatpush3.msk.msra.mxu1 %vm2532_vm3, %v2723_v22  ;;  %v3336_v22 = vld [vmem:[%s6070_s23 + $0x8] sm:$0xff] }
0x1995   :  { %v2617_v61 = vmax.f32 %v2608_v6, 0.0  ;;  %4158 = vmatprep.subr.mxu1 %v4850_v1  ;;  %v3174_v6 = vld [vmem:[#allocation24 + $0x8] sm:$0x7] }
0x1996   :  { %v2612_v13 = vpop.f32.mrf.mxu1 }
0x1997   :  { %v2613_v35 = vadd.f32 %v3596_v63, %v2612_v13  ;;  %4136 = vmatmul.mubr.msk.f32.gmra.mxu1 %vm2625_vm12, %v2617_v61  ;;  %v3172_v61 = vld [vmem:[#allocation22 + $0x18] sm:$0xff]  ;;  %v3620_v13 = vsel %vm3089_vm13, 1.0, %v4850_v1 }
0x1998   :  { %v4125_v17 = vpop.f32.mrf.mxu1  ;;  %4138 = vmatprep.mubr.msk.f32.mxu1 %vm4851_vm2, %v4850_v1 }
0x1999   :  { %v2618_v18 = vmax.f32 %v2613_v35, 0.0  ;;  %v3171_v17 = vld [vmem:[#allocation22 + $0x10] sm:$0xff] }
0x199b   :  { %4139 = vmatmul.mubr.msk.f32.gmra.mxu1 %vm2625_vm12, %v2618_v18  ;;  %v3170_v18 = vld [vmem:[#allocation22 + $0x8] sm:$0xff] }
0x199c   :  { %4160 = vmatprep.mubr.msk.f32.mxu1 %vm4851_vm2, %v4850_v1 }
0x19e9   :  { %v3253_v36 = vpop.permute.xlu1 %3252 }
0x1a53   :  { %v2705_v2 = vpop.f32.mrf.mxu1 }
0x1a54   :  { %v2706_v46 = vadd.f32 %v3601_v19, %v2705_v2  ;;  %v3173_v2 = vld [vmem:[#allocation24] sm:$0xff] }
0x1a55   :  { %v4134_v25 = vpop.f32.mrf.mxu1 }
0x1a56   :  { %v2719_v42 = vmax.f32 %v2706_v46, 0.0  ;;  %v3347_v25 = vld [vmem:[%s6070_s23 + $0x60] sm:$0xf] }
0x1a57   :  { %v2710_v57 = vpop.f32.mrf.mxu1  ;;  %v3343_v46 = vld [vmem:[%s6070_s23 + $0x40] sm:$0xff] }
0x1a58   :  { %v2711_v40 = vadd.f32 %v3601_v19, %v2710_v57  ;;  %v2729_v49 = vmax.f32 %v2719_v42, 0.0 }
0x1a59   :  { %v4137_v21 = vpop.f32.mrf.mxu1 }
0x1a5a   :  { %v2720_v47 = vmax.f32 %v2711_v40, 0.0  ;;  %v3345_v40 = vld [vmem:[%s6070_s23 + $0x50] sm:$0xff] }
0x1a5b   :  { %v2715_v43 = vpop.f32.mrf.mxu1 }
0x1a5c   :  { %v2716_v10 = vadd.f32 %v3601_v19, %v2715_v43  ;;  %v2730_v58 = vmax.f32 %v2720_v47, 0.0  ;;  %v3346_v19 = vld [vmem:[%s6070_s23 + $0x58] sm:$0xff]  ;;  %v3344_v43 = vld [vmem:[%s6070_s23 + $0x48] sm:$0xff] }
0x1a5d   :  { %v4140_v12 = vpop.f32.mrf.mxu1 }
0x1a5e   :  { %v2721_v50 = vmax.f32 %v2716_v10, 0.0  ;;  %v3342_v12 = vld [vmem:[%s6070_s23 + $0x38] sm:$0xff] }
0x1a60   :  { %v2731_v48 = vmax.f32 %v2721_v50, 0.0 }
0x1a62   :  { %4142 = vmatpush3.msra.mxu0 %v2731_v48  ;;  %v3339_v48 = vld [vmem:[%s6070_s23 + $0x20] sm:$0xff] }
0x1a63   :  { %4143 = vmatprep.subr.mxu0 %v4850_v1 }
0x1a64   :  { %4144 = vmatpush3.msra.mxu0 %v2730_v58  ;;  %v3338_v58 = vld [vmem:[%s6070_s23 + $0x18] sm:$0xff] }
0x1a65   :  { %4145 = vmatprep.subr.mxu0 %v4850_v1 }
0x1a66   :  { %4146 = vmatpush3.msra.mxu0 %v2729_v49  ;;  %v3337_v49 = vld [vmem:[%s6070_s23 + $0x10] sm:$0xff] }
0x1a67   :  { %4148 = vmatmul.mubr.msk.f32.vlgmr.msra.gmra.mxu0 %vm2426_vm1, %v5790_v14  ;;  %4169 = vmatprep.subr.mxu0 %v4850_v1  ;;  %v2722_v14 = vld [vmem:[#allocation18] sm:$0xff] }
0x1a68   :  { %4150 = vmatprep.mubr.msk.f32.mxu0 %vm4851_vm2, %v4850_v1  ;;  %4159 = vmatpush3.msra.mxu1 %v2722_v14  ;;  %v3335_v14 = vld [vmem:[%s6070_s23] sm:$0xff] }
0x1a69   :  { %4184 = vmatprep.subr.mxu1 %v4850_v1  ;;  %4170 = vmatpush3.msk.msra.mxu0 %vm2635_vm7, %v2727_v53  ;;  %v3436_v53 = vld [vmem:[%s6072_s25 + $0x18] sm:$0xff] }
0x1a6a   :  { %4171 = vmatprep.subr.mxu0 %v4850_v1 }
0x1a6b   :  { %4151 = vmatmul.mubr.msk.f32.gmra.mxu0 %vm2426_vm1, %v5799_v5 }
0x1a6c   :  { %4153 = vmatprep.mubr.msk.f32.mxu0 %vm4851_vm2, %v4850_v1  ;;  %4172 = vmatpush3.msra.mxu0 %v2726_v30 }
0x1a6d   :  { %4173 = vmatprep.subr.mxu0 %v4850_v1 }
0x1a6e   :  { %4174 = vmatpush3.msra.mxu0 %v2725_v31  ;;  %v3626_v31 = vld [vmem:[#allocation25] ss:$0 sm:$0xff] }
0x1a6f   :  { %4154 = vmatmul.mubr.msk.f32.gmra.mxu0 %vm2426_vm1, %v5805_v41  ;;  %4193 = vmatprep.subr.mxu0 %v4850_v1 }
0x1a70   :  { %4175 = vmatprep.mubr.msk.f32.mxu0 %vm4851_vm2, %v4850_v1 }
0x1b27   :  { %v2798_v23 = vpop.f32.mrf.mxu0 }
0x1b28   :  { %v2799_v5 = vadd.f32 %v2798_v23, %v2719_v42  ;;  %v3340_v42 = vld [vmem:[%s6070_s23 + $0x28] sm:$0xff]  ;;  %v3445_v23 = vld [vmem:[%s6072_s25 + $0x60] sm:$0xf] }
0x1b29   :  { %v4149_v27 = vpop.f32.mrf.mxu0 }
0x1b2a   :  { %4161 = vmatmul.mubr.msk.f32.vlgmr.msra.gmra.mxu1 %vm2522_vm6, %v2799_v5  ;;  %v3444_v5 = vld [vmem:[%s6072_s25 + $0x58] sm:$0xff]  ;;  %v3443_v27 = vld [vmem:[%s6072_s25 + $0x50] sm:$0xff] }
0x1b2b   :  { %v2803_v26 = vpop.f32.mrf.mxu0  ;;  %4163 = vmatprep.mubr.msk.f32.mxu1 %vm4851_vm2, %v4850_v1 }
0x1b2c   :  { %v2804_v41 = vadd.f32 %v2803_v26, %v2720_v47  ;;  %v3442_v26 = vld [vmem:[%s6072_s25 + $0x48] sm:$0xff] }
0x1b2d   :  { %v4152_v59 = vpop.f32.mrf.mxu0 }
0x1b2e   :  { %4164 = vmatmul.mubr.msk.f32.gmra.mxu1 %vm2522_vm6, %v2804_v41  ;;  %v3441_v41 = vld [vmem:[%s6072_s25 + $0x40] sm:$0xff]  ;;  %v3440_v59 = vld [vmem:[%s6072_s25 + $0x38] sm:$0xff] }
0x1b2f   :  { %v2808_v28 = vpop.f32.mrf.mxu0  ;;  %4166 = vmatprep.mubr.msk.f32.mxu1 %vm4851_vm2, %v4850_v1 }
0x1b30   :  { %v2809_v8 = vadd.f32 %v2808_v28, %v2721_v50  ;;  %v3341_v50 = vld [vmem:[%s6070_s23 + $0x30] sm:$0xff] }
0x1b31   :  { %v4155_v55 = vpop.f32.mrf.mxu0  ;;  %v3439_v28 = vld [vmem:[%s6072_s25 + $0x30] sm:$0xff] }
0x1b32   :  { %4167 = vmatmul.mubr.msk.f32.gmra.mxu1 %vm2522_vm6, %v2809_v8  ;;  %v3438_v8 = vld [vmem:[%s6072_s25 + $0x28] sm:$0xff]  ;;  %v3437_v55 = vld [vmem:[%s6072_s25 + $0x20] sm:$0xff] }
0x1b33   :  { %4190 = vmatprep.mubr.msk.f32.mxu1 %vm4851_vm2, %v4850_v1 }
0x1bea   :  { %v2896_v51 = vpop.f32.mrf.mxu1 }
0x1beb   :  { %v2897_v0 = vadd.f32 %v3609_v32, %v2896_v51 }
0x1bec   :  { %v4162_v34 = vpop.f32.mrf.mxu1 }
0x1bed   :  { %v2910_v20 = vmax.f32 %v2897_v0, 0.0 }
0x1bee   :  { %v2901_v37 = vpop.f32.mrf.mxu1 }
0x1bef   :  { %v2902_v39 = vadd.f32 %v3609_v32, %v2901_v37  ;;  %4176 = vmatmul.mubr.msk.f32.vlgmr.msra.gmra.mxu0 %vm2625_vm12, %v2910_v20  ;;  %v3435_v20 = vld [vmem:[%s6072_s25 + $0x10] sm:$0xff]  ;;  %v3434_v37 = vld [vmem:[%s6072_s25 + $0x8] sm:$0xff] }
0x1bf0   :  { %v4165_v16 = vpop.f32.mrf.mxu1  ;;  %4178 = vmatprep.mubr.msk.f32.mxu0 %vm4851_vm2, %v4850_v1 }
0x1bf1   :  { %v2911_v52 = vmax.f32 %v2902_v39, 0.0  ;;  %v3433_v39 = vld [vmem:[%s6072_s25] sm:$0xff]  ;;  %v3627_v16 = vld [vmem:[#allocation27] ss:$0 sm:$0xff] }
0x1bf2   :  { %v2906_v3 = vpop.f32.mrf.mxu1 }
0x1bf3   :  { %v2907_v54 = vadd.f32 %v3609_v32, %v2906_v3  ;;  %4179 = vmatmul.mubr.msk.f32.gmra.mxu0 %vm2625_vm12, %v2911_v52 }
0x1bf4   :  { %v4168_v60 = vpop.f32.mrf.mxu1  ;;  %4181 = vmatprep.mubr.msk.f32.mxu0 %vm4851_vm2, %v4850_v1 }
0x1bf5   :  { %v2912_v24 = vmax.f32 %v2907_v54, 0.0 }
0x1bf7   :  { %4182 = vmatmul.mubr.msk.f32.gmra.mxu0 %vm2625_vm12, %v2912_v24  ;;  %v3630_v24 = vld [vmem:[#allocation28] ss:$0 sm:$0xff] }
0x1bf8   :  { %4195 = vmatprep.mubr.msk.f32.mxu0 %vm4851_vm2, %v4850_v1 }
0x1caf   :  { %v2997_v45 = vpop.f32.mrf.mxu0 }
0x1cb0   :  { %v2998_v4 = vadd.f32 %v3614_v62, %v2997_v45 }
0x1cb1   :  { %v4177_v29 = vpop.f32.mrf.mxu0 }
0x1cb3   :  { %v3002_v7 = vpop.f32.mrf.mxu0 }
0x1cb4   :  { %v3003_v44 = vadd.f32 %v3614_v62, %v3002_v7 }
0x1cb5   :  { %v4180_v33 = vpop.f32.mrf.mxu0 }
0x1cb7   :  { %v3007_v63 = vpop.f32.mrf.mxu0 }
0x1cb8   :  { %v3008_v56 = vadd.f32 %v3614_v62, %v3007_v63 }
0x1cb9   :  { %v4183_v38 = vpop.f32.mrf.mxu0 }
0x1cba   :  { %4185 = vmatpush3.msra.mxu1 %v3008_v56 }
0x1cbb   :  { %4186 = vmatprep.subr.mxu1 %v4850_v1 }
0x1cbc   :  { %4187 = vmatpush3.msra.mxu1 %v3003_v44 }
0x1cbd   :  { %4188 = vmatprep.subr.mxu1 %v4850_v1 }
0x1cbe   :  { %4189 = vmatpush3.msra.mxu1 %v2998_v4 }
0x1cbf   :  { %4191 = vmatmul.mubr.msk.f32.vlgmr.msra.gmra.mxu1 %vm2426_vm1, %v3011_v9  ;;  %4198 = vmatprep.subr.mxu1 %v4850_v1 }
0x1cc0   :  { %4202 = vmatprep.mubr.msk.f32.mxu1 %vm4851_vm2, %v4850_v1  ;;  %4199 = vmatpush3.msk.msra.mxu1 %vm2532_vm3, %v3174_v6 }
0x1cc1   :  { %4200 = vmatprep.subr.mxu1 %v4850_v1 }
0x1cc2   :  { %4201 = vmatpush3.msra.mxu1 %v3173_v2 }
0x1cc3   :  { %4216 = vmatprep.subr.mxu1 %v4850_v1 }
0x1d7f   :  { %v3081_v11 = vpop.f32.mrf.mxu1 }
0x1d80   :  { %4194 = vmatpush3.msk.msra.mxu0 %vm365_vm0, %v3081_v11 }
0x1d81   :  { %v4192_v35 = vpop.f32.mrf.mxu1  ;;  %4196 = vmatmul.mubr.msk.f32.vlgmr.msra.gmra.mxu0 %vm3092_vm14, %v3620_v13  ;;  %4205 = vmatprep.subr.mxu0 %v4850_v1 }
0x1d82   :  { %4206 = vmatpush3.msra.mxu0 %v3172_v61  ;;  %4213 = vmatprep.mubr.msk.f32.mxu0 %vm4851_vm2, %v4850_v1 }
0x1d83   :  { %4207 = vmatprep.subr.mxu0 %v4850_v1 }
0x1d84   :  { %4208 = vmatpush3.msra.mxu0 %v3171_v17 }
0x1d85   :  { %4209 = vmatprep.subr.mxu0 %v4850_v1 }
0x1d86   :  { %4210 = vmatpush3.msra.mxu0 %v3170_v18 }
0x1d87   :  { %4211 = vmatprep.subr.mxu0 %v4850_v1 }
0x1d88   :  { %4212 = vmatpush3.msra.mxu0 %v3169_v15 }
0x1d89   :  { %4214 = vmatmul.mubr.msk.f32.vlgmr.msra.gmra.mxu0 %vm469_vm9, %v3253_v36  ;;  %4245 = vmatprep.subr.mxu0 %v4850_v1 }
0x1d8a   :  { %4271 = vmatprep.mubr.msk.f32.mxu0 %vm4851_vm2, %v4850_v1  ;;  %4246 = vmatpush3.msk.msra.mxu0 %vm365_vm0, %v3445_v23 }
0x1d8b   :  { %4247 = vmatprep.subr.mxu0 %v4850_v1 }
0x1d8c   :  { %4248 = vmatpush3.msra.mxu0 %v3444_v5 }
0x1d8d   :  { %4249 = vmatprep.subr.mxu0 %v4850_v1 }
0x1d8e   :  { %4250 = vmatpush3.msra.mxu0 %v3443_v27 }
0x1d8f   :  { %4251 = vmatprep.subr.mxu0 %v4850_v1 }
0x1d90   :  { %4252 = vmatpush3.msra.mxu0 %v3442_v26 }
0x1d91   :  { %4253 = vmatprep.subr.mxu0 %v4850_v1 }
0x1d92   :  { %4254 = vmatpush3.msra.mxu0 %v3441_v41 }
0x1d93   :  { %4255 = vmatprep.subr.mxu0 %v4850_v1 }
0x1d94   :  { %4256 = vmatpush3.msra.mxu0 %v3440_v59 }
0x1d95   :  { %4257 = vmatprep.subr.mxu0 %v4850_v1 }
0x1d96   :  { %4258 = vmatpush3.msra.mxu0 %v3439_v28 }
0x1d97   :  { %4259 = vmatprep.subr.mxu0 %v4850_v1 }
0x1d98   :  { %4260 = vmatpush3.msra.mxu0 %v3438_v8 }
0x1d99   :  { %4261 = vmatprep.subr.mxu0 %v4850_v1 }
0x1d9a   :  { %4262 = vmatpush3.msra.mxu0 %v3437_v55 }
0x1d9b   :  { %4263 = vmatprep.subr.mxu0 %v4850_v1 }
0x1d9c   :  { %4264 = vmatpush3.msra.mxu0 %v3436_v53 }
0x1d9d   :  { %4265 = vmatprep.subr.mxu0 %v4850_v1 }
0x1d9e   :  { %4266 = vmatpush3.msra.mxu0 %v3435_v20 }
0x1d9f   :  { %4267 = vmatprep.subr.mxu0 %v4850_v1 }
0x1da0   :  { %4268 = vmatpush3.msra.mxu0 %v3434_v37 }
0x1da1   :  { %4269 = vmatprep.subr.mxu0 %v4850_v1 }
0x1da2   :  { %4270 = vmatpush3.msra.mxu0 %v3433_v39 }
0x1e41   :  { %v3165_v57 = vpop.f32.mrf.mxu0 }
0x1e42   :  { %4203 = vmatmul.mubr.msk.f32.vlgmr.msra.gmra.mxu1 %vm2522_vm6, %v3165_v57 }
0x1e43   :  { %v4197_v21 = vpop.f32.mrf.mxu0  ;;  %4217 = vmatpush3.msk.msra.mxu1 %vm365_vm0, %v3347_v25  ;;  %4242 = vmatprep.mubr.msk.f32.mxu1 %vm4851_vm2, %v4850_v1  ;;  %vm3355_vm0 = vcmask 818176  }
0x1e44   :  { %4218 = vmatprep.subr.mxu1 %v4850_v1 }
0x1e45   :  { %4219 = vmatpush3.msra.mxu1 %v3346_v19 }
0x1e46   :  { %4220 = vmatprep.subr.mxu1 %v4850_v1 }
0x1e47   :  { %4221 = vmatpush3.msra.mxu1 %v3345_v40 }
0x1e48   :  { %4222 = vmatprep.subr.mxu1 %v4850_v1 }
0x1e49   :  { %v3322_v10 = vpop.f32.mrf.mxu0  ;;  %4223 = vmatpush3.msra.mxu1 %v3344_v43 }
0x1e4a   :  { %4224 = vmatprep.subr.mxu1 %v4850_v1 }
0x1e4b   :  { %v4215_v47 = vpop.f32.mrf.mxu0  ;;  %4225 = vmatpush3.msra.mxu1 %v3343_v46 }
0x1e4c   :  { %4226 = vmatprep.subr.mxu1 %v4850_v1 }
0x1e4d   :  { %4227 = vmatpush3.msra.mxu1 %v3342_v12 }
0x1e4e   :  { %4228 = vmatprep.subr.mxu1 %v4850_v1 }
0x1e4f   :  { %4229 = vmatpush3.msra.mxu1 %v3341_v50 }
0x1e50   :  { %4230 = vmatprep.subr.mxu1 %v4850_v1 }
0x1e51   :  { %4231 = vmatpush3.msra.mxu1 %v3340_v42 }
0x1e52   :  { %4232 = vmatprep.subr.mxu1 %v4850_v1 }
0x1e53   :  { %4233 = vmatpush3.msra.mxu1 %v3339_v48 }
0x1e54   :  { %4234 = vmatprep.subr.mxu1 %v4850_v1 }
0x1e55   :  { %4235 = vmatpush3.msra.mxu1 %v3338_v58 }
0x1e56   :  { %4236 = vmatprep.subr.mxu1 %v4850_v1 }
0x1e57   :  { %4237 = vmatpush3.msra.mxu1 %v3337_v49 }
0x1e58   :  { %4238 = vmatprep.subr.mxu1 %v4850_v1 }
0x1e59   :  { %4239 = vmatpush3.msra.mxu1 %v3336_v22 }
0x1e5a   :  { %4240 = vmatprep.subr.mxu1 %v4850_v1 }
0x1e5b   :  { %4241 = vmatpush3.msra.mxu1 %v3335_v14 }
0x1f02   :  { %v3247_v30 = vpop.f32.mrf.mxu1 }
0x1f03   :  { %v3323_v32 = vadd.f32 %v3322_v10, %v3247_v30 }
0x1f04   :  { %v4204_v51 = vpop.f32.mrf.mxu1 }
0x1f05   :  { %v3333_v0 = vadd.f32 %v3626_v31, %v3323_v32 }
0x1f07   :  { %v3334_v34 = vmax.f32 %v3333_v0, 0.0 }
0x1f09   :  { %4243 = vmatmul.mubr.msk.f32.vlgmr.msra.gmra.mxu1 %vm3355_vm0, %v3334_v34 }
0x1fc9   :  { %v3428_v52 = vpop.f32.mrf.mxu1 }
0x1fca   :  { %v3429_v3 = vadd.f32 %v3627_v16, %v3428_v52 }
0x1fcb   :  { %v4244_v54 = vpop.f32.mrf.mxu1 }
0x1fcc   :  { %v3432_v60 = vmax.f32 %v3429_v3, 0.0 }
0x1fce   :  { %4272 = vmatmul.mubr.msk.f32.vlgmr.msra.gmra.mxu0 %vm3355_vm0, %v3432_v60 }
0x208e   :  { %v3525_v45 = vpop.f32.mrf.mxu0 }
0x208f   :  { %v3526_v29 = vadd.f32 %v3630_v24, %v3525_v45 }
0x2090   :  { %v4273_v7 = vpop.f32.mrf.mxu0 }
0x2091   :  { %3529 = vst [vmem:[%s6074_s27] sm:$0xf] %v3526_v29 }
0x2092   :  { %3534 = vsyncpa [#allocation3], 1 }
0x2093   :  { %3535 = vsyncpa [#allocation5], 1 }
0x2094   :  { %3536 = vsyncpa [#allocation8], 1 }
0x2095   :  { %3537 = vsyncpa [#allocation11], 1 }
0x2096   :  { %3538 = vsyncpa [#allocation14], 1 }
0x2097   :  { %3539 = vsyncpa [#allocation17], 1 }
0x2098   :  { %3540 = vsyncpa [#allocation20], 1 }
0x2099   :  { %3541 = vsyncpa [#allocation23], 1 }
0x209a   :  { %3542 = vsyncpa [#allocation26], 1 }
0x209b   :  { %3543 = vsyncpa [#allocation29], 1 }

</bundles_post_ra>
